<compile_context>
chip_gen: v6e
topology: v6e:2x2x1
jax: 0.10.0
libtpu: 0.0.40
codegen_flags: <defaults>
</compile_context>

<pallas_src>
import functools

import jax
import jax.numpy as jnp
from jax.experimental import pallas as pl
from jax.experimental.pallas import tpu as pltpu


# -----------------------------------------------------------------------------------
# Fused kernel: AvgPool2 -> (1x1 conv + shortcut) matmul -> relu_poly -> depthwise KxK
# Grid is (N, Ho//TH); the batch dim is squeezed out of every ref.
# -----------------------------------------------------------------------------------
def _block_kernel(x_ref, w_ref, b_ref, coef_ref, mask_ref, dww_ref, dwb_ref,
                  y_ref, fm_ref, fmp_ref, *, k, pad, th, ho, fold_w):
    t = pl.program_id(1)
    hw = th + 2 * pad                      # fm rows computed this step (tile + halo)
    wo = y_ref.shape[1]
    cout = y_ref.shape[2]

    # ---- x window for this tile's fm rows (+halo).  x_ref holds the whole row-padded image
    #      (index constant along the tile axis -> fetched once per image); rows are the cheap
    #      major axis, so this is a dynamic major-axis slice. ------------------------------
    xw = x_ref[pl.ds(pl.multiple_of(t * (2 * th), 2 * th), 2 * hw), :, :]

    # ---- AvgPool2d(2): H pair-sum (major-axis reshape + slices, layout-trivial). ----------
    xs = xw.reshape(hw, 2, xw.shape[1], xw.shape[2])
    xh = xs[:, 0] + xs[:, 1]

    if fold_w:
        # W pair-sum folded into the matmul: wrapper pre-regrouped x to (..., Wo, 2*Cin) and
        # stacked the (0.25-scaled) weight twice along the contraction.
        lhs = xh.reshape(hw * wo, xh.shape[-1])
    else:
        # Fallback for large Cin: explicit even/odd W pair-sum (sublane deinterleave).
        xp = xh.reshape(hw, wo, 2, xh.shape[-1])
        lhs = (xp[:, :, 0, :] + xp[:, :, 1, :]).reshape(hw * wo, xh.shape[-1])

    # ---- 1x1 conv + zero-padded shortcut in ONE MXU matmul (weight = 0.25*(W^T + [I|0])). --
    z = jnp.dot(lhs.astype(w_ref.dtype), w_ref[...],
                preferred_element_type=jnp.float32) + b_ref[...]          # (hw*wo, cout) f32

    # ---- relu_poly: mask-blended per-channel polynomial (all f32 elementwise). ------------
    c = coef_ref[...]                                                     # (3, cout) = w*factor
    c0 = c[0].reshape(1, cout)
    c1 = c[1].reshape(1, cout)
    c2 = c[2].reshape(1, cout)
    poly = (c0 * z + c1) * z + c2                                         # Horner
    m = mask_ref[pl.ds(pl.multiple_of(t * th, th), hw), :, :]
    m = m.reshape(hw * wo, cout).astype(jnp.float32)
    fm = poly + m * (jnp.maximum(z, 0.0) - poly)                          # == m*relu + (1-m)*poly
    fm = fm.reshape(hw, wo, cout)

    # ---- zero out-of-image halo rows (the depthwise 'same' padding along H). --------------
    g = jax.lax.broadcasted_iota(jnp.int32, (hw, 1, 1), 0) + (t * th - pad)
    fm = fm * ((g >= 0) & (g < ho)).astype(jnp.float32)

    # fm output = this tile's own rows (always in-image).
    fm_ref[...] = fm[pad:pad + th].astype(fm_ref.dtype)

    # ---- depthwise KxK conv, padding=pad, groups=cout. -------------------------------------
    # Window-sized padded scratch: only the 2*pad border columns are zeroed; the interior and
    # all rows are fully rewritten every step, so no stale data (megacore-safe).
    fmp_ref[:, :pad, :] = jnp.zeros((hw, pad, cout), jnp.float32)
    fmp_ref[:, pad + wo:pad + wo + pad, :] = jnp.zeros((hw, pad, cout), jnp.float32)
    fmp_ref[:, pad:pad + wo, :] = fm

    w_all = dww_ref[...]                                                  # (k*k, cout)
    w_taps = [w_all[tap].reshape(1, 1, cout) for tap in range(k * k)]     # hoisted broadcasts
    sr = 8 if th % 8 == 0 else th                                         # sublane-aligned strips
    acc0 = jnp.broadcast_to(dwb_ref[...].reshape(1, 1, cout), (sr, wo, cout))

    for s0 in range(0, th, sr):                                           # register-blocked strips
        acc = acc0                                                        # bias-initialised acc
        for j in range(k):                                                # one sublane shift/col tap
            colj = fmp_ref[s0:s0 + sr + 2 * pad, j:j + wo, :]
            for i in range(k):                                            # row taps: major slices
                acc = acc + colj[i:i + sr] * w_taps[i * k + j]
        y_ref[s0:s0 + sr] = acc.astype(y_ref.dtype)


def _scoped_vmem_limit_bytes():
    """Half of the per-generation VMEM (32 MiB on v7x, 64 MiB on v5e/v6e), safe fallback."""
    try:
        cap = int(pltpu.get_tpu_info().vmem_capacity_bytes)
    except Exception:
        cap = 64 * 1024 * 1024
    return max(32 * 1024 * 1024, min(cap // 2, 100 * 1024 * 1024))


# -----------------------------------------------------------------------------------
# Wrapper (NCHW in / NCHW out, like the PyTorch module)
# -----------------------------------------------------------------------------------
def block_deploy_poly_forward(x_nchw, mask_nchw, w_conv, b_conv, dw_weight, dw_bias,
                              poly_w, poly_factors, *,
                              matmul_dtype=jnp.bfloat16, out_dtype=jnp.float32,
                              row_tile=None, fold_w=None):
    N, Cin, H, W = x_nchw.shape
    Cout = w_conv.shape[0]
    K = dw_weight.shape[-1]
    pad = K // 2
    assert H % 2 == 0 and W % 2 == 0, "AvgPool2d(2) needs even spatial dims"
    assert Cout >= Cin, "channel zero-pad shortcut needs dim_out >= dim"
    Ho, Wo = H // 2, W // 2

    # Row tile: prefer a multiple of 8 that divides Ho (sublane-aligned output strips).
    if row_tile is None:
        row_tile = Ho
        for cand in (32, 24, 16, 8):
            if Ho % cand == 0:
                row_tile = cand
                break
    TH = row_tile
    assert Ho % TH == 0, "row_tile must divide Ho"
    nT = Ho // TH
    Hw = TH + 2 * pad
    Hp = H + 4 * pad                              # 2*pad pooled halo rows == 4*pad raw rows

    # Fold the W pair-sum of the pool into the MXU contraction while K stays underfilled.
    if fold_w is None:
        fold_w = (2 * Cin) <= 256

    # ---- NHWC (channels on the 128-lane axis), halo-row padded, DMA'd in matmul dtype. ----
    # NOTE: at production Cout should be a multiple of 128 for lane-dense (unmasked) stores;
    # the demo Cout=8 is intentionally tiny and exercises masked partial stores.
    x = jnp.transpose(x_nchw, (0, 2, 3, 1)).astype(jnp.float32)
    x = jnp.pad(x, ((0, 0), (2 * pad, 2 * pad), (0, 0), (0, 0)))
    if fold_w:
        x = x.reshape(N, Hp, Wo, 2 * Cin)         # row-major regroup done by XLA, not in-kernel
    x = x.astype(matmul_dtype)

    mask = jnp.transpose(mask_nchw, (0, 2, 3, 1)).astype(jnp.float32)
    mask = jnp.pad(mask, ((0, 0), (pad, pad), (0, 0), (0, 0))).astype(matmul_dtype)

    # ---- 1x1-conv weight with shortcut + 0.25 pool scale folded in: 0.25*(W^T + [I|0]). ----
    w1 = jnp.transpose(w_conv[:, :, 0, 0], (1, 0)).astype(jnp.float32)       # (Cin, Cout)
    pad_eye = jnp.concatenate([jnp.eye(Cin, dtype=jnp.float32),
                               jnp.zeros((Cin, Cout - Cin), jnp.float32)], axis=1)
    w_aug = 0.25 * (w1 + pad_eye)
    if fold_w:
        w_aug = jnp.concatenate([w_aug, w_aug], axis=0)                      # (2*Cin, Cout)
    w_aug = w_aug.astype(matmul_dtype)
    C2 = w_aug.shape[0]
    b1 = b_conv.reshape(1, Cout).astype(jnp.float32)

    # relu_poly coefficients: weight * factor, per channel.
    coef = poly_w.astype(jnp.float32) * jnp.asarray(poly_factors, jnp.float32).reshape(3, 1)

    # Depthwise weights as (K*K, Cout): one sublane row per tap; bias as (1, Cout).
    w_dw = jnp.transpose(dw_weight[:, 0, :, :], (1, 2, 0)).reshape(K * K, Cout)
    w_dw = w_dw.astype(jnp.float32)
    b_dw = dw_bias.reshape(1, Cout).astype(jnp.float32)

    kernel = functools.partial(_block_kernel, k=K, pad=pad, th=TH, ho=Ho, fold_w=fold_w)

    img_map = lambda n, t: (n, 0, 0, 0)           # image-resident (index constant along t)
    tile_map = lambda n, t: (n, t, 0, 0)          # TH-row output tiles
    const2 = lambda n, t: (0, 0)

    x_block = (None, Hp, Wo, 2 * Cin) if fold_w else (None, Hp, W, Cin)

    cost = pl.CostEstimate(
        flops=int(N * (2 * nT * Hw * Wo * C2 * Cout          # fused conv+shortcut (halo incl.)
                       + 2 * Ho * Wo * Cout * K * K          # depthwise conv
                       + H * W * Cin                         # pooling adds
                       + 8 * nT * Hw * Wo * Cout)),          # poly / mask blend
        transcendentals=0,
        bytes_accessed=int(x.size * x.dtype.itemsize + mask.size * mask.dtype.itemsize
                           + w_aug.size * w_aug.dtype.itemsize
                           + 4 * (b1.size + coef.size + w_dw.size + b_dw.size)
                           + 2 * N * Ho * Wo * Cout * jnp.dtype(out_dtype).itemsize),
    )

    y, fm = pl.pallas_call(
        kernel,
        out_shape=(jax.ShapeDtypeStruct((N, Ho, Wo, Cout), out_dtype),    # y
                   jax.ShapeDtypeStruct((N, Ho, Wo, Cout), out_dtype)),   # fm
        grid_spec=pltpu.PrefetchScalarGridSpec(
            num_scalar_prefetch=0,
            grid=(N, nT),                                    # batch x row-tiles, pipelined
            in_specs=[
                pl.BlockSpec(x_block, img_map),              # x (row-padded, image-resident)
                pl.BlockSpec((C2, Cout), const2),            # W' (conv + shortcut + 0.25)
                pl.BlockSpec((1, Cout), const2),             # conv bias
                pl.BlockSpec((3, Cout), const2),             # poly coefficients
                pl.BlockSpec((None, Ho + 2 * pad, Wo, Cout), img_map),    # mask (row-padded)
                pl.BlockSpec((K * K, Cout), const2),         # depthwise weights
                pl.BlockSpec((1, Cout), const2),             # depthwise bias
            ],
            out_specs=[
                pl.BlockSpec((None, TH, Wo, Cout), tile_map),    # y
                pl.BlockSpec((None, TH, Wo, Cout), tile_map),    # fm
            ],
            scratch_shapes=[
                pltpu.VMEM((Hw, Wo + 2 * pad, Cout), jnp.float32),   # window-sized padded fm
            ],
        ),
        compiler_params=pltpu.CompilerParams(
            dimension_semantics=("parallel", "parallel"),    # feed both v7x cores even at N=1
            vmem_limit_bytes=_scoped_vmem_limit_bytes()),    # per-generation VMEM budget
        cost_estimate=cost,
    )(x, w_aug, b1, coef, mask, w_dw, b_dw)

    return jnp.transpose(y, (0, 3, 1, 2)), jnp.transpose(fm, (0, 3, 1, 2))


# -----------------------------------------------------------------------------------
# Pure-JAX reference implementing the ORIGINAL module ordering (f32 everywhere)
# -----------------------------------------------------------------------------------
def _ref_forward(x_nchw, mask_nchw, w_conv, b_conv, dw_weight, dw_bias, poly_w, factors):
    x = jnp.transpose(x_nchw, (0, 2, 3, 1))
    mask = jnp.transpose(mask_nchw, (0, 2, 3, 1))
    N, H, W, Cin = x.shape
    Cout = w_conv.shape[0]
    Ho, Wo = H // 2, W // 2
    K = dw_weight.shape[-1]

    def pool2(t):
        n, h, w, c = t.shape
        return t.reshape(n, h // 2, 2, w // 2, 2, c).mean(axis=(2, 4))

    y = jnp.einsum('nhwc,oc->nhwo', x, w_conv[:, :, 0, 0]) + b_conv.reshape(1, 1, 1, Cout)
    y = pool2(y)
    identity = jnp.concatenate(
        [pool2(x), jnp.zeros((N, Ho, Wo, Cout - Cin), jnp.float32)], axis=-1)
    z = y + identity
    c0 = (poly_w[0] * factors[0]).reshape(1, 1, 1, Cout)
    c1 = (poly_w[1] * factors[1]).reshape(1, 1, 1, Cout)
    c2 = (poly_w[2] * factors[2]).reshape(1, 1, 1, Cout)
    fm = mask * jnp.maximum(z, 0.0) + (1.0 - mask) * (c0 * z * z + c1 * z + c2)

    pad = K // 2
    fmp = jnp.pad(fm, ((0, 0), (pad, pad), (pad, pad), (0, 0)))
    w_dw = jnp.transpose(dw_weight[:, 0, :, :], (1, 2, 0))
    out = jnp.zeros((N, Ho, Wo, Cout), jnp.float32)
    for i in range(K):
        for j in range(K):
            out = out + fmp[:, i:i + Ho, j:j + Wo, :] * w_dw[i, j].reshape(1, 1, 1, Cout)
    out = out + dw_bias.reshape(1, 1, 1, Cout)
    return jnp.transpose(out, (0, 3, 1, 2)), jnp.transpose(fm, (0, 3, 1, 2))


if __name__ == "__main__":
    N, H, W = 2, 16, 16
    dim, dim_out = 4, 8                 # dim_out = 2*dim, as the module's shortcut pad implies
    stride, act_num = 2, 3
    K = 2 * act_num + 1
    poly_weight_inits = (0.1, 0.5, 0.0)
    poly_weight_factors = (0.2, 0.5, 1.0)

    key = jax.random.PRNGKey(0)
    ks = jax.random.split(key, 5)
    x = jax.random.normal(ks[0], (N, dim, H, W), jnp.float32)
    mask = (jax.random.uniform(ks[1], (N, dim_out, H // stride, W // stride)) > 0.5
            ).astype(jnp.float32)
    w_conv = jax.random.normal(ks[2], (dim_out, dim, 1, 1), jnp.float32) * 0.1
    b_conv = jax.random.normal(ks[3], (dim_out,), jnp.float32) * 0.1
    dw_weight = jax.random.normal(ks[4], (dim_out, 1, K, K), jnp.float32) * 0.02
    dw_bias = jnp.zeros((dim_out,), jnp.float32)
    poly_w = jnp.tile(jnp.asarray(poly_weight_inits, jnp.float32).reshape(3, 1),
                      (1, dim_out))

    # Deploy path: bf16 input DMA + bf16 MXU operands, f32 accumulate / elementwise.
    y, fm = block_deploy_poly_forward(x, mask, w_conv, b_conv, dw_weight, dw_bias,
                                      poly_w, poly_weight_factors,
                                      matmul_dtype=jnp.bfloat16)
    y = jax.block_until_ready(y)
    fm = jax.block_until_ready(fm)

    # Exact-algebra path (f32 end to end) to verify pool/shortcut/halo fusion math.
    y32, fm32 = block_deploy_poly_forward(x, mask, w_conv, b_conv, dw_weight, dw_bias,
                                          poly_w, poly_weight_factors,
                                          matmul_dtype=jnp.float32)
    y32 = jax.block_until_ready(y32)
    fm32 = jax.block_until_ready(fm32)

    y_ref, fm_ref = _ref_forward(x, mask, w_conv, b_conv, dw_weight, dw_bias,
                                 poly_w, poly_weight_factors)

    assert y.shape == (N, dim_out, H // stride, W // stride)
    assert fm.shape == (N, dim_out, H // stride, W // stride)
    # Tight check: f32 Pallas path vs original-order reference (proves fusion/halo algebra).
    assert jnp.allclose(y32, y_ref, atol=1e-4, rtol=1e-4)
    assert jnp.allclose(fm32, fm_ref, atol=1e-4, rtol=1e-4)
    # Loose check: bf16-operand fast path (bf16 input/pool rounding vs f32 reference).
    assert jnp.allclose(y, y_ref, atol=5e-2, rtol=5e-2)
    assert jnp.allclose(fm, fm_ref, atol=5e-2, rtol=5e-2)
    print("KERNEL_OK")
</pallas_src>

<mosaic_0001>
module attributes {stable_mosaic.version = 11 : i64} {
  func.func @_block_kernel(%arg0: i32, %arg1: i32, %arg2: memref<1x28x8x8xbf16, #tpu.memory_space<vmem>>, %arg3: memref<8x8xbf16, #tpu.memory_space<vmem>>, %arg4: memref<1x8xf32, #tpu.memory_space<vmem>>, %arg5: memref<3x8xf32, #tpu.memory_space<vmem>>, %arg6: memref<1x14x8x8xbf16, #tpu.memory_space<vmem>>, %arg7: memref<49x8xf32, #tpu.memory_space<vmem>>, %arg8: memref<1x8xf32, #tpu.memory_space<vmem>>, %arg9: memref<1x8x8x8xf32, #tpu.memory_space<vmem>>, %arg10: memref<1x8x8x8xf32, #tpu.memory_space<vmem>>, %arg11: memref<14x14x8xf32, #tpu.memory_space<vmem>>) attributes {dimension_semantics = [#tpu.dimension_semantics<parallel>, #tpu.dimension_semantics<parallel>], iteration_bounds = array<i64: 2, 1>, scalar_prefetch = 0 : i64, scratch_operands = 1 : i64, tpu.core_type = #tpu.core_type<tc>, window_params = [{transform_indices = @transform_0, window_bounds = array<i64: 1, 28, 8, 8>}, {pipeline_mode = #tpu.pipeline_mode<synchronous>, transform_indices = @transform_1, window_bounds = array<i64: 8, 8>}, {pipeline_mode = #tpu.pipeline_mode<synchronous>, transform_indices = @transform_2, window_bounds = array<i64: 1, 8>}, {pipeline_mode = #tpu.pipeline_mode<synchronous>, transform_indices = @transform_3, window_bounds = array<i64: 3, 8>}, {transform_indices = @transform_4, window_bounds = array<i64: 1, 14, 8, 8>}, {pipeline_mode = #tpu.pipeline_mode<synchronous>, transform_indices = @transform_5, window_bounds = array<i64: 49, 8>}, {pipeline_mode = #tpu.pipeline_mode<synchronous>, transform_indices = @transform_6, window_bounds = array<i64: 1, 8>}, {transform_indices = @transform_7, window_bounds = array<i64: 1, 8, 8, 8>}, {transform_indices = @transform_8, window_bounds = array<i64: 1, 8, 8, 8>}]} {
    %c16_i32 = arith.constant 16 : i32
    %0 = arith.muli %arg1, %c16_i32 : i32
    %1 = tpu.assume_multiple %0, 16 : i32
    %c0 = arith.constant 0 : index
    %2 = arith.index_cast %1 : i32 to index
    %c0_0 = arith.constant 0 : index
    %c0_1 = arith.constant 0 : index
    %3 = vector.load %arg2[%c0, %2, %c0_0, %c0_1] : memref<1x28x8x8xbf16, #tpu.memory_space<vmem>>, vector<1x28x8x8xbf16>
    %4 = vector.shape_cast %3 : vector<1x28x8x8xbf16> to vector<28x8x8xbf16>
    %5 = vector.shape_cast %4 : vector<28x8x8xbf16> to vector<14x2x8x8xbf16>
    %6 = vector.extract_strided_slice %5 {offsets = [0, 0, 0, 0], sizes = [14, 1, 8, 8], strides = [1, 1, 1, 1]} : vector<14x2x8x8xbf16> to vector<14x1x8x8xbf16>
    %7 = vector.shape_cast %6 : vector<14x1x8x8xbf16> to vector<14x8x8xbf16>
    %8 = vector.extract_strided_slice %5 {offsets = [0, 1, 0, 0], sizes = [14, 1, 8, 8], strides = [1, 1, 1, 1]} : vector<14x2x8x8xbf16> to vector<14x1x8x8xbf16>
    %9 = vector.shape_cast %8 : vector<14x1x8x8xbf16> to vector<14x8x8xbf16>
    %10 = arith.addf %7, %9 : vector<14x8x8xbf16>
    %11 = vector.shape_cast %10 : vector<14x8x8xbf16> to vector<112x8xbf16>
    %c0_2 = arith.constant 0 : index
    %c0_3 = arith.constant 0 : index
    %12 = vector.load %arg3[%c0_2, %c0_3] : memref<8x8xbf16, #tpu.memory_space<vmem>>, vector<8x8xbf16>
    %cst = arith.constant dense<0.000000e+00> : vector<112x8xf32>
    %13 = tpu.matmul %11, %12, %cst {dimension_numbers = #tpu.dot_dimension_numbers<[1], [0], [0], [1], [0, 0, 1, 1], [], []>} : vector<112x8xbf16>, vector<8x8xbf16>, vector<112x8xf32> -> vector<112x8xf32>
    %c0_4 = arith.constant 0 : index
    %c0_5 = arith.constant 0 : index
    %14 = vector.load %arg4[%c0_4, %c0_5] : memref<1x8xf32, #tpu.memory_space<vmem>>, vector<1x8xf32>
    %15 = vector.broadcast %14 : vector<1x8xf32> to vector<112x8xf32>
    %16 = arith.addf %13, %15 : vector<112x8xf32>
    %c0_6 = arith.constant 0 : index
    %c0_7 = arith.constant 0 : index
    %17 = vector.load %arg5[%c0_6, %c0_7] : memref<3x8xf32, #tpu.memory_space<vmem>>, vector<3x8xf32>
    %18 = vector.extract_strided_slice %17 {offsets = [0, 0], sizes = [1, 8], strides = [1, 1]} : vector<3x8xf32> to vector<1x8xf32>
    %19 = vector.shape_cast %18 : vector<1x8xf32> to vector<8xf32>
    %20 = vector.shape_cast %19 : vector<8xf32> to vector<1x8xf32>
    %21 = vector.extract_strided_slice %17 {offsets = [1, 0], sizes = [1, 8], strides = [1, 1]} : vector<3x8xf32> to vector<1x8xf32>
    %22 = vector.shape_cast %21 : vector<1x8xf32> to vector<8xf32>
    %23 = vector.shape_cast %22 : vector<8xf32> to vector<1x8xf32>
    %24 = vector.extract_strided_slice %17 {offsets = [2, 0], sizes = [1, 8], strides = [1, 1]} : vector<3x8xf32> to vector<1x8xf32>
    %25 = vector.shape_cast %24 : vector<1x8xf32> to vector<8xf32>
    %26 = vector.shape_cast %25 : vector<8xf32> to vector<1x8xf32>
    %27 = vector.broadcast %20 : vector<1x8xf32> to vector<112x8xf32>
    %28 = arith.mulf %27, %16 : vector<112x8xf32>
    %29 = vector.broadcast %23 : vector<1x8xf32> to vector<112x8xf32>
    %30 = arith.addf %28, %29 : vector<112x8xf32>
    %31 = arith.mulf %30, %16 : vector<112x8xf32>
    %32 = vector.broadcast %26 : vector<1x8xf32> to vector<112x8xf32>
    %33 = arith.addf %31, %32 : vector<112x8xf32>
    %c8_i32 = arith.constant 8 : i32
    %34 = arith.muli %arg1, %c8_i32 : i32
    %35 = tpu.assume_multiple %34, 8 : i32
    %c0_8 = arith.constant 0 : index
    %36 = arith.index_cast %35 : i32 to index
    %c0_9 = arith.constant 0 : index
    %c0_10 = arith.constant 0 : index
    %37 = vector.load %arg6[%c0_8, %36, %c0_9, %c0_10] : memref<1x14x8x8xbf16, #tpu.memory_space<vmem>>, vector<1x14x8x8xbf16>
    %38 = vector.shape_cast %37 : vector<1x14x8x8xbf16> to vector<14x8x8xbf16>
    %39 = vector.shape_cast %38 : vector<14x8x8xbf16> to vector<112x8xbf16>
    %40 = arith.extf %39 : vector<112x8xbf16> to vector<112x8xf32>
    %cst_11 = arith.constant 0.000000e+00 : f32
    %41 = vector.broadcast %cst_11 : f32 to vector<112x8xf32>
    %42 = arith.maximumf %16, %41 : vector<112x8xf32>
    %43 = arith.subf %42, %33 : vector<112x8xf32>
    %44 = arith.mulf %40, %43 : vector<112x8xf32>
    %45 = arith.addf %33, %44 : vector<112x8xf32>
    %46 = vector.shape_cast %45 : vector<112x8xf32> to vector<14x8x8xf32>
    %47 = tpu.iota {dimensions = array<i32: 0>} : vector<14x1x1xi32>
    %c8_i32_12 = arith.constant 8 : i32
    %48 = arith.muli %arg1, %c8_i32_12 : i32
    %c3_i32 = arith.constant 3 : i32
    %49 = arith.subi %48, %c3_i32 : i32
    %50 = vector.broadcast %49 : i32 to vector<14x1x1xi32>
    %51 = arith.addi %47, %50 : vector<14x1x1xi32>
    %c0_i32 = arith.constant 0 : i32
    %52 = vector.broadcast %c0_i32 : i32 to vector<14x1x1xi32>
    %53 = arith.cmpi sge, %51, %52 : vector<14x1x1xi32>
    %c8_i32_13 = arith.constant 8 : i32
    %54 = vector.broadcast %c8_i32_13 : i32 to vector<14x1x1xi32>
    %55 = arith.cmpi slt, %51, %54 : vector<14x1x1xi32>
    %56 = arith.andi %53, %55 : vector<14x1x1xi1>
    %57 = arith.extui %56 : vector<14x1x1xi1> to vector<14x1x1xi32>
    %58 = arith.sitofp %57 : vector<14x1x1xi32> to vector<14x1x1xf32>
    %59 = vector.broadcast %58 : vector<14x1x1xf32> to vector<14x8x8xf32>
    %60 = arith.mulf %46, %59 : vector<14x8x8xf32>
    %61 = vector.extract_strided_slice %60 {offsets = [3, 0, 0], sizes = [8, 8, 8], strides = [1, 1, 1]} : vector<14x8x8xf32> to vector<8x8x8xf32>
    %c0_14 = arith.constant 0 : index
    %c0_15 = arith.constant 0 : index
    %c0_16 = arith.constant 0 : index
    %c0_17 = arith.constant 0 : index
    %62 = vector.load %arg10[%c0_14, %c0_15, %c0_16, %c0_17] : memref<1x8x8x8xf32, #tpu.memory_space<vmem>>, vector<1x8x8x8xf32>
    %63 = vector.shape_cast %62 : vector<1x8x8x8xf32> to vector<8x8x8xf32>
    %64 = vector.shape_cast %61 : vector<8x8x8xf32> to vector<1x8x8x8xf32>
    tpu.vector_store %arg10[%c0_14, %c0_15, %c0_16, %c0_17], %64 {strides = array<i32>} : memref<1x8x8x8xf32, #tpu.memory_space<vmem>>, vector<1x8x8x8xf32>,
    %cst_18 = arith.constant 0.000000e+00 : f32
    %65 = vector.broadcast %cst_18 : f32 to vector<14x3x8xf32>
    %c0_19 = arith.constant 0 : index
    %c0_20 = arith.constant 0 : index
    %c0_21 = arith.constant 0 : index
    %66 = vector.load %arg11[%c0_19, %c0_20, %c0_21] : memref<14x14x8xf32, #tpu.memory_space<vmem>>, vector<14x3x8xf32>
    tpu.vector_store %arg11[%c0_19, %c0_20, %c0_21], %65 {strides = array<i32>} : memref<14x14x8xf32, #tpu.memory_space<vmem>>, vector<14x3x8xf32>,
    %cst_22 = arith.constant 0.000000e+00 : f32
    %67 = vector.broadcast %cst_22 : f32 to vector<14x3x8xf32>
    %c0_23 = arith.constant 0 : index
    %c11 = arith.constant 11 : index
    %c0_24 = arith.constant 0 : index
    %68 = vector.load %arg11[%c0_23, %c11, %c0_24] : memref<14x14x8xf32, #tpu.memory_space<vmem>>, vector<14x3x8xf32>
    tpu.vector_store %arg11[%c0_23, %c11, %c0_24], %67 {strides = array<i32>} : memref<14x14x8xf32, #tpu.memory_space<vmem>>, vector<14x3x8xf32>,
    %c0_25 = arith.constant 0 : index
    %c3 = arith.constant 3 : index
    %c0_26 = arith.constant 0 : index
    %69 = vector.load %arg11[%c0_25, %c3, %c0_26] : memref<14x14x8xf32, #tpu.memory_space<vmem>>, vector<14x8x8xf32>
    tpu.vector_store %arg11[%c0_25, %c3, %c0_26], %60 {strides = array<i32>} : memref<14x14x8xf32, #tpu.memory_space<vmem>>, vector<14x8x8xf32>,
    %c0_27 = arith.constant 0 : index
    %c0_28 = arith.constant 0 : index
    %70 = vector.load %arg7[%c0_27, %c0_28] : memref<49x8xf32, #tpu.memory_space<vmem>>, vector<49x8xf32>
    %71 = vector.extract_strided_slice %70 {offsets = [0, 0], sizes = [1, 8], strides = [1, 1]} : vector<49x8xf32> to vector<1x8xf32>
    %72 = vector.shape_cast %71 : vector<1x8xf32> to vector<8xf32>
    %73 = vector.shape_cast %72 : vector<8xf32> to vector<1x1x8xf32>
    %74 = vector.extract_strided_slice %70 {offsets = [1, 0], sizes = [1, 8], strides = [1, 1]} : vector<49x8xf32> to vector<1x8xf32>
    %75 = vector.shape_cast %74 : vector<1x8xf32> to vector<8xf32>
    %76 = vector.shape_cast %75 : vector<8xf32> to vector<1x1x8xf32>
    %77 = vector.extract_strided_slice %70 {offsets = [2, 0], sizes = [1, 8], strides = [1, 1]} : vector<49x8xf32> to vector<1x8xf32>
    %78 = vector.shape_cast %77 : vector<1x8xf32> to vector<8xf32>
    %79 = vector.shape_cast %78 : vector<8xf32> to vector<1x1x8xf32>
    %80 = vector.extract_strided_slice %70 {offsets = [3, 0], sizes = [1, 8], strides = [1, 1]} : vector<49x8xf32> to vector<1x8xf32>
    %81 = vector.shape_cast %80 : vector<1x8xf32> to vector<8xf32>
    %82 = vector.shape_cast %81 : vector<8xf32> to vector<1x1x8xf32>
    %83 = vector.extract_strided_slice %70 {offsets = [4, 0], sizes = [1, 8], strides = [1, 1]} : vector<49x8xf32> to vector<1x8xf32>
    %84 = vector.shape_cast %83 : vector<1x8xf32> to vector<8xf32>
    %85 = vector.shape_cast %84 : vector<8xf32> to vector<1x1x8xf32>
    %86 = vector.extract_strided_slice %70 {offsets = [5, 0], sizes = [1, 8], strides = [1, 1]} : vector<49x8xf32> to vector<1x8xf32>
    %87 = vector.shape_cast %86 : vector<1x8xf32> to vector<8xf32>
    %88 = vector.shape_cast %87 : vector<8xf32> to vector<1x1x8xf32>
    %89 = vector.extract_strided_slice %70 {offsets = [6, 0], sizes = [1, 8], strides = [1, 1]} : vector<49x8xf32> to vector<1x8xf32>
    %90 = vector.shape_cast %89 : vector<1x8xf32> to vector<8xf32>
    %91 = vector.shape_cast %90 : vector<8xf32> to vector<1x1x8xf32>
    %92 = vector.extract_strided_slice %70 {offsets = [7, 0], sizes = [1, 8], strides = [1, 1]} : vector<49x8xf32> to vector<1x8xf32>
    %93 = vector.shape_cast %92 : vector<1x8xf32> to vector<8xf32>
    %94 = vector.shape_cast %93 : vector<8xf32> to vector<1x1x8xf32>
    %95 = vector.extract_strided_slice %70 {offsets = [8, 0], sizes = [1, 8], strides = [1, 1]} : vector<49x8xf32> to vector<1x8xf32>
    %96 = vector.shape_cast %95 : vector<1x8xf32> to vector<8xf32>
    %97 = vector.shape_cast %96 : vector<8xf32> to vector<1x1x8xf32>
    %98 = vector.extract_strided_slice %70 {offsets = [9, 0], sizes = [1, 8], strides = [1, 1]} : vector<49x8xf32> to vector<1x8xf32>
    %99 = vector.shape_cast %98 : vector<1x8xf32> to vector<8xf32>
    %100 = vector.shape_cast %99 : vector<8xf32> to vector<1x1x8xf32>
    %101 = vector.extract_strided_slice %70 {offsets = [10, 0], sizes = [1, 8], strides = [1, 1]} : vector<49x8xf32> to vector<1x8xf32>
    %102 = vector.shape_cast %101 : vector<1x8xf32> to vector<8xf32>
    %103 = vector.shape_cast %102 : vector<8xf32> to vector<1x1x8xf32>
    %104 = vector.extract_strided_slice %70 {offsets = [11, 0], sizes = [1, 8], strides = [1, 1]} : vector<49x8xf32> to vector<1x8xf32>
    %105 = vector.shape_cast %104 : vector<1x8xf32> to vector<8xf32>
    %106 = vector.shape_cast %105 : vector<8xf32> to vector<1x1x8xf32>
    %107 = vector.extract_strided_slice %70 {offsets = [12, 0], sizes = [1, 8], strides = [1, 1]} : vector<49x8xf32> to vector<1x8xf32>
    %108 = vector.shape_cast %107 : vector<1x8xf32> to vector<8xf32>
    %109 = vector.shape_cast %108 : vector<8xf32> to vector<1x1x8xf32>
    %110 = vector.extract_strided_slice %70 {offsets = [13, 0], sizes = [1, 8], strides = [1, 1]} : vector<49x8xf32> to vector<1x8xf32>
    %111 = vector.shape_cast %110 : vector<1x8xf32> to vector<8xf32>
    %112 = vector.shape_cast %111 : vector<8xf32> to vector<1x1x8xf32>
    %113 = vector.extract_strided_slice %70 {offsets = [14, 0], sizes = [1, 8], strides = [1, 1]} : vector<49x8xf32> to vector<1x8xf32>
    %114 = vector.shape_cast %113 : vector<1x8xf32> to vector<8xf32>
    %115 = vector.shape_cast %114 : vector<8xf32> to vector<1x1x8xf32>
    %116 = vector.extract_strided_slice %70 {offsets = [15, 0], sizes = [1, 8], strides = [1, 1]} : vector<49x8xf32> to vector<1x8xf32>
    %117 = vector.shape_cast %116 : vector<1x8xf32> to vector<8xf32>
    %118 = vector.shape_cast %117 : vector<8xf32> to vector<1x1x8xf32>
    %119 = vector.extract_strided_slice %70 {offsets = [16, 0], sizes = [1, 8], strides = [1, 1]} : vector<49x8xf32> to vector<1x8xf32>
    %120 = vector.shape_cast %119 : vector<1x8xf32> to vector<8xf32>
    %121 = vector.shape_cast %120 : vector<8xf32> to vector<1x1x8xf32>
    %122 = vector.extract_strided_slice %70 {offsets = [17, 0], sizes = [1, 8], strides = [1, 1]} : vector<49x8xf32> to vector<1x8xf32>
    %123 = vector.shape_cast %122 : vector<1x8xf32> to vector<8xf32>
    %124 = vector.shape_cast %123 : vector<8xf32> to vector<1x1x8xf32>
    %125 = vector.extract_strided_slice %70 {offsets = [18, 0], sizes = [1, 8], strides = [1, 1]} : vector<49x8xf32> to vector<1x8xf32>
    %126 = vector.shape_cast %125 : vector<1x8xf32> to vector<8xf32>
    %127 = vector.shape_cast %126 : vector<8xf32> to vector<1x1x8xf32>
    %128 = vector.extract_strided_slice %70 {offsets = [19, 0], sizes = [1, 8], strides = [1, 1]} : vector<49x8xf32> to vector<1x8xf32>
    %129 = vector.shape_cast %128 : vector<1x8xf32> to vector<8xf32>
    %130 = vector.shape_cast %129 : vector<8xf32> to vector<1x1x8xf32>
    %131 = vector.extract_strided_slice %70 {offsets = [20, 0], sizes = [1, 8], strides = [1, 1]} : vector<49x8xf32> to vector<1x8xf32>
    %132 = vector.shape_cast %131 : vector<1x8xf32> to vector<8xf32>
    %133 = vector.shape_cast %132 : vector<8xf32> to vector<1x1x8xf32>
    %134 = vector.extract_strided_slice %70 {offsets = [21, 0], sizes = [1, 8], strides = [1, 1]} : vector<49x8xf32> to vector<1x8xf32>
    %135 = vector.shape_cast %134 : vector<1x8xf32> to vector<8xf32>
    %136 = vector.shape_cast %135 : vector<8xf32> to vector<1x1x8xf32>
    %137 = vector.extract_strided_slice %70 {offsets = [22, 0], sizes = [1, 8], strides = [1, 1]} : vector<49x8xf32> to vector<1x8xf32>
    %138 = vector.shape_cast %137 : vector<1x8xf32> to vector<8xf32>
    %139 = vector.shape_cast %138 : vector<8xf32> to vector<1x1x8xf32>
    %140 = vector.extract_strided_slice %70 {offsets = [23, 0], sizes = [1, 8], strides = [1, 1]} : vector<49x8xf32> to vector<1x8xf32>
    %141 = vector.shape_cast %140 : vector<1x8xf32> to vector<8xf32>
    %142 = vector.shape_cast %141 : vector<8xf32> to vector<1x1x8xf32>
    %143 = vector.extract_strided_slice %70 {offsets = [24, 0], sizes = [1, 8], strides = [1, 1]} : vector<49x8xf32> to vector<1x8xf32>
    %144 = vector.shape_cast %143 : vector<1x8xf32> to vector<8xf32>
    %145 = vector.shape_cast %144 : vector<8xf32> to vector<1x1x8xf32>
    %146 = vector.extract_strided_slice %70 {offsets = [25, 0], sizes = [1, 8], strides = [1, 1]} : vector<49x8xf32> to vector<1x8xf32>
    %147 = vector.shape_cast %146 : vector<1x8xf32> to vector<8xf32>
    %148 = vector.shape_cast %147 : vector<8xf32> to vector<1x1x8xf32>
    %149 = vector.extract_strided_slice %70 {offsets = [26, 0], sizes = [1, 8], strides = [1, 1]} : vector<49x8xf32> to vector<1x8xf32>
    %150 = vector.shape_cast %149 : vector<1x8xf32> to vector<8xf32>
    %151 = vector.shape_cast %150 : vector<8xf32> to vector<1x1x8xf32>
    %152 = vector.extract_strided_slice %70 {offsets = [27, 0], sizes = [1, 8], strides = [1, 1]} : vector<49x8xf32> to vector<1x8xf32>
    %153 = vector.shape_cast %152 : vector<1x8xf32> to vector<8xf32>
    %154 = vector.shape_cast %153 : vector<8xf32> to vector<1x1x8xf32>
    %155 = vector.extract_strided_slice %70 {offsets = [28, 0], sizes = [1, 8], strides = [1, 1]} : vector<49x8xf32> to vector<1x8xf32>
    %156 = vector.shape_cast %155 : vector<1x8xf32> to vector<8xf32>
    %157 = vector.shape_cast %156 : vector<8xf32> to vector<1x1x8xf32>
    %158 = vector.extract_strided_slice %70 {offsets = [29, 0], sizes = [1, 8], strides = [1, 1]} : vector<49x8xf32> to vector<1x8xf32>
    %159 = vector.shape_cast %158 : vector<1x8xf32> to vector<8xf32>
    %160 = vector.shape_cast %159 : vector<8xf32> to vector<1x1x8xf32>
    %161 = vector.extract_strided_slice %70 {offsets = [30, 0], sizes = [1, 8], strides = [1, 1]} : vector<49x8xf32> to vector<1x8xf32>
    %162 = vector.shape_cast %161 : vector<1x8xf32> to vector<8xf32>
    %163 = vector.shape_cast %162 : vector<8xf32> to vector<1x1x8xf32>
    %164 = vector.extract_strided_slice %70 {offsets = [31, 0], sizes = [1, 8], strides = [1, 1]} : vector<49x8xf32> to vector<1x8xf32>
    %165 = vector.shape_cast %164 : vector<1x8xf32> to vector<8xf32>
    %166 = vector.shape_cast %165 : vector<8xf32> to vector<1x1x8xf32>
    %167 = vector.extract_strided_slice %70 {offsets = [32, 0], sizes = [1, 8], strides = [1, 1]} : vector<49x8xf32> to vector<1x8xf32>
    %168 = vector.shape_cast %167 : vector<1x8xf32> to vector<8xf32>
    %169 = vector.shape_cast %168 : vector<8xf32> to vector<1x1x8xf32>
    %170 = vector.extract_strided_slice %70 {offsets = [33, 0], sizes = [1, 8], strides = [1, 1]} : vector<49x8xf32> to vector<1x8xf32>
    %171 = vector.shape_cast %170 : vector<1x8xf32> to vector<8xf32>
    %172 = vector.shape_cast %171 : vector<8xf32> to vector<1x1x8xf32>
    %173 = vector.extract_strided_slice %70 {offsets = [34, 0], sizes = [1, 8], strides = [1, 1]} : vector<49x8xf32> to vector<1x8xf32>
    %174 = vector.shape_cast %173 : vector<1x8xf32> to vector<8xf32>
    %175 = vector.shape_cast %174 : vector<8xf32> to vector<1x1x8xf32>
    %176 = vector.extract_strided_slice %70 {offsets = [35, 0], sizes = [1, 8], strides = [1, 1]} : vector<49x8xf32> to vector<1x8xf32>
    %177 = vector.shape_cast %176 : vector<1x8xf32> to vector<8xf32>
    %178 = vector.shape_cast %177 : vector<8xf32> to vector<1x1x8xf32>
    %179 = vector.extract_strided_slice %70 {offsets = [36, 0], sizes = [1, 8], strides = [1, 1]} : vector<49x8xf32> to vector<1x8xf32>
    %180 = vector.shape_cast %179 : vector<1x8xf32> to vector<8xf32>
    %181 = vector.shape_cast %180 : vector<8xf32> to vector<1x1x8xf32>
    %182 = vector.extract_strided_slice %70 {offsets = [37, 0], sizes = [1, 8], strides = [1, 1]} : vector<49x8xf32> to vector<1x8xf32>
    %183 = vector.shape_cast %182 : vector<1x8xf32> to vector<8xf32>
    %184 = vector.shape_cast %183 : vector<8xf32> to vector<1x1x8xf32>
    %185 = vector.extract_strided_slice %70 {offsets = [38, 0], sizes = [1, 8], strides = [1, 1]} : vector<49x8xf32> to vector<1x8xf32>
    %186 = vector.shape_cast %185 : vector<1x8xf32> to vector<8xf32>
    %187 = vector.shape_cast %186 : vector<8xf32> to vector<1x1x8xf32>
    %188 = vector.extract_strided_slice %70 {offsets = [39, 0], sizes = [1, 8], strides = [1, 1]} : vector<49x8xf32> to vector<1x8xf32>
    %189 = vector.shape_cast %188 : vector<1x8xf32> to vector<8xf32>
    %190 = vector.shape_cast %189 : vector<8xf32> to vector<1x1x8xf32>
    %191 = vector.extract_strided_slice %70 {offsets = [40, 0], sizes = [1, 8], strides = [1, 1]} : vector<49x8xf32> to vector<1x8xf32>
    %192 = vector.shape_cast %191 : vector<1x8xf32> to vector<8xf32>
    %193 = vector.shape_cast %192 : vector<8xf32> to vector<1x1x8xf32>
    %194 = vector.extract_strided_slice %70 {offsets = [41, 0], sizes = [1, 8], strides = [1, 1]} : vector<49x8xf32> to vector<1x8xf32>
    %195 = vector.shape_cast %194 : vector<1x8xf32> to vector<8xf32>
    %196 = vector.shape_cast %195 : vector<8xf32> to vector<1x1x8xf32>
    %197 = vector.extract_strided_slice %70 {offsets = [42, 0], sizes = [1, 8], strides = [1, 1]} : vector<49x8xf32> to vector<1x8xf32>
    %198 = vector.shape_cast %197 : vector<1x8xf32> to vector<8xf32>
    %199 = vector.shape_cast %198 : vector<8xf32> to vector<1x1x8xf32>
    %200 = vector.extract_strided_slice %70 {offsets = [43, 0], sizes = [1, 8], strides = [1, 1]} : vector<49x8xf32> to vector<1x8xf32>
    %201 = vector.shape_cast %200 : vector<1x8xf32> to vector<8xf32>
    %202 = vector.shape_cast %201 : vector<8xf32> to vector<1x1x8xf32>
    %203 = vector.extract_strided_slice %70 {offsets = [44, 0], sizes = [1, 8], strides = [1, 1]} : vector<49x8xf32> to vector<1x8xf32>
    %204 = vector.shape_cast %203 : vector<1x8xf32> to vector<8xf32>
    %205 = vector.shape_cast %204 : vector<8xf32> to vector<1x1x8xf32>
    %206 = vector.extract_strided_slice %70 {offsets = [45, 0], sizes = [1, 8], strides = [1, 1]} : vector<49x8xf32> to vector<1x8xf32>
    %207 = vector.shape_cast %206 : vector<1x8xf32> to vector<8xf32>
    %208 = vector.shape_cast %207 : vector<8xf32> to vector<1x1x8xf32>
    %209 = vector.extract_strided_slice %70 {offsets = [46, 0], sizes = [1, 8], strides = [1, 1]} : vector<49x8xf32> to vector<1x8xf32>
    %210 = vector.shape_cast %209 : vector<1x8xf32> to vector<8xf32>
    %211 = vector.shape_cast %210 : vector<8xf32> to vector<1x1x8xf32>
    %212 = vector.extract_strided_slice %70 {offsets = [47, 0], sizes = [1, 8], strides = [1, 1]} : vector<49x8xf32> to vector<1x8xf32>
    %213 = vector.shape_cast %212 : vector<1x8xf32> to vector<8xf32>
    %214 = vector.shape_cast %213 : vector<8xf32> to vector<1x1x8xf32>
    %215 = vector.extract_strided_slice %70 {offsets = [48, 0], sizes = [1, 8], strides = [1, 1]} : vector<49x8xf32> to vector<1x8xf32>
    %216 = vector.shape_cast %215 : vector<1x8xf32> to vector<8xf32>
    %217 = vector.shape_cast %216 : vector<8xf32> to vector<1x1x8xf32>
    %c0_29 = arith.constant 0 : index
    %c0_30 = arith.constant 0 : index
    %218 = vector.load %arg8[%c0_29, %c0_30] : memref<1x8xf32, #tpu.memory_space<vmem>>, vector<1x8xf32>
    %219 = vector.shape_cast %218 : vector<1x8xf32> to vector<1x1x8xf32>
    %220 = vector.shape_cast %219 : vector<1x1x8xf32> to vector<1x1x8xf32>
    %221 = vector.broadcast %220 : vector<1x1x8xf32> to vector<8x8x8xf32>
    %c0_31 = arith.constant 0 : index
    %c0_32 = arith.constant 0 : index
    %c0_33 = arith.constant 0 : index
    %222 = vector.load %arg11[%c0_31, %c0_32, %c0_33] : memref<14x14x8xf32, #tpu.memory_space<vmem>>, vector<14x8x8xf32>
    %223 = vector.extract_strided_slice %222 {offsets = [0, 0, 0], sizes = [8, 8, 8], strides = [1, 1, 1]} : vector<14x8x8xf32> to vector<8x8x8xf32>
    %224 = vector.broadcast %73 : vector<1x1x8xf32> to vector<8x8x8xf32>
    %225 = arith.mulf %223, %224 : vector<8x8x8xf32>
    %226 = arith.addf %221, %225 : vector<8x8x8xf32>
    %227 = vector.extract_strided_slice %222 {offsets = [1, 0, 0], sizes = [8, 8, 8], strides = [1, 1, 1]} : vector<14x8x8xf32> to vector<8x8x8xf32>
    %228 = vector.broadcast %94 : vector<1x1x8xf32> to vector<8x8x8xf32>
    %229 = arith.mulf %227, %228 : vector<8x8x8xf32>
    %230 = arith.addf %226, %229 : vector<8x8x8xf32>
    %231 = vector.extract_strided_slice %222 {offsets = [2, 0, 0], sizes = [8, 8, 8], strides = [1, 1, 1]} : vector<14x8x8xf32> to vector<8x8x8xf32>
    %232 = vector.broadcast %115 : vector<1x1x8xf32> to vector<8x8x8xf32>
    %233 = arith.mulf %231, %232 : vector<8x8x8xf32>
    %234 = arith.addf %230, %233 : vector<8x8x8xf32>
    %235 = vector.extract_strided_slice %222 {offsets = [3, 0, 0], sizes = [8, 8, 8], strides = [1, 1, 1]} : vector<14x8x8xf32> to vector<8x8x8xf32>
    %236 = vector.broadcast %136 : vector<1x1x8xf32> to vector<8x8x8xf32>
    %237 = arith.mulf %235, %236 : vector<8x8x8xf32>
    %238 = arith.addf %234, %237 : vector<8x8x8xf32>
    %239 = vector.extract_strided_slice %222 {offsets = [4, 0, 0], sizes = [8, 8, 8], strides = [1, 1, 1]} : vector<14x8x8xf32> to vector<8x8x8xf32>
    %240 = vector.broadcast %157 : vector<1x1x8xf32> to vector<8x8x8xf32>
    %241 = arith.mulf %239, %240 : vector<8x8x8xf32>
    %242 = arith.addf %238, %241 : vector<8x8x8xf32>
    %243 = vector.extract_strided_slice %222 {offsets = [5, 0, 0], sizes = [8, 8, 8], strides = [1, 1, 1]} : vector<14x8x8xf32> to vector<8x8x8xf32>
    %244 = vector.broadcast %178 : vector<1x1x8xf32> to vector<8x8x8xf32>
    %245 = arith.mulf %243, %244 : vector<8x8x8xf32>
    %246 = arith.addf %242, %245 : vector<8x8x8xf32>
    %247 = vector.extract_strided_slice %222 {offsets = [6, 0, 0], sizes = [8, 8, 8], strides = [1, 1, 1]} : vector<14x8x8xf32> to vector<8x8x8xf32>
    %248 = vector.broadcast %199 : vector<1x1x8xf32> to vector<8x8x8xf32>
    %249 = arith.mulf %247, %248 : vector<8x8x8xf32>
    %250 = arith.addf %246, %249 : vector<8x8x8xf32>
    %c0_34 = arith.constant 0 : index
    %c1 = arith.constant 1 : index
    %c0_35 = arith.constant 0 : index
    %251 = vector.load %arg11[%c0_34, %c1, %c0_35] : memref<14x14x8xf32, #tpu.memory_space<vmem>>, vector<14x8x8xf32>
    %252 = vector.extract_strided_slice %251 {offsets = [0, 0, 0], sizes = [8, 8, 8], strides = [1, 1, 1]} : vector<14x8x8xf32> to vector<8x8x8xf32>
    %253 = vector.broadcast %76 : vector<1x1x8xf32> to vector<8x8x8xf32>
    %254 = arith.mulf %252, %253 : vector<8x8x8xf32>
    %255 = arith.addf %250, %254 : vector<8x8x8xf32>
    %256 = vector.extract_strided_slice %251 {offsets = [1, 0, 0], sizes = [8, 8, 8], strides = [1, 1, 1]} : vector<14x8x8xf32> to vector<8x8x8xf32>
    %257 = vector.broadcast %97 : vector<1x1x8xf32> to vector<8x8x8xf32>
    %258 = arith.mulf %256, %257 : vector<8x8x8xf32>
    %259 = arith.addf %255, %258 : vector<8x8x8xf32>
    %260 = vector.extract_strided_slice %251 {offsets = [2, 0, 0], sizes = [8, 8, 8], strides = [1, 1, 1]} : vector<14x8x8xf32> to vector<8x8x8xf32>
    %261 = vector.broadcast %118 : vector<1x1x8xf32> to vector<8x8x8xf32>
    %262 = arith.mulf %260, %261 : vector<8x8x8xf32>
    %263 = arith.addf %259, %262 : vector<8x8x8xf32>
    %264 = vector.extract_strided_slice %251 {offsets = [3, 0, 0], sizes = [8, 8, 8], strides = [1, 1, 1]} : vector<14x8x8xf32> to vector<8x8x8xf32>
    %265 = vector.broadcast %139 : vector<1x1x8xf32> to vector<8x8x8xf32>
    %266 = arith.mulf %264, %265 : vector<8x8x8xf32>
    %267 = arith.addf %263, %266 : vector<8x8x8xf32>
    %268 = vector.extract_strided_slice %251 {offsets = [4, 0, 0], sizes = [8, 8, 8], strides = [1, 1, 1]} : vector<14x8x8xf32> to vector<8x8x8xf32>
    %269 = vector.broadcast %160 : vector<1x1x8xf32> to vector<8x8x8xf32>
    %270 = arith.mulf %268, %269 : vector<8x8x8xf32>
    %271 = arith.addf %267, %270 : vector<8x8x8xf32>
    %272 = vector.extract_strided_slice %251 {offsets = [5, 0, 0], sizes = [8, 8, 8], strides = [1, 1, 1]} : vector<14x8x8xf32> to vector<8x8x8xf32>
    %273 = vector.broadcast %181 : vector<1x1x8xf32> to vector<8x8x8xf32>
    %274 = arith.mulf %272, %273 : vector<8x8x8xf32>
    %275 = arith.addf %271, %274 : vector<8x8x8xf32>
    %276 = vector.extract_strided_slice %251 {offsets = [6, 0, 0], sizes = [8, 8, 8], strides = [1, 1, 1]} : vector<14x8x8xf32> to vector<8x8x8xf32>
    %277 = vector.broadcast %202 : vector<1x1x8xf32> to vector<8x8x8xf32>
    %278 = arith.mulf %276, %277 : vector<8x8x8xf32>
    %279 = arith.addf %275, %278 : vector<8x8x8xf32>
    %c0_36 = arith.constant 0 : index
    %c2 = arith.constant 2 : index
    %c0_37 = arith.constant 0 : index
    %280 = vector.load %arg11[%c0_36, %c2, %c0_37] : memref<14x14x8xf32, #tpu.memory_space<vmem>>, vector<14x8x8xf32>
    %281 = vector.extract_strided_slice %280 {offsets = [0, 0, 0], sizes = [8, 8, 8], strides = [1, 1, 1]} : vector<14x8x8xf32> to vector<8x8x8xf32>
    %282 = vector.broadcast %79 : vector<1x1x8xf32> to vector<8x8x8xf32>
    %283 = arith.mulf %281, %282 : vector<8x8x8xf32>
    %284 = arith.addf %279, %283 : vector<8x8x8xf32>
    %285 = vector.extract_strided_slice %280 {offsets = [1, 0, 0], sizes = [8, 8, 8], strides = [1, 1, 1]} : vector<14x8x8xf32> to vector<8x8x8xf32>
    %286 = vector.broadcast %100 : vector<1x1x8xf32> to vector<8x8x8xf32>
    %287 = arith.mulf %285, %286 : vector<8x8x8xf32>
    %288 = arith.addf %284, %287 : vector<8x8x8xf32>
    %289 = vector.extract_strided_slice %280 {offsets = [2, 0, 0], sizes = [8, 8, 8], strides = [1, 1, 1]} : vector<14x8x8xf32> to vector<8x8x8xf32>
    %290 = vector.broadcast %121 : vector<1x1x8xf32> to vector<8x8x8xf32>
    %291 = arith.mulf %289, %290 : vector<8x8x8xf32>
    %292 = arith.addf %288, %291 : vector<8x8x8xf32>
    %293 = vector.extract_strided_slice %280 {offsets = [3, 0, 0], sizes = [8, 8, 8], strides = [1, 1, 1]} : vector<14x8x8xf32> to vector<8x8x8xf32>
    %294 = vector.broadcast %142 : vector<1x1x8xf32> to vector<8x8x8xf32>
    %295 = arith.mulf %293, %294 : vector<8x8x8xf32>
    %296 = arith.addf %292, %295 : vector<8x8x8xf32>
    %297 = vector.extract_strided_slice %280 {offsets = [4, 0, 0], sizes = [8, 8, 8], strides = [1, 1, 1]} : vector<14x8x8xf32> to vector<8x8x8xf32>
    %298 = vector.broadcast %163 : vector<1x1x8xf32> to vector<8x8x8xf32>
    %299 = arith.mulf %297, %298 : vector<8x8x8xf32>
    %300 = arith.addf %296, %299 : vector<8x8x8xf32>
    %301 = vector.extract_strided_slice %280 {offsets = [5, 0, 0], sizes = [8, 8, 8], strides = [1, 1, 1]} : vector<14x8x8xf32> to vector<8x8x8xf32>
    %302 = vector.broadcast %184 : vector<1x1x8xf32> to vector<8x8x8xf32>
    %303 = arith.mulf %301, %302 : vector<8x8x8xf32>
    %304 = arith.addf %300, %303 : vector<8x8x8xf32>
    %305 = vector.extract_strided_slice %280 {offsets = [6, 0, 0], sizes = [8, 8, 8], strides = [1, 1, 1]} : vector<14x8x8xf32> to vector<8x8x8xf32>
    %306 = vector.broadcast %205 : vector<1x1x8xf32> to vector<8x8x8xf32>
    %307 = arith.mulf %305, %306 : vector<8x8x8xf32>
    %308 = arith.addf %304, %307 : vector<8x8x8xf32>
    %c0_38 = arith.constant 0 : index
    %c3_39 = arith.constant 3 : index
    %c0_40 = arith.constant 0 : index
    %309 = vector.load %arg11[%c0_38, %c3_39, %c0_40] : memref<14x14x8xf32, #tpu.memory_space<vmem>>, vector<14x8x8xf32>
    %310 = vector.extract_strided_slice %309 {offsets = [0, 0, 0], sizes = [8, 8, 8], strides = [1, 1, 1]} : vector<14x8x8xf32> to vector<8x8x8xf32>
    %311 = vector.broadcast %82 : vector<1x1x8xf32> to vector<8x8x8xf32>
    %312 = arith.mulf %310, %311 : vector<8x8x8xf32>
    %313 = arith.addf %308, %312 : vector<8x8x8xf32>
    %314 = vector.extract_strided_slice %309 {offsets = [1, 0, 0], sizes = [8, 8, 8], strides = [1, 1, 1]} : vector<14x8x8xf32> to vector<8x8x8xf32>
    %315 = vector.broadcast %103 : vector<1x1x8xf32> to vector<8x8x8xf32>
    %316 = arith.mulf %314, %315 : vector<8x8x8xf32>
    %317 = arith.addf %313, %316 : vector<8x8x8xf32>
    %318 = vector.extract_strided_slice %309 {offsets = [2, 0, 0], sizes = [8, 8, 8], strides = [1, 1, 1]} : vector<14x8x8xf32> to vector<8x8x8xf32>
    %319 = vector.broadcast %124 : vector<1x1x8xf32> to vector<8x8x8xf32>
    %320 = arith.mulf %318, %319 : vector<8x8x8xf32>
    %321 = arith.addf %317, %320 : vector<8x8x8xf32>
    %322 = vector.extract_strided_slice %309 {offsets = [3, 0, 0], sizes = [8, 8, 8], strides = [1, 1, 1]} : vector<14x8x8xf32> to vector<8x8x8xf32>
    %323 = vector.broadcast %145 : vector<1x1x8xf32> to vector<8x8x8xf32>
    %324 = arith.mulf %322, %323 : vector<8x8x8xf32>
    %325 = arith.addf %321, %324 : vector<8x8x8xf32>
    %326 = vector.extract_strided_slice %309 {offsets = [4, 0, 0], sizes = [8, 8, 8], strides = [1, 1, 1]} : vector<14x8x8xf32> to vector<8x8x8xf32>
    %327 = vector.broadcast %166 : vector<1x1x8xf32> to vector<8x8x8xf32>
    %328 = arith.mulf %326, %327 : vector<8x8x8xf32>
    %329 = arith.addf %325, %328 : vector<8x8x8xf32>
    %330 = vector.extract_strided_slice %309 {offsets = [5, 0, 0], sizes = [8, 8, 8], strides = [1, 1, 1]} : vector<14x8x8xf32> to vector<8x8x8xf32>
    %331 = vector.broadcast %187 : vector<1x1x8xf32> to vector<8x8x8xf32>
    %332 = arith.mulf %330, %331 : vector<8x8x8xf32>
    %333 = arith.addf %329, %332 : vector<8x8x8xf32>
    %334 = vector.extract_strided_slice %309 {offsets = [6, 0, 0], sizes = [8, 8, 8], strides = [1, 1, 1]} : vector<14x8x8xf32> to vector<8x8x8xf32>
    %335 = vector.broadcast %208 : vector<1x1x8xf32> to vector<8x8x8xf32>
    %336 = arith.mulf %334, %335 : vector<8x8x8xf32>
    %337 = arith.addf %333, %336 : vector<8x8x8xf32>
    %c0_41 = arith.constant 0 : index
    %c4 = arith.constant 4 : index
    %c0_42 = arith.constant 0 : index
    %338 = vector.load %arg11[%c0_41, %c4, %c0_42] : memref<14x14x8xf32, #tpu.memory_space<vmem>>, vector<14x8x8xf32>
    %339 = vector.extract_strided_slice %338 {offsets = [0, 0, 0], sizes = [8, 8, 8], strides = [1, 1, 1]} : vector<14x8x8xf32> to vector<8x8x8xf32>
    %340 = vector.broadcast %85 : vector<1x1x8xf32> to vector<8x8x8xf32>
    %341 = arith.mulf %339, %340 : vector<8x8x8xf32>
    %342 = arith.addf %337, %341 : vector<8x8x8xf32>
    %343 = vector.extract_strided_slice %338 {offsets = [1, 0, 0], sizes = [8, 8, 8], strides = [1, 1, 1]} : vector<14x8x8xf32> to vector<8x8x8xf32>
    %344 = vector.broadcast %106 : vector<1x1x8xf32> to vector<8x8x8xf32>
    %345 = arith.mulf %343, %344 : vector<8x8x8xf32>
    %346 = arith.addf %342, %345 : vector<8x8x8xf32>
    %347 = vector.extract_strided_slice %338 {offsets = [2, 0, 0], sizes = [8, 8, 8], strides = [1, 1, 1]} : vector<14x8x8xf32> to vector<8x8x8xf32>
    %348 = vector.broadcast %127 : vector<1x1x8xf32> to vector<8x8x8xf32>
    %349 = arith.mulf %347, %348 : vector<8x8x8xf32>
    %350 = arith.addf %346, %349 : vector<8x8x8xf32>
    %351 = vector.extract_strided_slice %338 {offsets = [3, 0, 0], sizes = [8, 8, 8], strides = [1, 1, 1]} : vector<14x8x8xf32> to vector<8x8x8xf32>
    %352 = vector.broadcast %148 : vector<1x1x8xf32> to vector<8x8x8xf32>
    %353 = arith.mulf %351, %352 : vector<8x8x8xf32>
    %354 = arith.addf %350, %353 : vector<8x8x8xf32>
    %355 = vector.extract_strided_slice %338 {offsets = [4, 0, 0], sizes = [8, 8, 8], strides = [1, 1, 1]} : vector<14x8x8xf32> to vector<8x8x8xf32>
    %356 = vector.broadcast %169 : vector<1x1x8xf32> to vector<8x8x8xf32>
    %357 = arith.mulf %355, %356 : vector<8x8x8xf32>
    %358 = arith.addf %354, %357 : vector<8x8x8xf32>
    %359 = vector.extract_strided_slice %338 {offsets = [5, 0, 0], sizes = [8, 8, 8], strides = [1, 1, 1]} : vector<14x8x8xf32> to vector<8x8x8xf32>
    %360 = vector.broadcast %190 : vector<1x1x8xf32> to vector<8x8x8xf32>
    %361 = arith.mulf %359, %360 : vector<8x8x8xf32>
    %362 = arith.addf %358, %361 : vector<8x8x8xf32>
    %363 = vector.extract_strided_slice %338 {offsets = [6, 0, 0], sizes = [8, 8, 8], strides = [1, 1, 1]} : vector<14x8x8xf32> to vector<8x8x8xf32>
    %364 = vector.broadcast %211 : vector<1x1x8xf32> to vector<8x8x8xf32>
    %365 = arith.mulf %363, %364 : vector<8x8x8xf32>
    %366 = arith.addf %362, %365 : vector<8x8x8xf32>
    %c0_43 = arith.constant 0 : index
    %c5 = arith.constant 5 : index
    %c0_44 = arith.constant 0 : index
    %367 = vector.load %arg11[%c0_43, %c5, %c0_44] : memref<14x14x8xf32, #tpu.memory_space<vmem>>, vector<14x8x8xf32>
    %368 = vector.extract_strided_slice %367 {offsets = [0, 0, 0], sizes = [8, 8, 8], strides = [1, 1, 1]} : vector<14x8x8xf32> to vector<8x8x8xf32>
    %369 = vector.broadcast %88 : vector<1x1x8xf32> to vector<8x8x8xf32>
    %370 = arith.mulf %368, %369 : vector<8x8x8xf32>
    %371 = arith.addf %366, %370 : vector<8x8x8xf32>
    %372 = vector.extract_strided_slice %367 {offsets = [1, 0, 0], sizes = [8, 8, 8], strides = [1, 1, 1]} : vector<14x8x8xf32> to vector<8x8x8xf32>
    %373 = vector.broadcast %109 : vector<1x1x8xf32> to vector<8x8x8xf32>
    %374 = arith.mulf %372, %373 : vector<8x8x8xf32>
    %375 = arith.addf %371, %374 : vector<8x8x8xf32>
    %376 = vector.extract_strided_slice %367 {offsets = [2, 0, 0], sizes = [8, 8, 8], strides = [1, 1, 1]} : vector<14x8x8xf32> to vector<8x8x8xf32>
    %377 = vector.broadcast %130 : vector<1x1x8xf32> to vector<8x8x8xf32>
    %378 = arith.mulf %376, %377 : vector<8x8x8xf32>
    %379 = arith.addf %375, %378 : vector<8x8x8xf32>
    %380 = vector.extract_strided_slice %367 {offsets = [3, 0, 0], sizes = [8, 8, 8], strides = [1, 1, 1]} : vector<14x8x8xf32> to vector<8x8x8xf32>
    %381 = vector.broadcast %151 : vector<1x1x8xf32> to vector<8x8x8xf32>
    %382 = arith.mulf %380, %381 : vector<8x8x8xf32>
    %383 = arith.addf %379, %382 : vector<8x8x8xf32>
    %384 = vector.extract_strided_slice %367 {offsets = [4, 0, 0], sizes = [8, 8, 8], strides = [1, 1, 1]} : vector<14x8x8xf32> to vector<8x8x8xf32>
    %385 = vector.broadcast %172 : vector<1x1x8xf32> to vector<8x8x8xf32>
    %386 = arith.mulf %384, %385 : vector<8x8x8xf32>
    %387 = arith.addf %383, %386 : vector<8x8x8xf32>
    %388 = vector.extract_strided_slice %367 {offsets = [5, 0, 0], sizes = [8, 8, 8], strides = [1, 1, 1]} : vector<14x8x8xf32> to vector<8x8x8xf32>
    %389 = vector.broadcast %193 : vector<1x1x8xf32> to vector<8x8x8xf32>
    %390 = arith.mulf %388, %389 : vector<8x8x8xf32>
    %391 = arith.addf %387, %390 : vector<8x8x8xf32>
    %392 = vector.extract_strided_slice %367 {offsets = [6, 0, 0], sizes = [8, 8, 8], strides = [1, 1, 1]} : vector<14x8x8xf32> to vector<8x8x8xf32>
    %393 = vector.broadcast %214 : vector<1x1x8xf32> to vector<8x8x8xf32>
    %394 = arith.mulf %392, %393 : vector<8x8x8xf32>
    %395 = arith.addf %391, %394 : vector<8x8x8xf32>
    %c0_45 = arith.constant 0 : index
    %c6 = arith.constant 6 : index
    %c0_46 = arith.constant 0 : index
    %396 = vector.load %arg11[%c0_45, %c6, %c0_46] : memref<14x14x8xf32, #tpu.memory_space<vmem>>, vector<14x8x8xf32>
    %397 = vector.extract_strided_slice %396 {offsets = [0, 0, 0], sizes = [8, 8, 8], strides = [1, 1, 1]} : vector<14x8x8xf32> to vector<8x8x8xf32>
    %398 = vector.broadcast %91 : vector<1x1x8xf32> to vector<8x8x8xf32>
    %399 = arith.mulf %397, %398 : vector<8x8x8xf32>
    %400 = arith.addf %395, %399 : vector<8x8x8xf32>
    %401 = vector.extract_strided_slice %396 {offsets = [1, 0, 0], sizes = [8, 8, 8], strides = [1, 1, 1]} : vector<14x8x8xf32> to vector<8x8x8xf32>
    %402 = vector.broadcast %112 : vector<1x1x8xf32> to vector<8x8x8xf32>
    %403 = arith.mulf %401, %402 : vector<8x8x8xf32>
    %404 = arith.addf %400, %403 : vector<8x8x8xf32>
    %405 = vector.extract_strided_slice %396 {offsets = [2, 0, 0], sizes = [8, 8, 8], strides = [1, 1, 1]} : vector<14x8x8xf32> to vector<8x8x8xf32>
    %406 = vector.broadcast %133 : vector<1x1x8xf32> to vector<8x8x8xf32>
    %407 = arith.mulf %405, %406 : vector<8x8x8xf32>
    %408 = arith.addf %404, %407 : vector<8x8x8xf32>
    %409 = vector.extract_strided_slice %396 {offsets = [3, 0, 0], sizes = [8, 8, 8], strides = [1, 1, 1]} : vector<14x8x8xf32> to vector<8x8x8xf32>
    %410 = vector.broadcast %154 : vector<1x1x8xf32> to vector<8x8x8xf32>
    %411 = arith.mulf %409, %410 : vector<8x8x8xf32>
    %412 = arith.addf %408, %411 : vector<8x8x8xf32>
    %413 = vector.extract_strided_slice %396 {offsets = [4, 0, 0], sizes = [8, 8, 8], strides = [1, 1, 1]} : vector<14x8x8xf32> to vector<8x8x8xf32>
    %414 = vector.broadcast %175 : vector<1x1x8xf32> to vector<8x8x8xf32>
    %415 = arith.mulf %413, %414 : vector<8x8x8xf32>
    %416 = arith.addf %412, %415 : vector<8x8x8xf32>
    %417 = vector.extract_strided_slice %396 {offsets = [5, 0, 0], sizes = [8, 8, 8], strides = [1, 1, 1]} : vector<14x8x8xf32> to vector<8x8x8xf32>
    %418 = vector.broadcast %196 : vector<1x1x8xf32> to vector<8x8x8xf32>
    %419 = arith.mulf %417, %418 : vector<8x8x8xf32>
    %420 = arith.addf %416, %419 : vector<8x8x8xf32>
    %421 = vector.extract_strided_slice %396 {offsets = [6, 0, 0], sizes = [8, 8, 8], strides = [1, 1, 1]} : vector<14x8x8xf32> to vector<8x8x8xf32>
    %422 = vector.broadcast %217 : vector<1x1x8xf32> to vector<8x8x8xf32>
    %423 = arith.mulf %421, %422 : vector<8x8x8xf32>
    %424 = arith.addf %420, %423 : vector<8x8x8xf32>
    %c0_47 = arith.constant 0 : index
    %c0_48 = arith.constant 0 : index
    %c0_49 = arith.constant 0 : index
    %c0_50 = arith.constant 0 : index
    %425 = vector.load %arg9[%c0_47, %c0_48, %c0_49, %c0_50] : memref<1x8x8x8xf32, #tpu.memory_space<vmem>>, vector<1x8x8x8xf32>
    %426 = vector.shape_cast %425 : vector<1x8x8x8xf32> to vector<8x8x8xf32>
    %427 = vector.shape_cast %424 : vector<8x8x8xf32> to vector<1x8x8x8xf32>
    tpu.vector_store %arg9[%c0_47, %c0_48, %c0_49, %c0_50], %427 {strides = array<i32>} : memref<1x8x8x8xf32, #tpu.memory_space<vmem>>, vector<1x8x8x8xf32>,
    return
  }
  func.func @transform_0(%arg0: i32, %arg1: i32) -> (i32, i32, i32, i32) {
    %c0_i32 = arith.constant 0 : i32
    %c0_i32_0 = arith.constant 0 : i32
    %c0_i32_1 = arith.constant 0 : i32
    %c0_i32_2 = arith.constant 0 : i32
    return %arg0, %c0_i32, %c0_i32_0, %c0_i32_1 : i32, i32, i32, i32
  }
  func.func @transform_1(%arg0: i32, %arg1: i32) -> (i32, i32) {
    %c0_i32 = arith.constant 0 : i32
    %c0_i32_0 = arith.constant 0 : i32
    %c0_i32_1 = arith.constant 0 : i32
    return %c0_i32, %c0_i32_0 : i32, i32
  }
  func.func @transform_2(%arg0: i32, %arg1: i32) -> (i32, i32) {
    %c0_i32 = arith.constant 0 : i32
    %c0_i32_0 = arith.constant 0 : i32
    %c0_i32_1 = arith.constant 0 : i32
    return %c0_i32, %c0_i32_0 : i32, i32
  }
  func.func @transform_3(%arg0: i32, %arg1: i32) -> (i32, i32) {
    %c0_i32 = arith.constant 0 : i32
    %c0_i32_0 = arith.constant 0 : i32
    %c0_i32_1 = arith.constant 0 : i32
    return %c0_i32, %c0_i32_0 : i32, i32
  }
  func.func @transform_4(%arg0: i32, %arg1: i32) -> (i32, i32, i32, i32) {
    %c0_i32 = arith.constant 0 : i32
    %c0_i32_0 = arith.constant 0 : i32
    %c0_i32_1 = arith.constant 0 : i32
    %c0_i32_2 = arith.constant 0 : i32
    return %arg0, %c0_i32, %c0_i32_0, %c0_i32_1 : i32, i32, i32, i32
  }
  func.func @transform_5(%arg0: i32, %arg1: i32) -> (i32, i32) {
    %c0_i32 = arith.constant 0 : i32
    %c0_i32_0 = arith.constant 0 : i32
    %c0_i32_1 = arith.constant 0 : i32
    return %c0_i32, %c0_i32_0 : i32, i32
  }
  func.func @transform_6(%arg0: i32, %arg1: i32) -> (i32, i32) {
    %c0_i32 = arith.constant 0 : i32
    %c0_i32_0 = arith.constant 0 : i32
    %c0_i32_1 = arith.constant 0 : i32
    return %c0_i32, %c0_i32_0 : i32, i32
  }
  func.func @transform_7(%arg0: i32, %arg1: i32) -> (i32, i32, i32, i32) {
    %c0_i32 = arith.constant 0 : i32
    %c0_i32_0 = arith.constant 0 : i32
    %c0_i32_1 = arith.constant 0 : i32
    return %arg0, %arg1, %c0_i32, %c0_i32_0 : i32, i32, i32, i32
  }
  func.func @transform_8(%arg0: i32, %arg1: i32) -> (i32, i32, i32, i32) {
    %c0_i32 = arith.constant 0 : i32
    %c0_i32_0 = arith.constant 0 : i32
    %c0_i32_1 = arith.constant 0 : i32
    return %arg0, %arg1, %c0_i32, %c0_i32_0 : i32, i32, i32, i32
  }
}

</mosaic_0001>

<bundles_post_ra>
// kernel: tpu_custom_call.1
= control target key start
LH: loop header
LB: loop body
LE: loop exit
PB: predicated region body
PF: predicated region fallthrough
CT: control target
= control target key end

     0   :  { %14 = vsyncpa [#allocation4], 0  ;;  %s4733_s0 = inlined_call_operand.vmem [shape: bf16[2,28,8,8], index: 0, kind: input, shape index: {}]   ;;  %s4734_s1 = inlined_call_operand.vmem [shape: bf16[8,8], index: 1, kind: input, shape index: {}]   ;;  %s4735_s2 = inlined_call_operand.vmem [shape: f32[1,8], index: 2, kind: input, shape index: {}]   ;;  %s4736_s3 = inlined_call_operand.vmem [shape: f32[3,8], index: 3, kind: input, shape index: {}]   ;;  %s4737_s4 = inlined_call_operand.vmem [shape: bf16[2,14,8,8], index: 4, kind: input, shape index: {}]   ;;  %s4738_s5 = inlined_call_operand.vmem [shape: f32[49,8], index: 5, kind: input, shape index: {}]   ;;  %s4739_s6 = inlined_call_operand.vmem [shape: f32[1,8], index: 6, kind: input, shape index: {}]   ;;  %s4740_s7 = inlined_call_operand.hbm [shape: f32[2,8,8,8], index: 7, kind: output, shape index: {0}]   ;;  %s4741_s8 = inlined_call_operand.hbm [shape: f32[2,8,8,8], index: 8, kind: output, shape index: {1}]  }
   0x1   :  { %16 = vsyncpa [#allocation4 + $0x1], 0 }
   0x2   :  { %17 = vsyncpa [#allocation6], 0 }
   0x3   :  { %19 = vsyncpa [#allocation6 + $0x1], 0  ;;  %s2463_s27 = smov 0   ;;  %s2465_s28 = smov 0  }
   0x4   :  { %s2467_s29 = smov 0   ;;  %s2469_s30 = smov 0  }
   0x5   :  { %s2471_s9 = smov 0   ;;  %s2473_s10 = smov 0  }
   0x6 LB: > { %s2126_s11 = sadd.s32 4294967295, %s2410_s10   ;;  %s2127_s12 = sadd.s32 4294967294, %s2410_s10   ;;  %s2410_s10 = sphi %s2473_s10, %s25_s10   ;;  %s2406_s9 = sphi %s2471_s9, %s5633_s9   ;;  %s2402_s30 = sphi %s2469_s30, %s5632_s30   ;;  %s2398_s29 = sphi %s2467_s29, %s5631_s29   ;;  %s2394_s28 = sphi %s2465_s28, %s5630_s28   ;;  %s2390_s27 = sphi %s2463_s27, %s5629_s27  }
   0x7   : > { %s37_s13 = sadd.s32 1, %s2406_s9  ;;  %s203_s14 = sadd.s32 1, %s2398_s29 }
   0x8   : > { %p39_p0 = scmp.ge.s32.totalorder %s37_s13, 2  ;;  %p213_p1 = scmp.ne.s32.totalorder %s2398_s29, %s2394_s28 }
   0x9   : > { %p214_p2 = scmp.eq.s32.totalorder %s2126_s11, 1  ;;  %p219_p3 = scmp.ne.s32.totalorder %s2394_s28, %s2390_s27 }
   0xa   : > { %s5635_s13 = smov (%p39_p0, %s37_s13), 0  ;;  %p220_p5 = scmp.eq.s32.totalorder %s2127_s12, 1 }
   0xb   : > { %p2503_p4 = por %p214_p2, %p213_p1  ;;  %s198_s16 = ssub.s32 %s2406_s9, %s5635_s13 }
   0xc   : > { %p2130_p6 = scmp.ge.s32.totalorder %s2410_s10, 1  ;;  %p201_p7 = scmp.eq.s32.totalorder %s198_s16, 0 }
   0xd   : > { %p2510_p8 = por %p220_p5, %p219_p3  ;;  %p297_p9 = scmp.lt.s32.totalorder %s2410_s10, 3 }
   0xe   : > { %s2516_s18 = scalar_select %p201_p7, %s2398_s29, %s203_s14  }
   0xf   : > { %p298_p10 = pnand %p2130_p6, %p297_p9 }
  0x11   : > { %301 = sbr.rel (%p298_p10) target bundleno = 574 (0x23e), region = 48 }
  0x16   : > { %v399_v0 = vld [vmem:[%s4734_s1] sm:$0xf]  ;;  %vm464_vm0 = vcmask 1043456   ;;  %p341_p11 = scmp.lt.s32.totalorder %s2402_s30, 1  ;;  %v2412_v1 = vmov 0.0   ;;  %vm2413_vm1 = vmmov 0   ;;  %v558_v52 = vlaneseq }
  0x17   : > { %2204 = vmatprep.subr.bf16.mxu0 %v2412_v1  ;;  %v466_v2 = vsel %vm464_vm0, %v399_v0, 0  ;;  %2206 = vmatprep.mubr.msk.bf16.mxu0 %vm2413_vm1, %v2412_v1  ;;  %vm442_vm2 = vcmask 64512   ;;  %vm820_vm3 = vcmask 59392   ;;  %v2641_v54 = vld [vmem:[%s4738_s5] sm:$0xff]  ;;  %v2658_v59 = vld [vmem:[%s4738_s5 + $0x8] sm:$0xff]  ;;  %v2673_v63 = vld [vmem:[%s4738_s5 + $0x10] sm:$0xff] }
  0x18   : > { %2205 = vmatpush3.bf16.msra.mxu0 %v466_v2  ;;  %s2526_s21 = scalar_select %p341_p11, %s2402_s30, 1  ;;  %2234 = vmatprep.subr.bf16.mxu1 %v2412_v1  ;;  %821 = vst.msk [vmem:[#allocation2] sm:$0x7] %vm820_vm3, %v2412_v1  ;;  %835 = vst.msk [vmem:[#allocation2 + $0xb] sm:$0x7] %vm820_vm3, %v2412_v1  ;;  %v559_v53 = vshrl.u32 %v558_v52, 7 }
  0x19   : > { %2235 = vmatpush3.bf16.msra.mxu1 %v466_v2  ;;  %2222 = vmatprep.mubr.msk.bf16.mxu1 %vm2413_vm1, %v2412_v1  ;;  %822 = vst.msk [vmem:[#allocation2 + $0x10] sm:$0x7] %vm820_vm3, %v2412_v1  ;;  %823 = vst.msk [vmem:[#allocation2 + $0x20] sm:$0x7] %vm820_vm3, %v2412_v1  ;;  %v2685_v2 = vld [vmem:[%s4738_s5 + $0x20] sm:$0xff]  ;;  %s4835_s16 = sshll.u32 %s2402_s30, 10 }
  0x1a   : > { %s2236_s22 = smul.u32 112, %s2526_s21  ;;  %824 = vst.msk [vmem:[#allocation2 + $0x30] sm:$0x7] %vm820_vm3, %v2412_v1  ;;  %825 = vst.msk [vmem:[#allocation2 + $0x40] sm:$0x7] %vm820_vm3, %v2412_v1  ;;  %v2643_v55 = vsub.s32 6, %v559_v53 }
  0x1b   : > { %826 = vst.msk [vmem:[#allocation2 + $0x50] sm:$0x7] %vm820_vm3, %v2412_v1  ;;  %827 = vst.msk [vmem:[#allocation2 + $0x60] sm:$0x7] %vm820_vm3, %v2412_v1  ;;  %v2645_v56 = vsub.s32 5, %v559_v53  ;;  %v2660_v60 = vsub.s32 4, %v559_v53 }
  0x1c   : > { %s2535_s25 = scalar_lea.vmem %s4733_s0, %s2236_s22  ;;  %828 = vst.msk [vmem:[#allocation2 + $0x70] sm:$0x7] %vm820_vm3, %v2412_v1  ;;  %829 = vst.msk [vmem:[#allocation2 + $0x80] sm:$0x7] %vm820_vm3, %v2412_v1  ;;  %v2653_v58 = vrot.slane %v2641_v54, %v2643_v55  ;;  %v2675_v0 = vsub.s32 3, %v559_v53  ;;  %s2237_s11 = smul.u32 56, %s2526_s21 }
  0x1d   : > { %v357_v3 = vld [vmem:[%s2535_s25] sm:$0xf]  ;;  %v358_v4 = vld [vmem:[%s2535_s25 + $0x4] sm:$0xf]  ;;  %v359_v5 = vld [vmem:[%s2535_s25 + $0x8] sm:$0xf]  ;;  %v2649_v57 = vrot.slane %v2641_v54, %v2645_v56  ;;  %v2664_v61 = vrot.slane %v2658_v59, %v2660_v60  ;;  %v2668_v62 = vrot.slane %v2658_v59, %v2645_v56  ;;  %s4005_s22 = scalar_lea.hbm %s4741_s8, %s4835_s16 }
  0x1e   : > { %v360_v6 = vld [vmem:[%s2535_s25 + $0xc] sm:$0xf]  ;;  %v385_v7 = vadd.bf16 %v358_v4, %v357_v3  ;;  %v373_v8 = vld [vmem:[%s2535_s25 + $0x40] sm:$0xf]  ;;  %v374_v9 = vld [vmem:[%s2535_s25 + $0x44] sm:$0xf]  ;;  %s2743_s20 = scalar_lea.vmem %s4737_s4, %s2237_s11 }
  0x1f   : > { %v386_v10 = vadd.bf16 %v360_v6, %v359_v5  ;;  %v375_v11 = vld [vmem:[%s2535_s25 + $0x48] sm:$0xf]  ;;  %v376_v12 = vld [vmem:[%s2535_s25 + $0x4c] sm:$0xf]  ;;  %v393_v13 = vadd.bf16 %v374_v9, %v373_v8  ;;  %v361_v14 = vld [vmem:[%s2535_s25 + $0x10] sm:$0xf]  ;;  %v2702_v8 = vrot.slane %v2673_v63, %v2675_v0 }
  0x20   : > { %v394_v15 = vadd.bf16 %v376_v12, %v375_v11  ;;  %v362_v16 = vld [vmem:[%s2535_s25 + $0x14] sm:$0xf]  ;;  %v363_v17 = vld [vmem:[%s2535_s25 + $0x18] sm:$0xf]  ;;  %v364_v18 = vld [vmem:[%s2535_s25 + $0x1c] sm:$0xf] }
  0x21   : > { %v2136_v19 = vcombine.low %v385_v7, %v386_v10  ;;  %v377_v20 = vld [vmem:[%s2535_s25 + $0x50] sm:$0xf]  ;;  %v378_v21 = vld [vmem:[%s2535_s25 + $0x54] sm:$0xf]  ;;  %v379_v22 = vld [vmem:[%s2535_s25 + $0x58] sm:$0xf]  ;;  %v387_v25 = vadd.bf16 %v362_v16, %v361_v14  ;;  %v388_v26 = vadd.bf16 %v364_v18, %v363_v17 }
  0x22   : > { %v2140_v23 = vcombine.low %v393_v13, %v394_v15  ;;  %v380_v24 = vld [vmem:[%s2535_s25 + $0x5c] sm:$0xf]  ;;  %v395_v27 = vadd.bf16 %v378_v21, %v377_v20  ;;  %v365_v30 = vld [vmem:[%s2535_s25 + $0x20] sm:$0xf]  ;;  %v366_v31 = vld [vmem:[%s2535_s25 + $0x24] sm:$0xf]  ;;  %v2722_v13 = vrot.slane %v2673_v63, %v2660_v60 }
  0x23   : > { %2207 = vmatmul.mubr.msk.bf16.vlgmr.msra.gmra.mxu0 %vm442_vm2, %v2136_v19  ;;  %v396_v28 = vadd.bf16 %v380_v24, %v379_v22  ;;  %v2137_v29 = vcombine.low %v387_v25, %v388_v26  ;;  %v367_v33 = vld [vmem:[%s2535_s25 + $0x28] sm:$0xf]  ;;  %v368_v34 = vld [vmem:[%s2535_s25 + $0x2c] sm:$0xf]  ;;  %v381_v35 = vld [vmem:[%s2535_s25 + $0x60] sm:$0xf]  ;;  %v389_v39 = vadd.bf16 %v366_v31, %v365_v30 }
  0x24   : > { %2223 = vmatmul.mubr.msk.bf16.vlgmr.msra.gmra.mxu1 %vm442_vm2, %v2140_v23  ;;  %2210 = vmatprep.mubr.msk.bf16.mxu0 %vm2413_vm1, %v2412_v1  ;;  %v382_v36 = vld [vmem:[%s2535_s25 + $0x64] sm:$0xf]  ;;  %v383_v37 = vld [vmem:[%s2535_s25 + $0x68] sm:$0xf]  ;;  %v384_v38 = vld [vmem:[%s2535_s25 + $0x6c] sm:$0xf]  ;;  %v390_v40 = vadd.bf16 %v368_v34, %v367_v33 }
  0x25   : > { %2226 = vmatprep.mubr.msk.bf16.mxu1 %vm2413_vm1, %v2412_v1  ;;  %v2141_v32 = vcombine.low %v395_v27, %v396_v28  ;;  %v397_v41 = vadd.bf16 %v382_v36, %v381_v35  ;;  %v398_v42 = vadd.bf16 %v384_v38, %v383_v37  ;;  %v369_v44 = vld [vmem:[%s2535_s25 + $0x30] sm:$0xf]  ;;  %v370_v46 = vld [vmem:[%s2535_s25 + $0x34] sm:$0xf]  ;;  %v371_v47 = vld [vmem:[%s2535_s25 + $0x38] sm:$0xf] }
  0x26   : > { %v2138_v43 = vcombine.low %v389_v39, %v390_v40  ;;  %v372_v48 = vld [vmem:[%s2535_s25 + $0x3c] sm:$0xf]  ;;  %v391_v49 = vadd.bf16 %v370_v46, %v369_v44  ;;  %830 = vst.msk [vmem:[#allocation2 + $0x90] sm:$0x7] %vm820_vm3, %v2412_v1  ;;  %831 = vst.msk [vmem:[#allocation2 + $0xa0] sm:$0x7] %vm820_vm3, %v2412_v1 }
  0x27   : > { %v2142_v45 = vcombine.low %v397_v41, %v398_v42  ;;  %v392_v50 = vadd.bf16 %v372_v48, %v371_v47  ;;  %832 = vst.msk [vmem:[#allocation2 + $0xb0] sm:$0x7] %vm820_vm3, %v2412_v1  ;;  %833 = vst.msk [vmem:[#allocation2 + $0xc0] sm:$0x7] %vm820_vm3, %v2412_v1  ;;  %v2690_v3 = vld [vmem:[%s4738_s5 + $0x28] sm:$0xff]  ;;  %v2692_v4 = vsub.s32 0, %v559_v53 }
  0x28   : > { %834 = vst.msk [vmem:[#allocation2 + $0xd0] sm:$0x7] %vm820_vm3, %v2412_v1  ;;  %836 = vst.msk [vmem:[#allocation2 + $0x1b] sm:$0x7] %vm820_vm3, %v2412_v1  ;;  %v2694_v5 = vsub.s32 1, %v559_v53  ;;  %v2696_v6 = vsub.s32 2, %v559_v53 }
  0x29   : > { %v2139_v51 = vcombine.low %v391_v49, %v392_v50  ;;  %837 = vst.msk [vmem:[#allocation2 + $0x2b] sm:$0x7] %vm820_vm3, %v2412_v1  ;;  %838 = vst.msk [vmem:[#allocation2 + $0x3b] sm:$0x7] %vm820_vm3, %v2412_v1  ;;  %v2698_v7 = vsub.s32 7, %v559_v53  ;;  %v2714_v11 = vrot.slane %v2690_v3, %v2692_v4  ;;  %v2758_v23 = vld [vmem:[%s2743_s20] sm:$0xff]   ;;  %v2779_v40 = vrot.slane %v2641_v54, %v2692_v4 }
  0x2a   : > { %839 = vst.msk [vmem:[#allocation2 + $0x4b] sm:$0x7] %vm820_vm3, %v2412_v1  ;;  %840 = vst.msk [vmem:[#allocation2 + $0x5b] sm:$0x7] %vm820_vm3, %v2412_v1  ;;  %v2710_v10 = vrot.slane %v2685_v2, %v2694_v5  ;;  %v2730_v15 = vrot.slane %v2685_v2, %v2696_v6  ;;  %v2734_v16 = vrot.slane %v2690_v3, %v2694_v5  ;;  %v557_v17 = vld [vmem:[%s4736_s3] sm:$0x7]  ;;  %v2164_v31 = vunpack.c.l.bf16 %v2758_v23 }
  0x2b   : > { %2211 = vmatmul.mubr.msk.bf16.gmra.mxu0 %vm442_vm2, %v2137_v29  ;;  %841 = vst.msk [vmem:[#allocation2 + $0x6b] sm:$0x7] %vm820_vm3, %v2412_v1  ;;  %842 = vst.msk [vmem:[#allocation2 + $0x7b] sm:$0x7] %vm820_vm3, %v2412_v1  ;;  %v2718_v12 = vrot.slane %v2690_v3, %v2698_v7  ;;  %v2748_v18 = vld [vmem:[%s4735_s2] ss:$0 sm:$0xff]  ;;  %v2751_v19 = vrot.slane %v557_v17, %v2692_v4  ;;  %v2755_v22 = vrot.slane %v557_v17, %v2694_v5 }
  0x2c   : > { %2227 = vmatmul.mubr.msk.bf16.gmra.mxu1 %vm442_vm2, %v2141_v32  ;;  %2214 = vmatprep.mubr.msk.bf16.mxu0 %vm2413_vm1, %v2412_v1  ;;  %843 = vst.msk [vmem:[#allocation2 + $0x8b] sm:$0x7] %vm820_vm3, %v2412_v1  ;;  %844 = vst.msk [vmem:[#allocation2 + $0x9b] sm:$0x7] %vm820_vm3, %v2412_v1  ;;  %v2762_v27 = vld [vmem:[%s2743_s20 + $0x20] sm:$0xff]   ;;  %v2766_v30 = vrot.slane %v557_v17, %v2696_v6  ;;  %v2771_v34 = vld [vmem:[%s2743_s20 + $0x8] sm:$0xff]   ;;  %v2165_v37 = vunpack.c.h.bf16 %v2758_v23  ;;  %v2783_v41 = vrot.slane %v2641_v54, %v2694_v5 }
  0x2d   : > { %2230 = vmatprep.mubr.msk.bf16.mxu1 %vm2413_vm1, %v2412_v1  ;;  %845 = vst.msk [vmem:[#allocation2 + $0xab] sm:$0x7] %vm820_vm3, %v2412_v1  ;;  %846 = vst.msk [vmem:[#allocation2 + $0xbb] sm:$0x7] %vm820_vm3, %v2412_v1  ;;  %v2180_v38 = vunpack.c.l.bf16 %v2762_v27  ;;  %v2789_v46 = vrot.slane %v2641_v54, %v2696_v6  ;;  %v2795_v50 = vrot.slane %v2641_v54, %v2675_v0  ;;  %s2801_s21 = sand.u32 1, %s2394_s28   ;;  %s2414_s11 = smov [#allocation5]  }
  0x2e   : > { %847 = vst.msk [vmem:[#allocation2 + $0xcb] sm:$0x7] %vm820_vm3, %v2412_v1  ;;  %848 = vst.msk [vmem:[#allocation2 + $0xdb] sm:$0x7] %vm820_vm3, %v2412_v1  ;;  %s4836_s24 = sshll.u32 %s2801_s21, 6  ;;  %s2308_s12 = sshll.u32 %s2414_s11, 4  ;;  %s2309_s12 = int_to_ptr.vmem [resolvable:$false] %s2308_s12 }
  0x2f   : > { %4861 = vst [vmem:[#allocation9_spill] sm:$0xff] %v2649_v57  ;;  %4862 = vst [vmem:[#allocation10_spill] sm:$0xff] %v2653_v58  ;;  %s2836_s25 = scalar_lea.vmem [#allocation5], %s4836_s24  ;;  %s2310_s14 = scalar_lea.vmem %s2309_s12, 2048 }
  0x30   : > { %4863 = vst [vmem:[#allocation11_spill] sm:$0xff] %v2664_v61  ;;  %4864 = vst [vmem:[#allocation12_spill] sm:$0xff] %v2668_v62  ;;  %s2002_s23 = sshll.u32 %s2836_s25, 4  ;;  %s4020_s23 = int_to_ptr.vmem [resolvable:$true] %s2002_s23 }
  0x31   : > { %4865 = vst [vmem:[#allocation13_spill] sm:$0xff] %v2702_v8  ;;  %4867 = vst [vmem:[#allocation15_spill] sm:$0xff] %v2710_v10  ;;  %v2973_v10 = vrot.slane %v2685_v2, %v2643_v55  ;;  %v2981_v8 = vrot.slane %v2673_v63, %v2696_v6  ;;  %s2304_s26 = scalar_lea.vmem %s4020_s23, 1024  ;;  %p2311_p1 = scmp.lt.s32.totalorder %s4020_s23, %s2309_s12 }
  0x32   : > { %4868 = vst [vmem:[#allocation16_spill] sm:$0xff] %v2714_v11  ;;  %4869 = vst [vmem:[#allocation17_spill] sm:$0xff] %v2718_v12  ;;  %v2948_v12 = vrot.slane %v2673_v63, %v2694_v5  ;;  %p2305_p12 = scmp.ne.s32.totalorder %s4020_s23, %s2304_s26  ;;  %p2312_p2 = scmp.lt.s32.totalorder %s2310_s14, %s2304_s26 }
  0x33   : > { %2215 = vmatmul.mubr.msk.bf16.gmra.mxu0 %vm442_vm2, %v2138_v43  ;;  %4870 = vst [vmem:[#allocation18_spill] sm:$0xff] %v2722_v13  ;;  %4872 = vst [vmem:[#allocation20_spill] sm:$0xff] %v2730_v15 }
  0x34   : > { %2231 = vmatmul.mubr.msk.bf16.gmra.mxu1 %vm442_vm2, %v2142_v45  ;;  %2218 = vmatprep.mubr.msk.bf16.mxu0 %vm2413_vm1, %v2412_v1  ;;  %v2680_v1 = vld [vmem:[%s4738_s5 + $0x18] sm:$0xff]  ;;  %4873 = vst [vmem:[#allocation21_spill] sm:$0xff] %v2734_v16  ;;  %4874 = vst [vmem:[#allocation22_spill] sm:$0xff] %v2748_v18  ;;  %p2306_p13 = pnand %p2305_p12, %p2503_p4  ;;  %p2313_p3 = por %p2312_p2, %p2311_p1 }
  0x35   : > { %v2706_v9 = vrot.slane %v2680_v1, %v2696_v6  ;;  %v2726_v14 = vrot.slane %v2680_v1, %v2675_v0  ;;  %4875 = vst [vmem:[#allocation23_spill] sm:$0xff] %v2751_v19  ;;  %4876 = vst [vmem:[#allocation24_spill] sm:$0xff] %v2755_v22 }
  0x36   : > { %4877 = vst [vmem:[#allocation25_spill] sm:$0xff] %v2779_v40  ;;  %4878 = vst [vmem:[#allocation26_spill] sm:$0xff] %v2783_v41  ;;  %p2307_p0 = pneg %p2306_p13 }
  0x37   : > { %4866 = vst [vmem:[#allocation14_spill] sm:$0xff] %v2706_v9  ;;  %4871 = vst [vmem:[#allocation19_spill] sm:$0xff] %v2726_v14  ;;  %v2977_v9 = vrot.slane %v2690_v3, %v2645_v56 }
  0x38   : > { %4899 = vst [vmem:[#allocation46_spill] sm:$0xff] %v2948_v12  ;;  %4903 = vst [vmem:[#allocation50_spill] sm:$0xff] %v2973_v10  ;;  %v2993_v10 = vrot.slane %v2685_v2, %v2692_v4  ;;  %p2314_p5 = pnand %p2313_p3, %p2307_p0 }
  0x39   : > { %4904 = vst [vmem:[#allocation51_spill] sm:$0xff] %v2977_v9  ;;  %4905 = vst [vmem:[#allocation52_spill] sm:$0xff] %v2981_v8  ;;  %v3004_v9 = vrot.slane %v2690_v3, %v2643_v55 }
  0x3a   : > { %4908 = vst [vmem:[#allocation55_spill] sm:$0xff] %v2993_v10 }
  0x3b   : > { %2219 = vmatmul.mubr.msk.bf16.gmra.mxu0 %vm442_vm2, %v2139_v51  ;;  %4910 = vst [vmem:[#allocation57_spill] sm:$0xff] %v3004_v9 }
  0xe3   : > { %v502_v20 = vpop.f32.mrf.mxu0 }
  0xe4   : > { %v503_v21 = vadd.f32 %v2748_v18, %v502_v20  ;;  %v534_v24 = vpop.f32.mrf.mxu1 }
  0xe5   : > { %v2208_v25 = vpop.f32.mrf.mxu0  ;;  %v535_v26 = vadd.f32 %v2748_v18, %v534_v24 }
  0xe6   : > { %v562_v28 = vmul.f32 %v2751_v19, %v503_v21  ;;  %v2224_v29 = vpop.f32.mrf.mxu1  ;;  %v657_v23 = vmax.f32 %v503_v21, 0.0 }
  0xe7   : > { %v505_v32 = vpop.f32.mrf.mxu0  ;;  %v570_v33 = vmul.f32 %v2751_v19, %v535_v26  ;;  %v665_v52 = vmax.f32 %v535_v26, 0.0  ;;  %v2806_v29 = vrot.slane %v2641_v54, %v2660_v60 }
  0xe8   : > { %v580_v35 = vadd.f32 %v2755_v22, %v562_v28  ;;  %v506_v36 = vadd.f32 %v2748_v18, %v505_v32  ;;  %v537_v39 = vpop.f32.mrf.mxu1 }
  0xe9   : > { %v2209_v42 = vpop.f32.mrf.mxu0  ;;  %v588_v43 = vadd.f32 %v2755_v22, %v570_v33  ;;  %v538_v44 = vadd.f32 %v2748_v18, %v537_v39  ;;  %4879 = vst [vmem:[#allocation27_spill] sm:$0xff] %v2806_v29 }
  0xea   : > { %v594_v45 = vmul.f32 %v580_v35, %v503_v21  ;;  %v563_v47 = vmul.f32 %v2751_v19, %v506_v36  ;;  %v2225_v49 = vpop.f32.mrf.mxu1  ;;  %v658_v42 = vmax.f32 %v506_v36, 0.0 }
  0xeb   : > { %v602_v51 = vmul.f32 %v588_v43, %v535_v26  ;;  %v510_v53 = vpop.f32.mrf.mxu0  ;;  %v571_v17 = vmul.f32 %v2751_v19, %v538_v44 }
  0xec   : > { %v612_v20 = vadd.f32 %v2766_v30, %v594_v45  ;;  %v581_v24 = vadd.f32 %v2755_v22, %v563_v47  ;;  %v511_v25 = vadd.f32 %v2748_v18, %v510_v53  ;;  %v542_v28 = vpop.f32.mrf.mxu1  ;;  %v666_v53 = vmax.f32 %v538_v44, 0.0 }
  0xed   : > { %v620_v26 = vadd.f32 %v2766_v30, %v602_v51  ;;  %v2212_v32 = vpop.f32.mrf.mxu0  ;;  %v589_v33 = vadd.f32 %v2755_v22, %v571_v17  ;;  %v543_v35 = vadd.f32 %v2748_v18, %v542_v28 }
  0xee   : > { %v671_v21 = vsub.f32 %v657_v23, %v612_v20  ;;  %v595_v39 = vmul.f32 %v581_v24, %v506_v36  ;;  %v564_v43 = vmul.f32 %v2751_v19, %v511_v25  ;;  %v2228_v45 = vpop.f32.mrf.mxu1 }
  0xef   : > { %v679_v47 = vsub.f32 %v665_v52, %v620_v26  ;;  %v603_v49 = vmul.f32 %v589_v33, %v538_v44  ;;  %v513_v48 = vpop.f32.mrf.mxu0  ;;  %v572_v16 = vmul.f32 %v2751_v19, %v543_v35  ;;  %v2181_v52 = vunpack.c.h.bf16 %v2762_v27 }
  0xf0   : > { %v685_v51 = vmul.f32 %v2164_v31, %v671_v21  ;;  %v613_v32 = vadd.f32 %v2766_v30, %v595_v39  ;;  %v582_v17 = vadd.f32 %v2755_v22, %v564_v43  ;;  %v2817_v23 = vadd.f32 %v2748_v18, %v513_v48  ;;  %v545_v36 = vpop.f32.mrf.mxu1  ;;  %v2823_v21 = vld [vmem:[%s2743_s20 + $0x28] sm:$0xff]  }
  0xf1   : > { %v693_v24 = vmul.f32 %v2180_v38, %v679_v47  ;;  %v621_v28 = vadd.f32 %v2766_v30, %v603_v49  ;;  %v2213_v33 = vpop.f32.mrf.mxu0  ;;  %v590_v44 = vadd.f32 %v2755_v22, %v572_v16  ;;  %4880 = vst [vmem:[#allocation28_spill] sm:$0xff] %v2823_v21  ;;  %v667_v39 = vmax.f32 %v543_v35, 0.0 }
  0xf2   : > { %v699_v45 = vadd.f32 %v685_v51, %v612_v20  ;;  %v672_v15 = vsub.f32 %v658_v42, %v613_v32  ;;  %v596_v31 = vmul.f32 %v582_v17, %v511_v25  ;;  %v2229_v43 = vpop.f32.mrf.mxu1  ;;  %v565_v38 = vmul.f32 %v2751_v19, %v2817_v23 }
  0xf3   : > { %v707_v14 = vadd.f32 %v693_v24, %v620_v26  ;;  %v680_v48 = vsub.f32 %v666_v53, %v621_v28  ;;  %v604_v47 = vmul.f32 %v590_v44, %v543_v35  ;;  %v518_v49 = vpop.f32.mrf.mxu0  ;;  %v659_v16 = vmax.f32 %v511_v25, 0.0 }
  0xf4   : > { %v798_v13 = vmul.f32 0.0, %v699_v45  ;;  %v686_v27 = vmul.f32 %v2165_v37, %v672_v15  ;;  %v614_v33 = vadd.f32 %v2766_v30, %v596_v31  ;;  %v2828_v20 = vpop.f32.mrf.mxu1  ;;  %v2832_v42 = vrot.slane %v2641_v54, %v2698_v7 }
  0xf5   : > { %817 = vst.msk [vmem:[%s2836_s25 + $0x28] sm:$0xff] %vm442_vm2, %v707_v14  ;;  %857 = vst.msk [vmem:[#allocation2 + $0x83] sm:$0xff] %vm442_vm2, %v707_v14  ;;  %v694_v26 = vmul.f32 %v2181_v52, %v680_v48  ;;  %v622_v15 = vadd.f32 %v2766_v30, %v604_v47  ;;  %v2184_v37 = vunpack.c.l.bf16 %v2823_v21  ;;  %v2216_v25 = vpop.f32.mrf.mxu0  ;;  %v2846_v54 = vrot.slane %v2658_v59, %v2692_v4 }
  0xf6   : > { %4881 = vst [vmem:[#allocation29_spill] sm:$0xff] %v2832_v42  ;;  %849 = vst.msk [vmem:[#allocation2 + $0x3] sm:$0xff] %vm442_vm2, %v798_v13  ;;  %v700_v35 = vadd.f32 %v686_v27, %v613_v32  ;;  %v2850_v53 = vrot.slane %v2658_v59, %v2694_v5  ;;  %v673_v51 = vsub.f32 %v659_v16, %v614_v33  ;;  %v2232_v14 = vpop.f32.mrf.mxu1  ;;  %v4884_v31 = vunpack.c.l.bf16 %v2771_v34 }
  0xf7   : > { %v2854_v17 = vrot.slane %v2658_v59, %v2696_v6  ;;  %v708_v24 = vadd.f32 %v694_v26, %v621_v28  ;;  %v583_v52 = vadd.f32 %v2755_v22, %v565_v38  ;;  %v681_v13 = vsub.f32 %v667_v39, %v622_v15  ;;  %v2857_v32 = vpop.f32.mrf.mxu0 }
  0xf8   : > { %v799_v44 = vmul.f32 0.0, %v700_v35  ;;  %v2861_v45 = vrot.slane %v2658_v59, %v2675_v0  ;;  %v687_v43 = vmul.f32 %v4884_v31, %v673_v51  ;;  %v2866_v48 = vadd.f32 %v2748_v18, %v545_v36  ;;  %v2868_v47 = vpop.f32.mrf.mxu1 }
  0xf9   : > { %4882 = vst [vmem:[#allocation30_spill] sm:$0xff] %v2854_v17  ;;  %v2872_v28 = vrot.slane %v2658_v59, %v2643_v55  ;;  %v2876_v39 = vrot.slane %v2673_v63, %v2645_v56  ;;  %v2880_v38 = vrot.slane %v2658_v59, %v2698_v7  ;;  %818 = vst.msk [vmem:[%s2836_s25 + $0x30] sm:$0xff] %vm442_vm2, %v708_v24  ;;  %v2217_v27 = vpop.f32.mrf.mxu0 }
  0xfa   : > { %4883 = vst [vmem:[#allocation31_spill] sm:$0xff] %v2861_v45  ;;  %4885 = vst [vmem:[#allocation32_spill] sm:$0xff] %v2866_v48  ;;  %v695_v36 = vmul.f32 %v2184_v37, %v681_v13  ;;  %v2888_v16 = vrot.slane %v2680_v1, %v2660_v60  ;;  %v2892_v26 = vrot.slane %v2685_v2, %v2675_v0  ;;  %v2233_v35 = vpop.f32.mrf.mxu1 }
  0xfb   : > { %4886 = vst [vmem:[#allocation33_spill] sm:$0xff] %v2872_v28  ;;  %4887 = vst [vmem:[#allocation34_spill] sm:$0xff] %v2876_v39  ;;  %v2896_v59 = vrot.slane %v2673_v63, %v2643_v55  ;;  %v701_v25 = vadd.f32 %v687_v43, %v614_v33  ;;  %v2900_v37 = vrot.slane %v2690_v3, %v2696_v6  ;;  %v2906_v13 = vpop.f32.mrf.mxu0 }
  0xfc   : > { %858 = vst.msk [vmem:[#allocation2 + $0x93] sm:$0xff] %vm442_vm2, %v708_v24  ;;  %850 = vst.msk [vmem:[#allocation2 + $0x13] sm:$0xff] %vm442_vm2, %v799_v44  ;;  %v597_v51 = vmul.f32 %v583_v52, %v2817_v23  ;;  %v709_v14 = vadd.f32 %v695_v36, %v622_v15  ;;  %v2904_v24 = vadd.f32 %v2748_v18, %v518_v49  ;;  %v885_v9 = vld [vmem:[#allocation2 + $0x80] sm:$0xff] }
  0xfd   : > { %4888 = vst [vmem:[#allocation35_spill] sm:$0xff] %v2888_v16  ;;  %4889 = vst [vmem:[#allocation36_spill] sm:$0xff] %v2892_v26  ;;  %v2910_v44 = vrot.slane %v2680_v1, %v2645_v56  ;;  %v2914_v33 = vrot.slane %v2685_v2, %v2660_v60  ;;  %v800_v31 = vmul.f32 0.0, %v701_v25  ;;  %v573_v43 = vmul.f32 %v2751_v19, %v2866_v48  ;;  %v877_v27 = vld [vmem:[#allocation2] sm:$0xff]  ;;  %v2220_v25 = vpop.f32.mrf.mxu0 }
  0xfe   : > { %4890 = vst [vmem:[#allocation37_spill] sm:$0xff] %v2900_v37  ;;  %4891 = vst [vmem:[#allocation38_spill] sm:$0xff] %v2904_v24  ;;  %v2920_v15 = vrot.slane %v2690_v3, %v2675_v0  ;;  %v2924_v49 = vrot.slane %v2673_v63, %v2692_v4  ;;  %v2928_v52 = vrot.slane %v2673_v63, %v2698_v7  ;;  %v660_v63 = vmax.f32 %v2817_v23, 0.0  ;;  %v1339_v21 = vld [vmem:[#allocation2 + $0x3] sm:$0xff] }
  0xff   : > { %4892 = vst [vmem:[#allocation39_spill] sm:$0xff] %v2906_v13  ;;  %4893 = vst [vmem:[#allocation40_spill] sm:$0xff] %v2910_v44  ;;  %v2932_v36 = vrot.slane %v2680_v1, %v2643_v55  ;;  %v895_v0 = vmul.f32 %v2779_v40, %v877_v27  ;;  %v2940_v35 = vrot.slane %v2685_v2, %v2645_v56 }
 0x100   : > { %4894 = vst [vmem:[#allocation41_spill] sm:$0xff] %v2914_v33  ;;  %4895 = vst [vmem:[#allocation42_spill] sm:$0xff] %v2920_v15  ;;  %v2944_v13 = vrot.slane %v2690_v3, %v2660_v60  ;;  %v2958_v27 = vrot.slane %v2680_v1, %v2692_v4  ;;  %v2962_v25 = vrot.slane %v2680_v1, %v2698_v7  ;;  %v3011_v4 = vld [vmem:[%s2743_s20 + $0x18] sm:$0xff]   ;;  %v1185_v3 = vld [vmem:[#allocation2 + $0x2] sm:$0xff] }
 0x101   : > { %4896 = vst [vmem:[#allocation43_spill] sm:$0xff] %v2932_v36  ;;  %819 = vst.msk [vmem:[%s2836_s25 + $0x38] sm:$0xff] %vm442_vm2, %v709_v14  ;;  %v2965_v60 = vadd.f32 %v2766_v30, %v597_v51  ;;  %v566_v11 = vmul.f32 %v2751_v19, %v2904_v24  ;;  %v2984_v51 = vld [vmem:[%s2743_s20 + $0x10] sm:$0xff]   ;;  %v2997_v56 = vrot.slane %v2685_v2, %v2698_v7 }
 0x102   : > { %859 = vst.msk [vmem:[#allocation2 + $0xa3] sm:$0xff] %vm442_vm2, %v709_v14  ;;  %4897 = vst [vmem:[#allocation44_spill] sm:$0xff] %v2940_v35  ;;  %v2954_v14 = vld [vmem:[%s4739_s6] ss:$0 sm:$0xff] }
 0x103   : > { %4898 = vst [vmem:[#allocation45_spill] sm:$0xff] %v2944_v13  ;;  %851 = vst.msk [vmem:[#allocation2 + $0x23] sm:$0xff] %vm442_vm2, %v800_v31  ;;  %v2969_v31 = vpop.f32.mrf.mxu0  ;;  %v903_v8 = vadd.f32 %v2954_v14, %v895_v0  ;;  %v674_v2 = vsub.f32 %v660_v63, %v2965_v60  ;;  %v584_v7 = vadd.f32 %v2755_v22, %v566_v11  ;;  %v1493_v63 = vld [vmem:[#allocation2 + $0x4] sm:$0xff] }
 0x104   : > { %4900 = vst [vmem:[#allocation47_spill] sm:$0xff] %v2958_v27  ;;  %4901 = vst [vmem:[#allocation48_spill] sm:$0xff] %v2962_v25  ;;  %v591_v25 = vadd.f32 %v2755_v22, %v573_v43  ;;  %v878_v27 = vld [vmem:[#allocation2 + $0x10] sm:$0xff]  ;;  %v3018_v0 = vadd.f32 %v2748_v18, %v2857_v32  ;;  %v1031_v22 = vld [vmem:[#allocation2 + $0x1] sm:$0xff] }
 0x105   : > { %4902 = vst [vmem:[#allocation49_spill] sm:$0xff] %v2969_v31  ;;  %4906 = vst [vmem:[#allocation53_spill] sm:$0xff] %v2984_v51  ;;  %v2989_v31 = vrot.slane %v2680_v1, %v2694_v5  ;;  %v2221_v6 = vpop.f32.mrf.mxu0  ;;  %v915_v43 = vmul.f32 %v2832_v42, %v878_v27  ;;  %v2169_v1 = vunpack.c.h.bf16 %v2771_v34  ;;  %v3008_v5 = vld [vmem:[%s2743_s20 + $0x30] sm:$0xff]   ;;  %v3026_v34 = vadd.f32 %v2748_v18, %v2828_v20 }
 0x106   : > { %4909 = vst [vmem:[#allocation56_spill] sm:$0xff] %v2997_v56  ;;  %4911 = vst [vmem:[#allocation58_spill] sm:$0xff] %v3008_v5  ;;  %v605_v55 = vmul.f32 %v591_v25, %v2866_v48  ;;  %v3042_v23 = vmul.f32 %v584_v7, %v2904_v24  ;;  %v3046_v32 = vmul.f32 %v2751_v19, %v3018_v0  ;;  %v1647_v25 = vld [vmem:[#allocation2 + $0x5] sm:$0xff] }
 0x107   : > { %4907 = vst [vmem:[#allocation54_spill] sm:$0xff] %v2989_v31  ;;  %4912 = vst [vmem:[#allocation59_spill] sm:$0xff] %v3011_v4  ;;  %v3020_v6 = vadd.f32 %v915_v43, %v903_v8  ;;  %v3036_v43 = vadd.f32 %v2748_v18, %v2868_v47  ;;  %v3039_v51 = vmul.f32 %v2169_v1, %v674_v2  ;;  %v1801_v8 = vld [vmem:[#allocation2 + $0x6] sm:$0xff] }
 0x108   : > { %4913 = vst [vmem:[#allocation60_spill] sm:$0xff] %v3018_v0  ;;  %4914 = vst [vmem:[#allocation61_spill] sm:$0xff] %v3026_v34  ;;  %v3050_v47 = vmul.f32 %v2832_v42, %v885_v9  ;;  %v3053_v20 = vmul.f32 %v2872_v28, %v885_v9  ;;  %v1039_v4 = vld [vmem:[#allocation2 + $0x81] sm:$0xff]  ;;  %v3056_v1 = vadd.f32 %v2766_v30, %v605_v55 }
 0x109   : > { %4915 = vst [vmem:[#allocation62_spill] sm:$0xff] %v3036_v43  ;;  %4916 = vst [vmem:[#allocation63_spill] sm:$0xff] %v3046_v32  ;;  %v3060_v2 = vmul.f32 %v2751_v19, %v3026_v34  ;;  %v3063_v7 = vmul.f32 %v2783_v41, %v1031_v22  ;;  %v896_v11 = vmul.f32 %v2779_v40, %v878_v27  ;;  %v1186_v34 = vld [vmem:[#allocation2 + $0x12] sm:$0xff]  ;;  %v4977_v43 = vld [vmem:[#allocation13_spill] sm:$0xff] }
 0x10a   : > { %4917 = vst [vmem:[#allocation64_spill] sm:$0xff] %v3050_v47  ;;  %4918 = vst [vmem:[#allocation65_spill] sm:$0xff] %v3053_v20  ;;  %v3067_v5 = vmul.f32 %v2876_v39, %v885_v9  ;;  %v3070_v47 = vmul.f32 %v2888_v16, %v885_v9  ;;  %v3073_v20 = vmul.f32 %v2789_v46, %v1185_v3  ;;  %v4979_v18 = vld [vmem:[#allocation14_spill] sm:$0xff] }
 0x10b   : > { %4919 = vst [vmem:[#allocation66_spill] sm:$0xff] %v3056_v1  ;;  %4920 = vst [vmem:[#allocation67_spill] sm:$0xff] %v3060_v2  ;;  %v3076_v55 = vmul.f32 %v2795_v50, %v1339_v21  ;;  %v3079_v0 = vmul.f32 %v2806_v29, %v1493_v63  ;;  %v3082_v22 = vmul.f32 %v2892_v26, %v885_v9  ;;  %v1340_v63 = vld [vmem:[#allocation2 + $0x13] sm:$0xff]  ;;  %v1187_v32 = vld [vmem:[#allocation2 + $0x22] sm:$0xff] }
 0x10c   : > { %4921 = vst [vmem:[#allocation68_spill] sm:$0xff] %v3063_v7  ;;  %4922 = vst [vmem:[#allocation69_spill] sm:$0xff] %v3067_v5  ;;  %v879_v7 = vld [vmem:[#allocation2 + $0x20] sm:$0xff]  ;;  %v3085_v27 = vmul.f32 %v2649_v57, %v1647_v25  ;;  %v3088_v5 = vmul.f32 %v2653_v58, %v1801_v8  ;;  %v3091_v3 = vmul.f32 %v2900_v37, %v885_v9  ;;  %v1494_v9 = vld [vmem:[#allocation2 + $0x14] sm:$0xff] }
 0x10d   : > { %4923 = vst [vmem:[#allocation70_spill] sm:$0xff] %v3070_v47  ;;  %4924 = vst [vmem:[#allocation71_spill] sm:$0xff] %v3073_v20  ;;  %v1032_v47 = vld [vmem:[#allocation2 + $0x11] sm:$0xff]  ;;  %v3094_v21 = vmul.f32 %v2846_v54, %v1039_v4  ;;  %v3103_v25 = vmul.f32 %v2910_v44, %v1039_v4  ;;  %v3106_v8 = vmul.f32 %v2914_v33, %v1039_v4  ;;  %v1193_v20 = vld [vmem:[#allocation2 + $0x82] sm:$0xff] }
 0x10e   : > { %4925 = vst [vmem:[#allocation72_spill] sm:$0xff] %v3076_v55  ;;  %4926 = vst [vmem:[#allocation73_spill] sm:$0xff] %v3079_v0  ;;  %v3097_v0 = vmul.f32 %v2880_v38, %v1039_v4  ;;  %v3100_v55 = vmul.f32 %v2896_v59, %v1039_v4  ;;  %v4988_v24 = vld [vmem:[#allocation18_spill] sm:$0xff] }
 0x10f   : > { %4927 = vst [vmem:[#allocation74_spill] sm:$0xff] %v3082_v22  ;;  %4928 = vst [vmem:[#allocation75_spill] sm:$0xff] %v3085_v27  ;;  %v1648_v27 = vld [vmem:[#allocation2 + $0x15] sm:$0xff]  ;;  %v3115_v22 = vmul.f32 %v2783_v41, %v1032_v47 }
 0x110   : > { %4929 = vst [vmem:[#allocation76_spill] sm:$0xff] %v3088_v5  ;;  %4930 = vst [vmem:[#allocation77_spill] sm:$0xff] %v3091_v3  ;;  %v904_v5 = vadd.f32 %v2954_v14, %v896_v11  ;;  %v3110_v3 = vmul.f32 %v2920_v15, %v1039_v4  ;;  %v3124_v11 = vmul.f32 %v2850_v53, %v1186_v34 }
 0x111   : > { %4931 = vst [vmem:[#allocation78_spill] sm:$0xff] %v3094_v21  ;;  %4932 = vst [vmem:[#allocation79_spill] sm:$0xff] %v3097_v0  ;;  %v916_v21 = vmul.f32 %v2832_v42, %v879_v7  ;;  %v935_v0 = vmul.f32 %v2872_v28, %v879_v7  ;;  %v3127_v4 = vmul.f32 %v2795_v50, %v1340_v63 }
 0x112   : > { %4933 = vst [vmem:[#allocation80_spill] sm:$0xff] %v3100_v55  ;;  %4934 = vst [vmem:[#allocation81_spill] sm:$0xff] %v3103_v25  ;;  %v3118_v55 = vmul.f32 %v2846_v54, %v1032_v47  ;;  %v3121_v25 = vmul.f32 %v2789_v46, %v1186_v34  ;;  %v3138_v47 = vmul.f32 %v2806_v29, %v1494_v9 }
 0x113   : > { %4935 = vst [vmem:[#allocation82_spill] sm:$0xff] %v3106_v8  ;;  %4936 = vst [vmem:[#allocation83_spill] sm:$0xff] %v3110_v3  ;;  %v1802_v8 = vld [vmem:[#allocation2 + $0x16] sm:$0xff]  ;;  %v3130_v3 = vmul.f32 %v2854_v17, %v1340_v63  ;;  %v3132_v19 = vadd.f32 %v916_v21, %v904_v5  ;;  %v3144_v34 = vmul.f32 %v2649_v57, %v1648_v27  ;;  %v1501_v21 = vld [vmem:[#allocation2 + $0x84] sm:$0xff] }
 0x114   : > { %4937 = vst [vmem:[#allocation84_spill] sm:$0xff] %v3115_v22  ;;  %4938 = vst [vmem:[#allocation85_spill] sm:$0xff] %v3118_v55  ;;  %v3135_v22 = vadd.f32 %v935_v0, %v3020_v6  ;;  %v3150_v63 = vmul.f32 %v2653_v58, %v1802_v8  ;;  %v3153_v5 = vmul.f32 %v2668_v62, %v1802_v8 }
 0x115   : > { %4939 = vst [vmem:[#allocation86_spill] sm:$0xff] %v3121_v25  ;;  %4940 = vst [vmem:[#allocation87_spill] sm:$0xff] %v3124_v11  ;;  %v3141_v25 = vmul.f32 %v2861_v45, %v1494_v9  ;;  %v3147_v11 = vmul.f32 %v2664_v61, %v1648_v27  ;;  %v3156_v0 = vmul.f32 %v2850_v53, %v1193_v20 }
 0x116   : > { %4941 = vst [vmem:[#allocation88_spill] sm:$0xff] %v3127_v4  ;;  %4942 = vst [vmem:[#allocation89_spill] sm:$0xff] %v3130_v3  ;;  %v1347_v4 = vld [vmem:[#allocation2 + $0x83] sm:$0xff]  ;;  %v3159_v6 = vmul.f32 %v2924_v49, %v1193_v20  ;;  %v3162_v9 = vmul.f32 %v2928_v52, %v1193_v20  ;;  %v3165_v27 = vmul.f32 %v2932_v36, %v1193_v20 }
 0x117   : > { %4943 = vst [vmem:[#allocation90_spill] sm:$0xff] %v3132_v19  ;;  %4944 = vst [vmem:[#allocation91_spill] sm:$0xff] %v3135_v22  ;;  %v3174_v8 = vmul.f32 %v2854_v17, %v1347_v4  ;;  %v3206_v55 = vmul.f32 %v2997_v56, %v1501_v21  ;;  %v3259_v19 = vmul.f32 %v2850_v53, %v1187_v32 }
 0x118   : > { %4945 = vst [vmem:[#allocation92_spill] sm:$0xff] %v3138_v47  ;;  %4946 = vst [vmem:[#allocation93_spill] sm:$0xff] %v3141_v25  ;;  %v4959_v47 = vld [vmem:[#allocation47_spill] sm:$0xff]  ;;  %v4961_v25 = vld [vmem:[#allocation48_spill] sm:$0xff] }
 0x119   : > { %4947 = vst [vmem:[#allocation94_spill] sm:$0xff] %v3144_v34  ;;  %4948 = vst [vmem:[#allocation95_spill] sm:$0xff] %v3147_v11  ;;  %v3168_v34 = vmul.f32 %v2940_v35, %v1193_v20  ;;  %v3180_v11 = vmul.f32 %v4959_v47, %v1347_v4 }
 0x11a   : > { %4949 = vst [vmem:[#allocation96_spill] sm:$0xff] %v3150_v63  ;;  %4950 = vst [vmem:[#allocation97_spill] sm:$0xff] %v3153_v5  ;;  %v3171_v63 = vmul.f32 %v2944_v13, %v1193_v20  ;;  %v3177_v5 = vmul.f32 %v2948_v12, %v1347_v4  ;;  %v3192_v20 = vmul.f32 %v2861_v45, %v1501_v21 }
 0x11b   : > { %4951 = vst [vmem:[#allocation98_spill] sm:$0xff] %v3156_v0  ;;  %4952 = vst [vmem:[#allocation99_spill] sm:$0xff] %v3159_v6  ;;  %v1655_v6 = vld [vmem:[#allocation2 + $0x85] sm:$0xff] }
 0x11c   : > { %4953 = vst [vmem:[#allocation100_spill] sm:$0xff] %v3162_v9  ;;  %4954 = vst [vmem:[#allocation101_spill] sm:$0xff] %v3165_v27  ;;  %v3183_v9 = vmul.f32 %v4961_v25, %v1347_v4  ;;  %v4963_v27 = vld [vmem:[#allocation50_spill] sm:$0xff]  ;;  %v3218_v2 = vmul.f32 %v4979_v18, %v1655_v6 }
 0x11d   : > { %4955 = vst [vmem:[#allocation102_spill] sm:$0xff] %v3168_v34  ;;  %4956 = vst [vmem:[#allocation103_spill] sm:$0xff] %v3171_v63  ;;  %v3186_v0 = vmul.f32 %v4963_v27, %v1347_v4  ;;  %v4965_v34 = vld [vmem:[#allocation51_spill] sm:$0xff] }
 0x11e   : > { %4957 = vst [vmem:[#allocation104_spill] sm:$0xff] %v3174_v8  ;;  %4958 = vst [vmem:[#allocation105_spill] sm:$0xff] %v3177_v5  ;;  %v3189_v3 = vmul.f32 %v4965_v34, %v1347_v4  ;;  %v4968_v8 = vld [vmem:[#allocation52_spill] sm:$0xff]  ;;  %v3197_v5 = vld [vmem:[#allocation2 + $0x86] sm:$0xff] }
 0x11f   : > { %4960 = vst [vmem:[#allocation47_spill] sm:$0xff] %v3180_v11  ;;  %4962 = vst [vmem:[#allocation48_spill] sm:$0xff] %v3183_v9  ;;  %v3195_v63 = vmul.f32 %v4968_v8, %v1501_v21  ;;  %v3200_v11 = vmul.f32 %v2989_v31, %v1501_v21  ;;  %v3203_v9 = vmul.f32 %v2993_v10, %v1501_v21 }
 0x120   : > { %4964 = vst [vmem:[#allocation50_spill] sm:$0xff] %v3186_v0  ;;  %4966 = vst [vmem:[#allocation51_spill] sm:$0xff] %v3189_v3  ;;  %v4974_v0 = vld [vmem:[#allocation57_spill] sm:$0xff] }
 0x121   : > { %4967 = vst [vmem:[#allocation106_spill] sm:$0xff] %v3192_v20  ;;  %4969 = vst [vmem:[#allocation107_spill] sm:$0xff] %v3195_v63  ;;  %v3209_v4 = vmul.f32 %v4974_v0, %v1501_v21  ;;  %v1033_v3 = vld [vmem:[#allocation2 + $0x21] sm:$0xff]  ;;  %v3212_v20 = vmul.f32 %v2664_v61, %v1655_v6  ;;  %v3215_v63 = vmul.f32 %v4977_v43, %v1655_v6 }
 0x122   : > { %4970 = vst [vmem:[#allocation108_spill] sm:$0xff] %v3197_v5  ;;  %4971 = vst [vmem:[#allocation109_spill] sm:$0xff] %v3200_v11  ;;  %v897_v11 = vmul.f32 %v2779_v40, %v879_v7  ;;  %v4985_v21 = vld [vmem:[#allocation17_spill] sm:$0xff]  ;;  %v4990_v7 = vld [vmem:[#allocation19_spill] sm:$0xff] }
 0x123   : > { %4972 = vst [vmem:[#allocation110_spill] sm:$0xff] %v3203_v9  ;;  %4973 = vst [vmem:[#allocation111_spill] sm:$0xff] %v3206_v55  ;;  %v4981_v9 = vld [vmem:[#allocation15_spill] sm:$0xff]  ;;  %v4983_v55 = vld [vmem:[#allocation16_spill] sm:$0xff]  ;;  %v3240_v40 = vmul.f32 %v4990_v7, %v3197_v5 }
 0x124   : > { %4975 = vst [vmem:[#allocation57_spill] sm:$0xff] %v3209_v4  ;;  %4976 = vst [vmem:[#allocation112_spill] sm:$0xff] %v3212_v20  ;;  %v3222_v48 = vmul.f32 %v4981_v9, %v1655_v6  ;;  %v3225_v1 = vmul.f32 %v4983_v55, %v1655_v6  ;;  %v3228_v4 = vmul.f32 %v4985_v21, %v1655_v6 }
 0x125   : > { %4978 = vst [vmem:[#allocation113_spill] sm:$0xff] %v3215_v63  ;;  %4980 = vst [vmem:[#allocation114_spill] sm:$0xff] %v3218_v2  ;;  %v3232_v20 = vmul.f32 %v2668_v62, %v3197_v5  ;;  %v1341_v63 = vld [vmem:[#allocation2 + $0x23] sm:$0xff]  ;;  %v3236_v2 = vmul.f32 %v4988_v24, %v3197_v5  ;;  %v3247_v6 = vmul.f32 %v2783_v41, %v1033_v3 }
 0x126   : > { %4982 = vst [vmem:[#allocation115_spill] sm:$0xff] %v3222_v48  ;;  %4984 = vst [vmem:[#allocation116_spill] sm:$0xff] %v3225_v1  ;;  %v4992_v48 = vld [vmem:[#allocation20_spill] sm:$0xff]  ;;  %v3250_v1 = vmul.f32 %v2846_v54, %v1033_v3 }
 0x127   : > { %4986 = vst [vmem:[#allocation117_spill] sm:$0xff] %v3228_v4  ;;  %4987 = vst [vmem:[#allocation118_spill] sm:$0xff] %v3232_v20  ;;  %v3244_v22 = vmul.f32 %v4992_v48, %v3197_v5  ;;  %v1495_v4 = vld [vmem:[#allocation2 + $0x24] sm:$0xff]  ;;  %v3253_v20 = vmul.f32 %v2880_v38, %v1033_v3  ;;  %v3262_v5 = vadd.f32 %v2954_v14, %v897_v11 }
 0x128   : > { %4989 = vst [vmem:[#allocation119_spill] sm:$0xff] %v3236_v2  ;;  %4991 = vst [vmem:[#allocation120_spill] sm:$0xff] %v3240_v40  ;;  %v3256_v2 = vmul.f32 %v2789_v46, %v1187_v32  ;;  %v1649_v40 = vld [vmem:[#allocation2 + $0x25] sm:$0xff]  ;;  %v3280_v11 = vmul.f32 %v2861_v45, %v1495_v4  ;;  %v5061_v45 = vld [vmem:[#allocation67_spill] sm:$0xff] }
 0x129   : > { %4993 = vst [vmem:[#allocation121_spill] sm:$0xff] %v3244_v22  ;;  %4994 = vst [vmem:[#allocation122_spill] sm:$0xff] %v3247_v6  ;;  %v3265_v22 = vmul.f32 %v2924_v49, %v1187_v32  ;;  %v3268_v6 = vmul.f32 %v2795_v50, %v1341_v63  ;;  %v1803_v3 = vld [vmem:[#allocation2 + $0x26] sm:$0xff]  ;;  %v702_v32 = vadd.f32 %v3039_v51, %v2965_v60 }
 0x12a   : > { %4995 = vst [vmem:[#allocation123_spill] sm:$0xff] %v3250_v1  ;;  %4996 = vst [vmem:[#allocation124_spill] sm:$0xff] %v3253_v20  ;;  %v3271_v1 = vmul.f32 %v2854_v17, %v1341_v63  ;;  %v886_v20 = vld [vmem:[#allocation2 + $0x90] sm:$0xff]  ;;  %v3303_v60 = vmul.f32 %v4988_v24, %v1803_v3 }
 0x12b   : > { %4997 = vst [vmem:[#allocation125_spill] sm:$0xff] %v3256_v2  ;;  %4998 = vst [vmem:[#allocation126_spill] sm:$0xff] %v3259_v19  ;;  %v3274_v2 = vmul.f32 %v2948_v12, %v1341_v63  ;;  %v3277_v19 = vmul.f32 %v2806_v29, %v1495_v4  ;;  %v3294_v63 = vmul.f32 %v4977_v43, %v1649_v40  ;;  %v1503_v29 = vld [vmem:[#allocation2 + $0xa4] sm:$0xff] }
 0x12c   : > { %4999 = vst [vmem:[#allocation127_spill] sm:$0xff] %v3265_v22  ;;  %5000 = vst [vmem:[#allocation128_spill] sm:$0xff] %v3268_v6  ;;  %v3285_v6 = vmul.f32 %v4968_v8, %v1495_v4  ;;  %v3291_v22 = vmul.f32 %v2664_v61, %v1649_v40  ;;  %v3306_v51 = vmul.f32 %v2872_v28, %v886_v20  ;;  %v1194_v4 = vld [vmem:[#allocation2 + $0x92] sm:$0xff] }
 0x12d   : > { %5001 = vst [vmem:[#allocation129_spill] sm:$0xff] %v3271_v1  ;;  %5002 = vst [vmem:[#allocation130_spill] sm:$0xff] %v3274_v2  ;;  %v3288_v1 = vmul.f32 %v2649_v57, %v1649_v40  ;;  %v1040_v2 = vld [vmem:[#allocation2 + $0x91] sm:$0xff]  ;;  %v3312_v40 = vmul.f32 %v2876_v39, %v886_v20 }
 0x12e   : > { %5003 = vst [vmem:[#allocation131_spill] sm:$0xff] %v3277_v19  ;;  %5004 = vst [vmem:[#allocation132_spill] sm:$0xff] %v3280_v11  ;;  %v3297_v19 = vmul.f32 %v2653_v58, %v1803_v3  ;;  %v3300_v11 = vmul.f32 %v2668_v62, %v1803_v3  ;;  %v3321_v3 = vmul.f32 %v2900_v37, %v886_v20  ;;  %v1041_v62 = vld [vmem:[#allocation2 + $0xa1] sm:$0xff]  ;;  %v5059_v57 = vld [vmem:[#allocation63_spill] sm:$0xff] }
 0x12f   : > { %5005 = vst [vmem:[#allocation133_spill] sm:$0xff] %v3285_v6  ;;  %5006 = vst [vmem:[#allocation134_spill] sm:$0xff] %v3288_v1  ;;  %v3327_v1 = vmul.f32 %v2896_v59, %v1040_v2  ;;  %v1502_v6 = vld [vmem:[#allocation2 + $0x94] sm:$0xff] }
 0x130   : > { %5007 = vst [vmem:[#allocation135_spill] sm:$0xff] %v3291_v22  ;;  %5008 = vst [vmem:[#allocation136_spill] sm:$0xff] %v3294_v63  ;;  %v3315_v22 = vmul.f32 %v2888_v16, %v886_v20  ;;  %v3333_v63 = vmul.f32 %v2914_v33, %v1040_v2 }
 0x131   : > { %5009 = vst [vmem:[#allocation137_spill] sm:$0xff] %v3297_v19  ;;  %5010 = vst [vmem:[#allocation138_spill] sm:$0xff] %v3300_v11  ;;  %v3318_v19 = vmul.f32 %v2892_v26, %v886_v20  ;;  %v3324_v11 = vmul.f32 %v2880_v38, %v1040_v2  ;;  %v3339_v20 = vmul.f32 %v2924_v49, %v1194_v4 }
 0x132   : > { %5011 = vst [vmem:[#allocation139_spill] sm:$0xff] %v3303_v60  ;;  %5012 = vst [vmem:[#allocation140_spill] sm:$0xff] %v3306_v51  ;;  %v1348_v60 = vld [vmem:[#allocation2 + $0x93] sm:$0xff] }
 0x133   : > { %812 = vst.msk [vmem:[%s2836_s25] sm:$0xff] %vm442_vm2, %v702_v32  ;;  %852 = vst.msk [vmem:[#allocation2 + $0x33] sm:$0xff] %vm442_vm2, %v702_v32  ;;  %v3330_v32 = vmul.f32 %v2910_v44, %v1040_v2 }
 0x134   : > { %5013 = vst [vmem:[#allocation141_spill] sm:$0xff] %v3312_v40  ;;  %5014 = vst [vmem:[#allocation142_spill] sm:$0xff] %v3315_v22  ;;  %v3336_v22 = vmul.f32 %v2920_v15, %v1040_v2  ;;  %v3357_v2 = vmul.f32 %v4959_v47, %v1348_v60  ;;  %v5046_v40 = vld [vmem:[#allocation21_spill] sm:$0xff] }
 0x135   : > { %5015 = vst [vmem:[#allocation143_spill] sm:$0xff] %v3318_v19  ;;  %5016 = vst [vmem:[#allocation144_spill] sm:$0xff] %v3321_v3  ;;  %v3342_v3 = vmul.f32 %v2928_v52, %v1194_v4 }
 0x136   : > { %5017 = vst [vmem:[#allocation145_spill] sm:$0xff] %v3324_v11  ;;  %5018 = vst [vmem:[#allocation146_spill] sm:$0xff] %v3327_v1  ;;  %v3345_v11 = vmul.f32 %v2932_v36, %v1194_v4  ;;  %v3348_v1 = vmul.f32 %v2940_v35, %v1194_v4 }
 0x137   : > { %5019 = vst [vmem:[#allocation147_spill] sm:$0xff] %v3330_v32  ;;  %5020 = vst [vmem:[#allocation148_spill] sm:$0xff] %v3333_v63  ;;  %v3351_v32 = vmul.f32 %v2944_v13, %v1194_v4  ;;  %v3354_v63 = vmul.f32 %v2948_v12, %v1348_v60  ;;  %v3372_v4 = vmul.f32 %v2989_v31, %v1502_v6  ;;  %v5078_v12 = vld [vmem:[#allocation28_spill] sm:$0xff] }
 0x138   : > { %5021 = vst [vmem:[#allocation149_spill] sm:$0xff] %v3336_v22  ;;  %5022 = vst [vmem:[#allocation150_spill] sm:$0xff] %v3339_v20  ;;  %v1656_v22 = vld [vmem:[#allocation2 + $0x95] sm:$0xff]  ;;  %v3360_v20 = vmul.f32 %v4961_v25, %v1348_v60 }
 0x139   : > { %5023 = vst [vmem:[#allocation151_spill] sm:$0xff] %v3342_v3  ;;  %5024 = vst [vmem:[#allocation152_spill] sm:$0xff] %v3345_v11  ;;  %v3363_v3 = vmul.f32 %v4963_v27, %v1348_v60  ;;  %v3366_v11 = vmul.f32 %v4965_v34, %v1348_v60  ;;  %v3386_v60 = vmul.f32 %v4977_v43, %v1656_v22 }
 0x13a   : > { %5025 = vst [vmem:[#allocation153_spill] sm:$0xff] %v3348_v1  ;;  %5026 = vst [vmem:[#allocation154_spill] sm:$0xff] %v3351_v32  ;;  %v3369_v1 = vmul.f32 %v4968_v8, %v1502_v6  ;;  %v3383_v32 = vld [vmem:[#allocation2 + $0x96] sm:$0xff] }
 0x13b   : > { %5027 = vst [vmem:[#allocation155_spill] sm:$0xff] %v3354_v63  ;;  %5028 = vst [vmem:[#allocation156_spill] sm:$0xff] %v3357_v2  ;;  %v3375_v63 = vmul.f32 %v2993_v10, %v1502_v6  ;;  %v3378_v2 = vmul.f32 %v2997_v56, %v1502_v6  ;;  %v3420_v19 = vmul.f32 %v4992_v48, %v3383_v32 }
 0x13c   : > { %5029 = vst [vmem:[#allocation157_spill] sm:$0xff] %v3360_v20  ;;  %5030 = vst [vmem:[#allocation158_spill] sm:$0xff] %v3363_v3  ;;  %v3381_v20 = vmul.f32 %v4974_v0, %v1502_v6  ;;  %v3416_v3 = vmul.f32 %v4990_v7, %v3383_v32  ;;  %v3424_v51 = vmul.f32 %v5046_v40, %v3383_v32 }
 0x13d   : > { %5031 = vst [vmem:[#allocation159_spill] sm:$0xff] %v3366_v11  ;;  %5032 = vst [vmem:[#allocation160_spill] sm:$0xff] %v3369_v1  ;;  %v3389_v11 = vmul.f32 %v4979_v18, %v1656_v22  ;;  %v3392_v1 = vmul.f32 %v4981_v9, %v1656_v22 }
 0x13e   : > { %5033 = vst [vmem:[#allocation161_spill] sm:$0xff] %v3372_v4  ;;  %5034 = vst [vmem:[#allocation162_spill] sm:$0xff] %v3375_v63  ;;  %v3395_v4 = vmul.f32 %v4983_v55, %v1656_v22  ;;  %v3397_v63 = vld [vmem:[#allocation2 + $0x30] sm:$0xff] }
 0x13f   : > { %5035 = vst [vmem:[#allocation163_spill] sm:$0xff] %v3378_v2  ;;  %5036 = vst [vmem:[#allocation164_spill] sm:$0xff] %v3381_v20  ;;  %v917_v6 = vmul.f32 %v2832_v42, %v3397_v63  ;;  %v936_v20 = vmul.f32 %v2872_v28, %v3397_v63  ;;  %v887_v2 = vld [vmem:[#allocation2 + $0xa0] sm:$0xff] }
 0x140   : > { %5037 = vst [vmem:[#allocation165_spill] sm:$0xff] %v3383_v32  ;;  %5038 = vst [vmem:[#allocation166_spill] sm:$0xff] %v3386_v60  ;;  %v955_v60 = vmul.f32 %v2876_v39, %v3397_v63  ;;  %v3439_v58 = vmul.f32 %v2888_v16, %v887_v2 }
 0x141   : > { %5039 = vst [vmem:[#allocation167_spill] sm:$0xff] %v3389_v11  ;;  %5040 = vst [vmem:[#allocation168_spill] sm:$0xff] %v3392_v1  ;;  %v616_v11 = vadd.f32 %v2766_v30, %v3042_v23  ;;  %v3408_v1 = vmul.f32 %v4985_v21, %v1656_v22  ;;  %v3427_v23 = vadd.f32 %v917_v6, %v3262_v5  ;;  %v5048_v22 = vld [vmem:[#allocation90_spill] sm:$0xff] }
 0x142   : > { %5041 = vst [vmem:[#allocation169_spill] sm:$0xff] %v3395_v4  ;;  %v3412_v4 = vmul.f32 %v4988_v24, %v3383_v32  ;;  %5044 = vst [vmem:[#allocation172_spill] sm:$0xff] %v3416_v3  ;;  %v5049_v24 = vld [vmem:[#allocation91_spill] sm:$0xff]  ;;  %v3436_v3 = vmul.f32 %v2876_v39, %v887_v2  ;;  %v1195_v5 = vld [vmem:[#allocation2 + $0xa2] sm:$0xff] }
 0x143   : > { %5042 = vst [vmem:[#allocation170_spill] sm:$0xff] %v3408_v1  ;;  %5045 = vst [vmem:[#allocation173_spill] sm:$0xff] %v3420_v19  ;;  %v3430_v1 = vadd.f32 %v936_v20, %v5048_v22  ;;  %v3442_v19 = vmul.f32 %v2892_v26, %v887_v2  ;;  %v1349_v6 = vld [vmem:[#allocation2 + $0xa3] sm:$0xff]  ;;  %v5067_v26 = vld [vmem:[#allocation23_spill] sm:$0xff] }
 0x144   : > { %5043 = vst [vmem:[#allocation171_spill] sm:$0xff] %v3412_v4  ;;  %5047 = vst [vmem:[#allocation174_spill] sm:$0xff] %v3424_v51  ;;  %v3433_v4 = vadd.f32 %v955_v60, %v5049_v24  ;;  %v3445_v51 = vmul.f32 %v2900_v37, %v887_v2  ;;  %v5054_v20 = vld [vmem:[#allocation38_spill] sm:$0xff]  ;;  %v5057_v60 = vld [vmem:[#allocation32_spill] sm:$0xff]  ;;  %v3460_v2 = vmul.f32 %v2910_v44, %v1041_v62 }
 0x145   : > { %5050 = vst [vmem:[#allocation90_spill] sm:$0xff] %v3436_v3  ;;  %5051 = vst [vmem:[#allocation91_spill] sm:$0xff] %v3439_v58  ;;  %v5055_v22 = vmax.f32 %v5054_v20, 0.0  ;;  %v5056_v24 = vld [vmem:[#allocation66_spill] sm:$0xff]  ;;  %v5058_v43 = vmax.f32 %v5057_v60, 0.0  ;;  %v5060_v3 = vld [vmem:[#allocation24_spill] sm:$0xff]  ;;  %v3487_v44 = vmul.f32 %v4959_v47, %v1349_v6 }
 0x146   : > { %5052 = vst [vmem:[#allocation175_spill] sm:$0xff] %v3442_v19  ;;  %5053 = vst [vmem:[#allocation176_spill] sm:$0xff] %v3445_v51  ;;  %v585_v8 = vadd.f32 %v5060_v3, %v5059_v57  ;;  %v592_v58 = vadd.f32 %v5060_v3, %v5061_v45  ;;  %v3457_v19 = vmul.f32 %v2896_v59, %v1041_v62  ;;  %v5064_v51 = vld [vmem:[#allocation39_spill] sm:$0xff]  ;;  %v5065_v37 = vld [vmem:[#allocation22_spill] sm:$0xff] }
 0x147   : > { %v675_v32 = vsub.f32 %v5055_v22, %v616_v11  ;;  %v682_v61 = vsub.f32 %v5058_v43, %v5056_v24  ;;  %5063 = vst [vmem:[#allocation66_spill] sm:$0xff] %v3460_v2  ;;  %v3464_v20 = vadd.f32 %v5065_v37, %v5064_v51  ;;  %v5066_v22 = vld [vmem:[#allocation62_spill] sm:$0xff]  ;;  %v3469_v43 = vmul.f32 %v2914_v33, %v1041_v62  ;;  %v5075_v33 = vld [vmem:[#allocation61_spill] sm:$0xff] }
 0x148   : > { %5062 = vst [vmem:[#allocation38_spill] sm:$0xff] %v3457_v19  ;;  %v575_v60 = vmul.f32 %v5067_v26, %v5066_v22  ;;  %v3472_v57 = vmul.f32 %v2920_v15, %v1041_v62  ;;  %v3475_v45 = vmul.f32 %v2928_v52, %v1195_v5  ;;  %v3478_v19 = vmul.f32 %v2932_v36, %v1195_v5  ;;  %v5076_v62 = vld [vmem:[#allocation53_spill] sm:$0xff]  ;;  %v5080_v36 = vld [vmem:[#allocation60_spill] sm:$0xff] }
 0x149   : > { %5068 = vst [vmem:[#allocation32_spill] sm:$0xff] %v3469_v43  ;;  %v3481_v2 = vmul.f32 %v2940_v35, %v1195_v5  ;;  %v3484_v51 = vmul.f32 %v2944_v13, %v1195_v5  ;;  %5074 = vst [vmem:[#allocation62_spill] sm:$0xff] %v3487_v44  ;;  %v669_v43 = vmax.f32 %v5075_v33, 0.0  ;;  %v606_v35 = vmul.f32 %v592_v58, %v5075_v33 }
 0x14a   : > { %5069 = vst [vmem:[#allocation63_spill] sm:$0xff] %v3472_v57  ;;  %5070 = vst [vmem:[#allocation24_spill] sm:$0xff] %v3475_v45  ;;  %v5077_v57 = vunpack.c.l.bf16 %v5076_v62  ;;  %v5079_v45 = vunpack.c.h.bf16 %v5078_v12  ;;  %v3497_v5 = vmul.f32 %v4961_v25, %v1349_v6  ;;  %v568_v44 = vmul.f32 %v5067_v26, %v3464_v20 }
 0x14b   : > { %5071 = vst [vmem:[#allocation67_spill] sm:$0xff] %v3478_v19  ;;  %5072 = vst [vmem:[#allocation39_spill] sm:$0xff] %v3481_v2  ;;  %v599_v19 = vmul.f32 %v585_v8, %v5080_v36  ;;  %v5082_v2 = vld [vmem:[#allocation49_spill] sm:$0xff]  ;;  %v624_v58 = vadd.f32 %v2766_v30, %v606_v35  ;;  %v3510_v33 = vmul.f32 %v4963_v27, %v1349_v6  ;;  %v5088_v35 = vmax.f32 %v5080_v36, 0.0 }
 0x14c   : > { %5073 = vst [vmem:[#allocation22_spill] sm:$0xff] %v3484_v51  ;;  %v689_v15 = vmul.f32 %v5077_v57, %v675_v32  ;;  %v696_v17 = vmul.f32 %v5079_v45, %v682_v61  ;;  %5081 = vst [vmem:[#allocation23_spill] sm:$0xff] %v3497_v5  ;;  %v593_v51 = vadd.f32 %v5060_v3, %v575_v60  ;;  %v5092_v36 = vunpack.c.h.bf16 %v5076_v62 }
 0x14d   : > { %v3504_v13 = vadd.f32 %v5065_v37, %v5082_v2  ;;  %v617_v12 = vadd.f32 %v2766_v30, %v599_v19  ;;  %5083 = vst [vmem:[#allocation61_spill] sm:$0xff] %v3510_v33  ;;  %v3513_v8 = vmul.f32 %v4965_v34, %v1349_v6  ;;  %v3516_v57 = vmul.f32 %v2989_v31, %v1503_v29  ;;  %v1657_v37 = vld [vmem:[#allocation2 + $0xa5] sm:$0xff] }
 0x14e   : > { %v703_v32 = vadd.f32 %v689_v15, %v616_v11  ;;  %v710_v61 = vadd.f32 %v696_v17, %v5056_v24  ;;  %v3519_v60 = vmul.f32 %v2993_v10, %v1503_v29  ;;  %v3522_v15 = vmul.f32 %v2997_v56, %v1503_v29  ;;  %v1811_v17 = vld [vmem:[#allocation2 + $0xa6] sm:$0xff] }
 0x14f   : > { %5084 = vst [vmem:[#allocation53_spill] sm:$0xff] %v3513_v8  ;;  %5085 = vst [vmem:[#allocation28_spill] sm:$0xff] %v3516_v57  ;;  %v676_v11 = vsub.f32 %v5088_v35, %v617_v12  ;;  %v683_v6 = vsub.f32 %v669_v43, %v624_v58  ;;  %v3530_v24 = vmul.f32 %v4974_v0, %v1503_v29  ;;  %v5093_v29 = vld [vmem:[#allocation58_spill] sm:$0xff] }
 0x150   : > { %5086 = vst [vmem:[#allocation60_spill] sm:$0xff] %v3519_v60  ;;  %5087 = vst [vmem:[#allocation49_spill] sm:$0xff] %v3522_v15  ;;  %v809_v19 = vmul.f32 0.0, %v710_v61  ;;  %v586_v2 = vadd.f32 %v5060_v3, %v568_v44  ;;  %v607_v45 = vmul.f32 %v593_v51, %v5066_v22  ;;  %v569_v15 = vmul.f32 %v5067_v26, %v3504_v13  ;;  %v5095_v44 = vld [vmem:[#allocation25_spill] sm:$0xff] }
 0x151   : > { %813 = vst.msk [vmem:[%s2836_s25 + $0x8] sm:$0xff] %vm442_vm2, %v703_v32  ;;  %853 = vst.msk [vmem:[#allocation2 + $0x43] sm:$0xff] %vm442_vm2, %v703_v32  ;;  %v3537_v60 = vmul.f32 %v4979_v18, %v1657_v37  ;;  %v3540_v32 = vmul.f32 %v4981_v9, %v1657_v37  ;;  %v690_v43 = vmul.f32 %v5092_v36, %v676_v11  ;;  %v5094_v61 = vunpack.c.l.bf16 %v5093_v29  ;;  %v3567_v36 = vld [vmem:[%s4738_s5 + $0x30] ss:$0 sm:$0xff] }
 0x152   : > { %5089 = vst [vmem:[#allocation177_spill] sm:$0xff] %v3530_v24  ;;  %860 = vst.msk [vmem:[#allocation2 + $0xb3] sm:$0xff] %vm442_vm2, %v809_v19  ;;  %v898_v51 = vmul.f32 %v5095_v44, %v3397_v63  ;;  %v1034_v24 = vld [vmem:[#allocation2 + $0x31] sm:$0xff]  ;;  %v3550_v26 = vmul.f32 %v4983_v55, %v1657_v37  ;;  %v3559_v62 = vmul.f32 %v4992_v48, %v1811_v17 }
 0x153   : > { %5090 = vst [vmem:[#allocation178_spill] sm:$0xff] %v3537_v60  ;;  %5091 = vst [vmem:[#allocation179_spill] sm:$0xff] %v3540_v32  ;;  %v697_v35 = vmul.f32 %v5094_v61, %v683_v6  ;;  %v3553_v60 = vmul.f32 %v4985_v21, %v1657_v37  ;;  %v3556_v32 = vmul.f32 %v4990_v7, %v1811_v17  ;;  %v1188_v19 = vld [vmem:[#allocation2 + $0x32] sm:$0xff] }
 0x154   : > { %5096 = vst [vmem:[#allocation58_spill] sm:$0xff] %v3550_v26  ;;  %5099 = vst [vmem:[#allocation181_spill] sm:$0xff] %v3559_v62  ;;  %v3562_v11 = vmul.f32 %v5046_v40, %v1811_v17  ;;  %v704_v6 = vadd.f32 %v690_v43, %v617_v12  ;;  %v600_v37 = vmul.f32 %v586_v2, %v3464_v20  ;;  %v1342_v43 = vld [vmem:[#allocation2 + $0x33] sm:$0xff] }
 0x155   : > { %5097 = vst [vmem:[#allocation25_spill] sm:$0xff] %v3553_v60  ;;  %5098 = vst [vmem:[#allocation180_spill] sm:$0xff] %v3556_v32  ;;  %v711_v63 = vadd.f32 %v697_v35, %v624_v58  ;;  %v625_v61 = vadd.f32 %v2766_v30, %v607_v45  ;;  %v670_v32 = vmax.f32 %v5066_v22, 0.0  ;;  %v587_v60 = vadd.f32 %v5060_v3, %v569_v15 }
 0x156   : > { %5100 = vst [vmem:[#allocation182_spill] sm:$0xff] %v3562_v11  ;;  %5101 = vst [vmem:[#allocation183_spill] sm:$0xff] %v3567_v36  ;;  %v3574_v62 = vmul.f32 %v2783_v41, %v1034_v24  ;;  %v3577_v11 = vmul.f32 %v2846_v54, %v1034_v24  ;;  %v3580_v12 = vmul.f32 %v3567_v36, %v1811_v17 }
 0x157   : > { %814 = vst.msk [vmem:[%s2836_s25 + $0x10] sm:$0xff] %vm442_vm2, %v704_v6  ;;  %854 = vst.msk [vmem:[#allocation2 + $0x53] sm:$0xff] %vm442_vm2, %v704_v6  ;;  %v810_v58 = vmul.f32 0.0, %v711_v63  ;;  %v906_v2 = vadd.f32 %v2954_v14, %v898_v51  ;;  %v3587_v22 = vmul.f32 %v2880_v38, %v1034_v24  ;;  %v3590_v3 = vmul.f32 %v2896_v59, %v1034_v24  ;;  %v1496_v63 = vld [vmem:[#allocation2 + $0x34] sm:$0xff] }
 0x158   : > { %5102 = vst [vmem:[#allocation184_spill] sm:$0xff] %v3574_v62  ;;  %5103 = vst [vmem:[#allocation185_spill] sm:$0xff] %v3577_v11  ;;  %v3593_v15 = vmul.f32 %v2789_v46, %v1188_v19  ;;  %v881_v45 = vld [vmem:[#allocation2 + $0x40] sm:$0xff]  ;;  %v3596_v17 = vmul.f32 %v2850_v53, %v1188_v19  ;;  %v684_v26 = vsub.f32 %v670_v32, %v625_v61  ;;  %v1650_v32 = vld [vmem:[#allocation2 + $0x35] sm:$0xff] }
 0x159   : > { %5104 = vst [vmem:[#allocation186_spill] sm:$0xff] %v3580_v12  ;;  %5105 = vst [vmem:[#allocation187_spill] sm:$0xff] %v3587_v22  ;;  %v918_v35 = vmul.f32 %v2832_v42, %v881_v45  ;;  %v937_v6 = vmul.f32 %v2872_v28, %v881_v45  ;;  %v956_v51 = vmul.f32 %v2876_v39, %v881_v45  ;;  %v1804_v22 = vld [vmem:[#allocation2 + $0x36] sm:$0xff]  ;;  %v1035_v62 = vld [vmem:[#allocation2 + $0x41] sm:$0xff] }
 0x15a   : > { %5106 = vst [vmem:[#allocation188_spill] sm:$0xff] %v3590_v3  ;;  %5107 = vst [vmem:[#allocation189_spill] sm:$0xff] %v3593_v15  ;;  %v975_v24 = vmul.f32 %v2888_v16, %v881_v45  ;;  %v3604_v12 = vadd.f32 %v2766_v30, %v600_v37  ;;  %v601_v57 = vmul.f32 %v587_v60, %v3504_v13  ;;  %v5120_v15 = vld [vmem:[#allocation31_spill] sm:$0xff]  ;;  %v5124_v11 = vld [vmem:[#allocation52_spill] sm:$0xff] }
 0x15b   : > { %5108 = vst [vmem:[#allocation190_spill] sm:$0xff] %v3596_v17  ;;  %861 = vst.msk [vmem:[#allocation2 + $0xc3] sm:$0xff] %vm442_vm2, %v810_v58  ;;  %v3608_v8 = vmul.f32 %v2924_v49, %v1188_v19  ;;  %v3610_v33 = vadd.f32 %v918_v35, %v906_v2  ;;  %v3613_v5 = vadd.f32 %v937_v6, %v3427_v23  ;;  %v5113_v2 = vld [vmem:[#allocation30_spill] sm:$0xff] }
 0x15c   : > { %5109 = vst [vmem:[#allocation191_spill] sm:$0xff] %v3604_v12  ;;  %v3616_v17 = vadd.f32 %v956_v51, %v3430_v1  ;;  %v3619_v58 = vmul.f32 %v2928_v52, %v1188_v19  ;;  %v3622_v37 = vmul.f32 %v2795_v50, %v1342_v43  ;;  %v3625_v60 = vadd.f32 %v975_v24, %v3433_v4  ;;  %v5115_v23 = vld [vmem:[#allocation46_spill] sm:$0xff]  ;;  %v5118_v19 = vld [vmem:[#allocation27_spill] sm:$0xff] }
 0x15d   : > { %5110 = vst [vmem:[#allocation192_spill] sm:$0xff] %v3608_v8  ;;  %v663_v8 = vmax.f32 %v3464_v20, 0.0  ;;  %v3629_v35 = vmul.f32 %v5113_v2, %v1342_v43  ;;  %v3632_v6 = vmul.f32 %v5115_v23, %v1342_v43  ;;  %v3635_v1 = vmul.f32 %v4959_v47, %v1342_v43 }
 0x15e   : > { %5111 = vst [vmem:[#allocation193_spill] sm:$0xff] %v3619_v58  ;;  %5112 = vst [vmem:[#allocation194_spill] sm:$0xff] %v3622_v37  ;;  %v3638_v51 = vmul.f32 %v5118_v19, %v1496_v63  ;;  %v3641_v37 = vmul.f32 %v5120_v15, %v1496_v63  ;;  %v5122_v20 = vunpack.c.h.bf16 %v5093_v29  ;;  %v3653_v43 = vmul.f32 %v2989_v31, %v1496_v63  ;;  %v5129_v58 = vld [vmem:[#allocation11_spill] sm:$0xff]  ;;  %v5131_v29 = vld [vmem:[#allocation13_spill] sm:$0xff] }
 0x15f   : > { %5114 = vst [vmem:[#allocation195_spill] sm:$0xff] %v3629_v35  ;;  %5116 = vst [vmem:[#allocation46_spill] sm:$0xff] %v3632_v6  ;;  %v677_v4 = vsub.f32 %v663_v8, %v3604_v12  ;;  %v3647_v35 = vadd.f32 %v2766_v30, %v601_v57  ;;  %v3650_v6 = vmul.f32 %v5124_v11, %v1496_v63  ;;  %v664_v57 = vmax.f32 %v3504_v13, 0.0 }
 0x160   : > { %5117 = vst [vmem:[#allocation196_spill] sm:$0xff] %v3635_v1  ;;  %5119 = vst [vmem:[#allocation197_spill] sm:$0xff] %v3638_v51  ;;  %v698_v24 = vmul.f32 %v5122_v20, %v684_v26  ;;  %v5127_v1 = vld [vmem:[#allocation9_spill] sm:$0xff]  ;;  %v3660_v8 = vmul.f32 %v5129_v58, %v1650_v32  ;;  %v3663_v26 = vmul.f32 %v5131_v29, %v1650_v32  ;;  %v5134_v20 = vld [vmem:[#allocation10_spill] sm:$0xff] }
 0x161   : > { %5121 = vst [vmem:[#allocation31_spill] sm:$0xff] %v3641_v37  ;;  %5123 = vst [vmem:[#allocation198_spill] sm:$0xff] %v3647_v35  ;;  %v3656_v51 = vmul.f32 %v5127_v1, %v1650_v32  ;;  %v899_v37 = vmul.f32 %v5095_v44, %v881_v45  ;;  %v3666_v30 = vmul.f32 %v4979_v18, %v1650_v32  ;;  %v1343_v32 = vld [vmem:[#allocation2 + $0x43] sm:$0xff] }
 0x162   : > { %5125 = vst [vmem:[#allocation199_spill] sm:$0xff] %v3650_v6  ;;  %5126 = vst [vmem:[#allocation200_spill] sm:$0xff] %v3653_v43  ;;  %v3670_v63 = vmul.f32 %v5134_v20, %v1804_v22  ;;  %v5136_v6 = vld [vmem:[#allocation12_spill] sm:$0xff]  ;;  %v3679_v3 = vmul.f32 %v4990_v7, %v1804_v22  ;;  %v3688_v36 = vadd.f32 %v698_v24, %v625_v61 }
 0x163   : > { %5128 = vst [vmem:[#allocation201_spill] sm:$0xff] %v3656_v51  ;;  %5130 = vst [vmem:[#allocation202_spill] sm:$0xff] %v3660_v8  ;;  %v3673_v43 = vmul.f32 %v5136_v6, %v1804_v22  ;;  %v5138_v51 = vld [vmem:[#allocation18_spill] sm:$0xff] }
 0x164   : > { %5132 = vst [vmem:[#allocation203_spill] sm:$0xff] %v3663_v26  ;;  %5133 = vst [vmem:[#allocation204_spill] sm:$0xff] %v3666_v30  ;;  %v3676_v45 = vmul.f32 %v5138_v51, %v1804_v22  ;;  %v1189_v8 = vld [vmem:[#allocation2 + $0x42] sm:$0xff]  ;;  %v3682_v26 = vmul.f32 %v2783_v41, %v1035_v62  ;;  %v5142_v30 = vld [vmem:[#allocation59_spill] sm:$0xff]  ;;  %v3698_v22 = vmul.f32 %v2880_v38, %v1035_v62 }
 0x165   : > { %5135 = vst [vmem:[#allocation205_spill] sm:$0xff] %v3670_v63  ;;  %5137 = vst [vmem:[#allocation206_spill] sm:$0xff] %v3673_v43  ;;  %v5143_v12 = vunpack.c.l.bf16 %v5142_v30  ;;  %v3691_v63 = vsub.f32 %v664_v57, %v3647_v35  ;;  %v907_v43 = vadd.f32 %v2954_v14, %v899_v37  ;;  %v5147_v30 = vld [vmem:[#allocation40_spill] sm:$0xff]  ;;  %v3707_v61 = vmul.f32 %v2789_v46, %v1189_v8  ;;  %v5153_v57 = vld [vmem:[#allocation43_spill] sm:$0xff] }
 0x166   : > { %5139 = vst [vmem:[#allocation207_spill] sm:$0xff] %v3676_v45  ;;  %5140 = vst [vmem:[#allocation208_spill] sm:$0xff] %v3679_v3  ;;  %v3695_v45 = vmul.f32 %v2846_v54, %v1035_v62  ;;  %v3701_v3 = vmul.f32 %v2896_v59, %v1035_v62  ;;  %v3713_v37 = vmul.f32 %v2924_v49, %v1189_v8 }
 0x167   : > { %5141 = vst [vmem:[#allocation209_spill] sm:$0xff] %v3682_v26  ;;  %v3686_v13 = vmul.f32 %v5143_v12, %v677_v4  ;;  %5145 = vst [vmem:[#allocation211_spill] sm:$0xff] %v3698_v22  ;;  %v1497_v26 = vld [vmem:[#allocation2 + $0x44] sm:$0xff]  ;;  %v3704_v12 = vmul.f32 %v5147_v30, %v1035_v62  ;;  %v3710_v4 = vmul.f32 %v2850_v53, %v1189_v8 }
 0x168   : > { %5144 = vst [vmem:[#allocation210_spill] sm:$0xff] %v3695_v45  ;;  %5146 = vst [vmem:[#allocation212_spill] sm:$0xff] %v3701_v3  ;;  %v3716_v24 = vmul.f32 %v2928_v52, %v1189_v8  ;;  %v3719_v22 = vmul.f32 %v5153_v57, %v1189_v8  ;;  %v3722_v3 = vmul.f32 %v2795_v50, %v1343_v32  ;;  %v1651_v45 = vld [vmem:[#allocation2 + $0x45] sm:$0xff] }
 0x169   : > { %5148 = vst [vmem:[#allocation40_spill] sm:$0xff] %v3704_v12  ;;  %5149 = vst [vmem:[#allocation213_spill] sm:$0xff] %v3707_v61  ;;  %v3725_v62 = vmul.f32 %v5113_v2, %v1343_v32  ;;  %v882_v61 = vld [vmem:[#allocation2 + $0x50] sm:$0xff]  ;;  %v3728_v12 = vmul.f32 %v5115_v23, %v1343_v32  ;;  %v3737_v8 = vmul.f32 %v5118_v19, %v1497_v26 }
 0x16a   : > { %5150 = vst [vmem:[#allocation214_spill] sm:$0xff] %v3710_v4  ;;  %5151 = vst [vmem:[#allocation215_spill] sm:$0xff] %v3713_v37  ;;  %v3731_v4 = vmul.f32 %v4959_v47, %v1343_v32  ;;  %v3734_v37 = vmul.f32 %v4961_v25, %v1343_v32  ;;  %v3755_v32 = vmul.f32 %v5129_v58, %v1651_v45  ;;  %v1042_v58 = vld [vmem:[#allocation2 + $0xb1] sm:$0xff] }
 0x16b   : > { %5152 = vst [vmem:[#allocation216_spill] sm:$0xff] %v3716_v24  ;;  %5154 = vst [vmem:[#allocation43_spill] sm:$0xff] %v3719_v22  ;;  %v3740_v24 = vmul.f32 %v5120_v15, %v1497_v26  ;;  %v3760_v22 = vmul.f32 %v5131_v29, %v1651_v45  ;;  %v3766_v35 = vmul.f32 %v4979_v18, %v1651_v45 }
 0x16c   : > { %5155 = vst [vmem:[#allocation217_spill] sm:$0xff] %v3722_v3  ;;  %5156 = vst [vmem:[#allocation218_spill] sm:$0xff] %v3725_v62  ;;  %v3743_v3 = vmul.f32 %v5124_v11, %v1497_v26  ;;  %v3746_v62 = vmul.f32 %v2989_v31, %v1497_v26 }
 0x16d   : > { %5157 = vst [vmem:[#allocation219_spill] sm:$0xff] %v3728_v12  ;;  %5158 = vst [vmem:[#allocation220_spill] sm:$0xff] %v3731_v4  ;;  %v3749_v12 = vmul.f32 %v2993_v10, %v1497_v26  ;;  %v3752_v4 = vmul.f32 %v5127_v1, %v1651_v45  ;;  %v5168_v26 = vld [vmem:[#allocation36_spill] sm:$0xff] }
 0x16e   : > { %5159 = vst [vmem:[#allocation221_spill] sm:$0xff] %v3734_v37  ;;  %5160 = vst [vmem:[#allocation222_spill] sm:$0xff] %v3737_v8  ;;  %v1805_v37 = vld [vmem:[#allocation2 + $0x46] sm:$0xff]  ;;  %v919_v8 = vmul.f32 %v2832_v42, %v882_v61 }
 0x16f   : > { %5161 = vst [vmem:[#allocation223_spill] sm:$0xff] %v3740_v24  ;;  %5162 = vst [vmem:[#allocation224_spill] sm:$0xff] %v3743_v3  ;;  %v938_v24 = vmul.f32 %v2872_v28, %v882_v61  ;;  %v957_v3 = vmul.f32 %v2876_v39, %v882_v61  ;;  %v1196_v39 = vld [vmem:[#allocation2 + $0xb2] sm:$0xff] }
 0x170   : > { %5163 = vst [vmem:[#allocation225_spill] sm:$0xff] %v3746_v62  ;;  %5164 = vst [vmem:[#allocation226_spill] sm:$0xff] %v3749_v12  ;;  %v976_v62 = vmul.f32 %v2888_v16, %v882_v61  ;;  %v995_v12 = vmul.f32 %v5168_v26, %v882_v61  ;;  %v3771_v42 = vadd.f32 %v919_v8, %v907_v43  ;;  %v1504_v8 = vld [vmem:[#allocation2 + $0xb4] sm:$0xff] }
 0x171   : > { %5165 = vst [vmem:[#allocation227_spill] sm:$0xff] %v3752_v4  ;;  %5166 = vst [vmem:[#allocation228_spill] sm:$0xff] %v3755_v32  ;;  %v3769_v4 = vmul.f32 %v4981_v9, %v1651_v45  ;;  %v888_v32 = vld [vmem:[#allocation2 + $0xb0] sm:$0xff]  ;;  %v3774_v28 = vadd.f32 %v938_v24, %v3610_v33  ;;  %v3780_v29 = vadd.f32 %v957_v3, %v3613_v5 }
 0x172   : > { %5167 = vst [vmem:[#allocation229_spill] sm:$0xff] %v3760_v22  ;;  %5169 = vst [vmem:[#allocation230_spill] sm:$0xff] %v3766_v35  ;;  %v3777_v22 = vmul.f32 %v5134_v20, %v1805_v37  ;;  %v3783_v18 = vadd.f32 %v976_v62, %v3616_v17  ;;  %v3786_v45 = vadd.f32 %v995_v12, %v3625_v60  ;;  %v1350_v5 = vld [vmem:[#allocation2 + $0xb3] sm:$0xff]  ;;  %v5179_v60 = vld [vmem:[#allocation37_spill] sm:$0xff] }
 0x173   : > { %5170 = vst [vmem:[#allocation231_spill] sm:$0xff] %v3769_v4  ;;  %v3789_v35 = vmul.f32 %v5136_v6, %v1805_v37  ;;  %v3792_v43 = vmul.f32 %v5138_v51, %v1805_v37  ;;  %v3795_v33 = vmul.f32 %v4990_v7, %v1805_v37  ;;  %v3798_v24 = vmul.f32 %v4992_v48, %v1805_v37  ;;  %v1812_v4 = vld [vmem:[#allocation2 + $0xb6] sm:$0xff] }
 0x174   : > { %5171 = vst [vmem:[#allocation232_spill] sm:$0xff] %v3777_v22  ;;  %5172 = vst [vmem:[#allocation233_spill] sm:$0xff] %v3786_v45  ;;  %v3801_v3 = vmul.f32 %v2888_v16, %v888_v32  ;;  %v3804_v17 = vmul.f32 %v5168_v26, %v888_v32  ;;  %v3807_v12 = vmul.f32 %v5179_v60, %v888_v32  ;;  %v1658_v22 = vld [vmem:[#allocation2 + $0xb5] sm:$0xff] }
 0x175   : > { %5173 = vst [vmem:[#allocation234_spill] sm:$0xff] %v3789_v35  ;;  %5174 = vst [vmem:[#allocation235_spill] sm:$0xff] %v3792_v43  ;;  %v3810_v62 = vmul.f32 %v5147_v30, %v1042_v58  ;;  %v5182_v43 = vld [vmem:[#allocation41_spill] sm:$0xff] }
 0x176   : > { %5175 = vst [vmem:[#allocation236_spill] sm:$0xff] %v3795_v33  ;;  %5176 = vst [vmem:[#allocation237_spill] sm:$0xff] %v3798_v24  ;;  %v3813_v35 = vmul.f32 %v5182_v43, %v1042_v58  ;;  %v5184_v33 = vld [vmem:[#allocation42_spill] sm:$0xff]  ;;  %v3819_v24 = vmul.f32 %v5153_v57, %v1196_v39 }
 0x177   : > { %5177 = vst [vmem:[#allocation238_spill] sm:$0xff] %v3801_v3  ;;  %5178 = vst [vmem:[#allocation239_spill] sm:$0xff] %v3804_v17  ;;  %v3816_v37 = vmul.f32 %v5184_v33, %v1042_v58  ;;  %v900_v17 = vmul.f32 %v5095_v44, %v882_v61  ;;  %v5187_v3 = vld [vmem:[#allocation44_spill] sm:$0xff]  ;;  %v3841_v61 = vmul.f32 %v2997_v56, %v1504_v8 }
 0x178   : > { %5180 = vst [vmem:[#allocation37_spill] sm:$0xff] %v3807_v12  ;;  %5181 = vst [vmem:[#allocation240_spill] sm:$0xff] %v3810_v62  ;;  %v3823_v32 = vmul.f32 %v5187_v3, %v1196_v39  ;;  %v5189_v12 = vld [vmem:[#allocation45_spill] sm:$0xff]  ;;  %v3829_v62 = vmul.f32 %v4961_v25, %v1350_v5  ;;  %v1036_v58 = vld [vmem:[#allocation2 + $0x51] sm:$0xff] }
 0x179   : > { %5183 = vst [vmem:[#allocation41_spill] sm:$0xff] %v3813_v35  ;;  %5185 = vst [vmem:[#allocation42_spill] sm:$0xff] %v3816_v37  ;;  %v3826_v45 = vmul.f32 %v5189_v12, %v1196_v39  ;;  %v3832_v35 = vmul.f32 %v4963_v27, %v1350_v5  ;;  %v3835_v37 = vmul.f32 %v4965_v34, %v1350_v5 }
 0x17a   : > { %5186 = vst [vmem:[#allocation241_spill] sm:$0xff] %v3819_v24  ;;  %5188 = vst [vmem:[#allocation242_spill] sm:$0xff] %v3823_v32  ;;  %v3838_v24 = vmul.f32 %v2993_v10, %v1504_v8  ;;  %v3844_v32 = vmul.f32 %v4974_v0, %v1504_v8  ;;  %v3847_v39 = vmul.f32 %v4981_v9, %v1658_v22 }
 0x17b   : > { %5190 = vst [vmem:[#allocation45_spill] sm:$0xff] %v3826_v45  ;;  %5191 = vst [vmem:[#allocation243_spill] sm:$0xff] %v3829_v62  ;;  %v3850_v62 = vmul.f32 %v4983_v55, %v1658_v22  ;;  %v3856_v5 = vmul.f32 %v4992_v48, %v1812_v4  ;;  %v3865_v8 = vadd.f32 %v2954_v14, %v900_v17 }
 0x17c   : > { %5192 = vst [vmem:[#allocation244_spill] sm:$0xff] %v3832_v35  ;;  %5193 = vst [vmem:[#allocation245_spill] sm:$0xff] %v3835_v37  ;;  %v3853_v35 = vmul.f32 %v4985_v21, %v1658_v22  ;;  %v1190_v37 = vld [vmem:[#allocation2 + $0x52] sm:$0xff]  ;;  %v3871_v22 = vmul.f32 %v2846_v54, %v1036_v58 }
 0x17d   : > { %5194 = vst [vmem:[#allocation246_spill] sm:$0xff] %v3838_v24  ;;  %5195 = vst [vmem:[#allocation247_spill] sm:$0xff] %v3841_v61  ;;  %v3859_v24 = vmul.f32 %v5046_v40, %v1812_v4  ;;  %v5202_v61 = vld [vmem:[#allocation183_spill] sm:$0xff]  ;;  %v3886_v17 = vmul.f32 %v2789_v46, %v1190_v37 }
 0x17e   : > { %5196 = vst [vmem:[#allocation248_spill] sm:$0xff] %v3844_v32  ;;  %5197 = vst [vmem:[#allocation249_spill] sm:$0xff] %v3847_v39  ;;  %v3862_v45 = vmul.f32 %v5202_v61, %v1812_v4  ;;  %v3868_v39 = vmul.f32 %v2783_v41, %v1036_v58  ;;  %v3883_v4 = vmul.f32 %v5182_v43, %v1036_v58 }
 0x17f   : > { %5198 = vst [vmem:[#allocation250_spill] sm:$0xff] %v3850_v62  ;;  %5199 = vst [vmem:[#allocation251_spill] sm:$0xff] %v3853_v35  ;;  %v1344_v62 = vld [vmem:[#allocation2 + $0x53] sm:$0xff]  ;;  %v3874_v35 = vmul.f32 %v2880_v38, %v1036_v58  ;;  %v3892_v32 = vmul.f32 %v2924_v49, %v1190_v37 }
 0x180   : > { %5200 = vst [vmem:[#allocation252_spill] sm:$0xff] %v3856_v5  ;;  %5201 = vst [vmem:[#allocation253_spill] sm:$0xff] %v3859_v24  ;;  %v3877_v5 = vmul.f32 %v2896_v59, %v1036_v58  ;;  %v3880_v24 = vmul.f32 %v5147_v30, %v1036_v58  ;;  %v3904_v58 = vmul.f32 %v2795_v50, %v1344_v62 }
 0x181   : > { %5203 = vst [vmem:[#allocation183_spill] sm:$0xff] %v3862_v45  ;;  %5204 = vst [vmem:[#allocation254_spill] sm:$0xff] %v3868_v39  ;;  %v3889_v45 = vmul.f32 %v2850_v53, %v1190_v37 }
 0x182   : > { %5205 = vst [vmem:[#allocation255_spill] sm:$0xff] %v3871_v22  ;;  %5206 = vst [vmem:[#allocation256_spill] sm:$0xff] %v3874_v35  ;;  %v1498_v22 = vld [vmem:[#allocation2 + $0x54] sm:$0xff]  ;;  %v3895_v35 = vmul.f32 %v2928_v52, %v1190_v37 }
 0x183   : > { %5207 = vst [vmem:[#allocation257_spill] sm:$0xff] %v3877_v5  ;;  %5208 = vst [vmem:[#allocation258_spill] sm:$0xff] %v3880_v24  ;;  %v3898_v5 = vmul.f32 %v5153_v57, %v1190_v37  ;;  %v3901_v24 = vmul.f32 %v5187_v3, %v1190_v37  ;;  %v3919_v37 = vmul.f32 %v4963_v27, %v1344_v62 }
 0x184   : > { %5209 = vst [vmem:[#allocation259_spill] sm:$0xff] %v3883_v4  ;;  %5210 = vst [vmem:[#allocation260_spill] sm:$0xff] %v3886_v17  ;;  %v3907_v17 = vmul.f32 %v5113_v2, %v1344_v62  ;;  %v3928_v39 = vmul.f32 %v5120_v15, %v1498_v22 }
 0x185   : > { %5211 = vst [vmem:[#allocation261_spill] sm:$0xff] %v3889_v45  ;;  %5212 = vst [vmem:[#allocation262_spill] sm:$0xff] %v3892_v32  ;;  %v3910_v45 = vmul.f32 %v5115_v23, %v1344_v62  ;;  %v3913_v32 = vmul.f32 %v4959_v47, %v1344_v62 }
 0x186   : > { %5213 = vst [vmem:[#allocation263_spill] sm:$0xff] %v3895_v35  ;;  %5214 = vst [vmem:[#allocation264_spill] sm:$0xff] %v3898_v5  ;;  %v3916_v35 = vmul.f32 %v4961_v25, %v1344_v62  ;;  %v1652_v5 = vld [vmem:[#allocation2 + $0x55] sm:$0xff] }
 0x187   : > { %5215 = vst [vmem:[#allocation265_spill] sm:$0xff] %v3901_v24  ;;  %5216 = vst [vmem:[#allocation266_spill] sm:$0xff] %v3904_v58  ;;  %v3922_v24 = vmul.f32 %v5118_v19, %v1498_v22  ;;  %v5223_v58 = vld [vmem:[#allocation191_spill] sm:$0xff]  ;;  %v3942_v19 = vmul.f32 %v2993_v10, %v1498_v22 }
 0x188   : > { %5217 = vst [vmem:[#allocation267_spill] sm:$0xff] %v3907_v17  ;;  %5218 = vst [vmem:[#allocation268_spill] sm:$0xff] %v3910_v45  ;;  %v705_v17 = vadd.f32 %v3686_v13, %v5223_v58  ;;  %v811_v45 = vmul.f32 0.0, %v3688_v36  ;;  %v3936_v62 = vld [vmem:[#allocation2 + $0x56] sm:$0xff]  ;;  %v3945_v36 = vmul.f32 %v2997_v56, %v1498_v22  ;;  %v3948_v13 = vmul.f32 %v5127_v1, %v1652_v5 }
 0x189   : > { %5219 = vst [vmem:[#allocation269_spill] sm:$0xff] %v3913_v32  ;;  %5220 = vst [vmem:[#allocation270_spill] sm:$0xff] %v3916_v35  ;;  %v3931_v32 = vmul.f32 %v5124_v11, %v1498_v22  ;;  %v3934_v35 = vmul.f32 %v2989_v31, %v1498_v22  ;;  %v5232_v58 = vld [vmem:[#allocation11_spill] sm:$0xff] }
 0x18a   : > { %5221 = vst [vmem:[#allocation271_spill] sm:$0xff] %v3919_v37  ;;  %5222 = vst [vmem:[#allocation272_spill] sm:$0xff] %v3922_v24  ;;  %v5227_v37 = vld [vmem:[#allocation59_spill] sm:$0xff] }
 0x18b   : > { %5224 = vst [vmem:[#allocation191_spill] sm:$0xff] %v3928_v39  ;;  %5225 = vst [vmem:[#allocation273_spill] sm:$0xff] %v3931_v32  ;;  %v5228_v24 = vunpack.c.h.bf16 %v5227_v37  ;;  %v3951_v32 = vmul.f32 %v5232_v58, %v1652_v5  ;;  %v889_v39 = vld [vmem:[#allocation2 + $0xc0] sm:$0xff]  ;;  %v5236_v37 = vld [vmem:[#allocation14_spill] sm:$0xff] }
 0x18c   : > { %5226 = vst [vmem:[#allocation274_spill] sm:$0xff] %v3934_v35  ;;  %5229 = vst [vmem:[#allocation59_spill] sm:$0xff] %v3942_v19  ;;  %v3962_v22 = vmul.f32 %v5236_v37, %v1652_v5  ;;  %v3965_v19 = vmul.f32 %v4981_v9, %v1652_v5  ;;  %v5239_v35 = vld [vmem:[#allocation198_spill] sm:$0xff] }
 0x18d   : > { %v692_v4 = vmul.f32 %v5228_v24, %v3691_v63  ;;  %5230 = vst [vmem:[#allocation275_spill] sm:$0xff] %v3945_v36  ;;  %5231 = vst [vmem:[#allocation276_spill] sm:$0xff] %v3948_v13  ;;  %v5234_v63 = vld [vmem:[#allocation13_spill] sm:$0xff] }
 0x18e   : > { %5233 = vst [vmem:[#allocation277_spill] sm:$0xff] %v3951_v32  ;;  %815 = vst.msk [vmem:[%s2836_s25 + $0x18] sm:$0xff] %vm442_vm2, %v705_v17  ;;  %v3959_v24 = vmul.f32 %v5234_v63, %v1652_v5  ;;  %v1043_v13 = vld [vmem:[#allocation2 + $0xc1] sm:$0xff] }
 0x18f   : > { %855 = vst.msk [vmem:[#allocation2 + $0x63] sm:$0xff] %vm442_vm2, %v705_v17  ;;  %862 = vst.msk [vmem:[#allocation2 + $0xd3] sm:$0xff] %vm442_vm2, %v811_v45  ;;  %v1197_v32 = vld [vmem:[#allocation2 + $0xc2] sm:$0xff]  ;;  %v706_v36 = vadd.f32 %v692_v4, %v5239_v35  ;;  %v3969_v17 = vmul.f32 %v4983_v55, %v1652_v5  ;;  %v3973_v45 = vmul.f32 %v5134_v20, %v3936_v62 }
 0x190   : > { %5235 = vst [vmem:[#allocation278_spill] sm:$0xff] %v3959_v24  ;;  %5237 = vst [vmem:[#allocation279_spill] sm:$0xff] %v3962_v22  ;;  %v3977_v22 = vmul.f32 %v5136_v6, %v3936_v62  ;;  %v1351_v24 = vld [vmem:[#allocation2 + $0xc3] sm:$0xff]  ;;  %v3985_v35 = vmul.f32 %v4990_v7, %v3936_v62  ;;  %v3989_v5 = vmul.f32 %v4992_v48, %v3936_v62 }
 0x191   : > { %5238 = vst [vmem:[#allocation280_spill] sm:$0xff] %v3965_v19  ;;  %5240 = vst [vmem:[#allocation198_spill] sm:$0xff] %v3969_v17  ;;  %v3981_v19 = vmul.f32 %v5138_v51, %v3936_v62  ;;  %v1505_v9 = vld [vmem:[#allocation2 + $0xc4] sm:$0xff]  ;;  %v3992_v4 = vmul.f32 %v5168_v26, %v889_v39  ;;  %v4015_v48 = vmul.f32 %v5187_v3, %v1197_v32 }
 0x192   : > { %5241 = vst [vmem:[#allocation281_spill] sm:$0xff] %v3973_v45  ;;  %5242 = vst [vmem:[#allocation282_spill] sm:$0xff] %v3977_v22  ;;  %v3995_v45 = vmul.f32 %v5179_v60, %v889_v39  ;;  %v1659_v22 = vld [vmem:[#allocation2 + $0xc5] sm:$0xff]  ;;  %v4012_v39 = vmul.f32 %v5184_v33, %v1043_v13  ;;  %v4026_v7 = vmul.f32 %v4965_v34, %v1351_v24 }
 0x193   : > { %5243 = vst [vmem:[#allocation283_spill] sm:$0xff] %v3981_v19  ;;  %5244 = vst [vmem:[#allocation284_spill] sm:$0xff] %v3985_v35  ;;  %v1813_v17 = vld [vmem:[#allocation2 + $0xc6] sm:$0xff]  ;;  %v4018_v35 = vmul.f32 %v5189_v12, %v1197_v32  ;;  %v4032_v19 = vmul.f32 %v4974_v0, %v1505_v9 }
 0x194   : > { %5245 = vst [vmem:[#allocation285_spill] sm:$0xff] %v3989_v5  ;;  %5246 = vst [vmem:[#allocation286_spill] sm:$0xff] %v3992_v4  ;;  %v4009_v5 = vmul.f32 %v5182_v43, %v1043_v13  ;;  %v4029_v13 = vmul.f32 %v2997_v56, %v1505_v9 }
 0x195   : > { %5247 = vst [vmem:[#allocation287_spill] sm:$0xff] %v3995_v45  ;;  %816 = vst.msk [vmem:[%s2836_s25 + $0x20] sm:$0xff] %vm442_vm2, %v706_v36 }
 0x196   : > { %856 = vst.msk [vmem:[#allocation2 + $0x73] sm:$0xff] %vm442_vm2, %v706_v36  ;;  %5248 = vst [vmem:[#allocation288_spill] sm:$0xff] %v4009_v5  ;;  %v4023_v36 = vmul.f32 %v4963_v27, %v1351_v24 }
 0x197   : > { %5249 = vst [vmem:[#allocation289_spill] sm:$0xff] %v4012_v39  ;;  %5250 = vst [vmem:[#allocation290_spill] sm:$0xff] %v4015_v48 }
 0x198   : > { %5251 = vst [vmem:[#allocation291_spill] sm:$0xff] %v4018_v35  ;;  %5252 = vst [vmem:[#allocation292_spill] sm:$0xff] %v4023_v36 }
 0x199   : > { %5253 = vst [vmem:[#allocation293_spill] sm:$0xff] %v4026_v7  ;;  %5254 = vst [vmem:[#allocation294_spill] sm:$0xff] %v4029_v13 }
 0x19a   : > { %5255 = vst [vmem:[#allocation295_spill] sm:$0xff] %v4032_v19 }
 0x19b   : > { %2317 = shalt.err (!%p2314_p5)
}
 0x19c   : > { %s2318_s19 = scalar_lea.hbm %s4005_s22, 1024  ;;  %s2322_s11 = scalar_lea.hbm %s4741_s8, 2048 }
 0x19d   : > { %p2319_p6 = scmp.ne.s32.totalorder %s4005_s22, %s2318_s19  ;;  %p2323_p10 = scmp.lt.s32.totalorder %s4005_s22, %s4741_s8 }
 0x19e   : > { %p2324_p11 = scmp.lt.s32.totalorder %s2322_s11, %s2318_s19 }
 0x19f   : > { %p2320_p7 = pnand %p2319_p6, %p2503_p4 }
 0x1a0   : > { %p2325_p12 = por %p2324_p11, %p2323_p10 }
 0x1a1   : > { %p2321_p9 = pneg %p2320_p7 }
 0x1a3   : > { %p2326_p13 = pnand %p2325_p12, %p2321_p9 }
 0x1a5   : > { %2329 = shalt.err (!%p2326_p13)
}
 0x1a6   : > { %s4858_s26 = smov 128   ;;  %s2416_s12 = smov 8   ;;  %v4061_v9 = vmul.f32 %v4983_v55, %v1659_v22  ;;  %v4064_v32 = vmul.f32 %v4985_v21, %v1659_v22  ;;  %v4067_v24 = vmul.f32 %v5046_v40, %v1813_v17  ;;  %v4070_v19 = vmul.f32 %v5202_v61, %v1813_v17  ;;  %v883_v13 = vld [vmem:[#allocation2 + $0x60] sm:$0xff]  ;;  %v5262_v35 = vld [vmem:[#allocation108_spill] sm:$0xff] }
 0x1a7   : > { %s5256_s16 = scalar_lea.sflag [#allocation6], %s2801_s21  ;;  %v1037_v7 = vld [vmem:[#allocation2 + $0x61] sm:$0xff]  ;;  %v4074_v36 = vmul.f32 %v5046_v40, %v3936_v62  ;;  %v4078_v48 = vmul.f32 %v5046_v40, %v5262_v35  ;;  %v4082_v22 = vmul.f32 %v5202_v61, %v5262_v35  ;;  %v901_v17 = vmul.f32 %v5095_v44, %v883_v13  ;;  %s5627_s11 = sshll.u32 %s2402_s30, 10 }
 0x1a8   : > { %2239 = dma.vmem_to_hbm [thread:$0]  (%p2503_p4), %s4020_s23, 1024, %s4005_s22, %s5256_s16, %s4858_s26, %s4858_s26, %s2416_s12   ;;  %5257 = vst [vmem:[#allocation296_spill] sm:$0xff] %v4061_v9  ;;  %5258 = vst [vmem:[#allocation297_spill] sm:$0xff] %v4064_v32  ;;  %v5265_v32 = vld [vmem:[#allocation165_spill] sm:$0xff]  ;;  %v5269_v62 = vld [vmem:[#allocation34_spill] sm:$0xff]  ;;  %v977_v45 = vmul.f32 %v2888_v16, %v883_v13  ;;  %v1015_v40 = vmul.f32 %v5179_v60, %v883_v13  ;;  %v4096_v35 = vmul.f32 %v2783_v41, %v1037_v7 }
 0x1a9   : > { %5259 = vst [vmem:[#allocation298_spill] sm:$0xff] %v4067_v24  ;;  %5260 = vst [vmem:[#allocation299_spill] sm:$0xff] %v4070_v19  ;;  %v4086_v24 = vmul.f32 %v5202_v61, %v5265_v32  ;;  %v5267_v19 = vld [vmem:[#allocation29_spill] sm:$0xff]  ;;  %v4099_v32 = vadd.f32 %v2954_v14, %v901_v17  ;;  %v4118_v14 = vmul.f32 %v2846_v54, %v1037_v7  ;;  %s5620_s23 = sshll.u32 %s2801_s21, 6  ;;  %s4675_s22 = scalar_lea.hbm %s4740_s7, %s5627_s11 }
 0x1aa   : > { %5261 = vst [vmem:[#allocation300_spill] sm:$0xff] %v4074_v36  ;;  %5263 = vst [vmem:[#allocation108_spill] sm:$0xff] %v4078_v48  ;;  %v920_v9 = vmul.f32 %v5267_v19, %v883_v13  ;;  %v5268_v39 = vld [vmem:[#allocation33_spill] sm:$0xff]  ;;  %v958_v36 = vmul.f32 %v5269_v62, %v883_v13  ;;  %v996_v48 = vmul.f32 %v5168_v26, %v883_v13  ;;  %s333_s25 = scalar_lea.vmem [#allocation3], %s5620_s23  ;;  %s1964_s30 = scalar_lea.sflag [#allocation4], %s2801_s21 }
 0x1ab   : > { %5264 = vst [vmem:[#allocation301_spill] sm:$0xff] %v4082_v22  ;;  %5266 = vst [vmem:[#allocation165_spill] sm:$0xff] %v4086_v24  ;;  %v939_v5 = vmul.f32 %v5268_v39, %v883_v13  ;;  %v1191_v16 = vld [vmem:[#allocation2 + $0x62] sm:$0xff]  ;;  %v4111_v26 = vadd.f32 %v977_v45, %v3780_v29  ;;  %v4130_v29 = vmul.f32 %v5182_v43, %v1037_v7  ;;  %s1984_s14 = sshll.u32 %s333_s25, 4  ;;  %s2417_s19 = smov [#allocation3]   ;;  %s4677_s14 = int_to_ptr.vmem [resolvable:$true] %s1984_s14 }
 0x1ac   : > { %5270 = vst [vmem:[#allocation29_spill] sm:$0xff] %v4096_v35  ;;  %v4102_v22 = vadd.f32 %v920_v9, %v3865_v8  ;;  %v4108_v4 = vadd.f32 %v958_v36, %v3774_v28  ;;  %v4114_v13 = vadd.f32 %v996_v48, %v3783_v18  ;;  %v5271_v35 = vld [vmem:[#allocation233_spill] sm:$0xff]  ;;  %v4121_v8 = vmul.f32 %v2880_v38, %v1037_v7  ;;  %v5273_v18 = vld [vmem:[#allocation68_spill] sm:$0xff]  ;;  %s2330_s23 = scalar_lea.vmem %s4677_s14, 1024  ;;  %s2334_s20 = sshll.u32 %s2417_s19, 4  ;;  %s2335_s20 = int_to_ptr.vmem [resolvable:$false] %s2334_s20 }
 0x1ad   : > { %v4105_v24 = vadd.f32 %v939_v5, %v3771_v42  ;;  %v1023_v41 = vadd.f32 %v1015_v40, %v5271_v35  ;;  %v4124_v42 = vmul.f32 %v2896_v59, %v1037_v7  ;;  %v4127_v28 = vmul.f32 %v5147_v30, %v1037_v7  ;;  %5272 = vst [vmem:[#allocation33_spill] sm:$0xff] %v4130_v29  ;;  %v1345_v45 = vld [vmem:[#allocation2 + $0x63] sm:$0xff]  ;;  %p2331_p0 = scmp.ne.s32.totalorder %s4677_s14, %s2330_s23  ;;  %s2336_s11 = scalar_lea.vmem %s2335_s20, 2048 }
 0x1ae   : > { %v1169_v40 = vmul.f32 %v5184_v33, %v1037_v7  ;;  %v4135_v5 = vmul.f32 %v2789_v46, %v1191_v16  ;;  %v4138_v36 = vmul.f32 %v2850_v53, %v1191_v16  ;;  %v4141_v9 = vmul.f32 %v2924_v49, %v1191_v16  ;;  %v5280_v7 = vld [vmem:[#allocation85_spill] sm:$0xff]  ;;  %p2337_p3 = scmp.lt.s32.totalorder %s4677_s14, %s2335_s20  ;;  %p2338_p5 = scmp.lt.s32.totalorder %s2336_s11, %s2330_s23 }
 0x1af   : > { %v1057_v48 = vadd.f32 %v5273_v18, %v1023_v41  ;;  %v4144_v17 = vmul.f32 %v2928_v52, %v1191_v16  ;;  %v4147_v35 = vmul.f32 %v5153_v57, %v1191_v16  ;;  %v4150_v29 = vmul.f32 %v5187_v3, %v1191_v16  ;;  %v1499_v41 = vld [vmem:[#allocation2 + $0x64] sm:$0xff]  ;;  %p2332_p1 = pnand %p2331_p0, %p2503_p4 }
 0x1b0   : > { %5274 = vst [vmem:[#allocation34_spill] sm:$0xff] %v4135_v5  ;;  %5275 = vst [vmem:[#allocation233_spill] sm:$0xff] %v4138_v36  ;;  %v4154_v5 = vmul.f32 %v5189_v12, %v1191_v16  ;;  %v4157_v36 = vmul.f32 %v2795_v50, %v1345_v45  ;;  %v1653_v16 = vld [vmem:[#allocation2 + $0x65] sm:$0xff]  ;;  %p2339_p6 = por %p2338_p5, %p2337_p3 }
 0x1b1   : > { %5276 = vst [vmem:[#allocation68_spill] sm:$0xff] %v4141_v9  ;;  %5277 = vst [vmem:[#allocation302_spill] sm:$0xff] %v4144_v17  ;;  %v1077_v18 = vadd.f32 %v5280_v7, %v1057_v48  ;;  %v4160_v9 = vmul.f32 %v5113_v2, %v1345_v45  ;;  %v4163_v17 = vmul.f32 %v5115_v23, %v1345_v45  ;;  %v5287_v7 = vld [vmem:[#allocation124_spill] sm:$0xff]  ;;  %v5288_v2 = vld [vmem:[#allocation27_spill] sm:$0xff]  ;;  %p2333_p2 = pneg %p2332_p1 }
 0x1b2   : > { %5278 = vst [vmem:[#allocation303_spill] sm:$0xff] %v4147_v35  ;;  %5279 = vst [vmem:[#allocation304_spill] sm:$0xff] %v4150_v29  ;;  %v4166_v35 = vmul.f32 %v4959_v47, %v1345_v45  ;;  %v4169_v29 = vmul.f32 %v4961_v25, %v1345_v45  ;;  %v4172_v48 = vmul.f32 %v4963_v27, %v1345_v45 }
 0x1b3   : > { %5281 = vst [vmem:[#allocation85_spill] sm:$0xff] %v4157_v36  ;;  %5282 = vst [vmem:[#allocation305_spill] sm:$0xff] %v4160_v9  ;;  %v1097_v3 = vadd.f32 %v5287_v7, %v1077_v18  ;;  %v4176_v36 = vmul.f32 %v4965_v34, %v1345_v45  ;;  %v4179_v9 = vmul.f32 %v5288_v2, %v1499_v41  ;;  %v4196_v45 = vld [vmem:[#allocation2 + $0x66] sm:$0xff]  ;;  %v5296_v7 = vld [vmem:[#allocation188_spill] sm:$0xff]  ;;  %p2340_p7 = pnand %p2339_p6, %p2333_p2 }
 0x1b4   : > { %5283 = vst [vmem:[#allocation306_spill] sm:$0xff] %v4163_v17  ;;  %5284 = vst [vmem:[#allocation307_spill] sm:$0xff] %v4166_v35  ;;  %v4182_v17 = vmul.f32 %v5120_v15, %v1499_v41  ;;  %v4185_v35 = vmul.f32 %v5124_v11, %v1499_v41  ;;  %v4194_v18 = vmul.f32 %v2997_v56, %v1499_v41  ;;  %v5301_v56 = vld [vmem:[#allocation15_spill] sm:$0xff] }
 0x1b5   : > { %5285 = vst [vmem:[#allocation308_spill] sm:$0xff] %v4169_v29  ;;  %5286 = vst [vmem:[#allocation309_spill] sm:$0xff] %v4172_v48  ;;  %v4188_v29 = vmul.f32 %v2989_v31, %v1499_v41  ;;  %v4191_v48 = vmul.f32 %v2993_v10, %v1499_v41  ;;  %v1117_v2 = vadd.f32 %v5296_v7, %v1097_v3  ;;  %v1044_v31 = vld [vmem:[#allocation2 + $0xd1] sm:$0xff] }
 0x1b6   : > { %5289 = vst [vmem:[#allocation124_spill] sm:$0xff] %v4179_v9  ;;  %5290 = vst [vmem:[#allocation310_spill] sm:$0xff] %v4182_v17  ;;  %v4200_v9 = vmul.f32 %v4974_v0, %v1499_v41  ;;  %v4203_v17 = vmul.f32 %v5127_v1, %v1653_v16  ;;  %v1198_v10 = vld [vmem:[#allocation2 + $0xd2] sm:$0xff]  ;;  %v4215_v3 = vmul.f32 %v5301_v56, %v1653_v16 }
 0x1b7   : > { %5291 = vst [vmem:[#allocation311_spill] sm:$0xff] %v4185_v35  ;;  %5292 = vst [vmem:[#allocation312_spill] sm:$0xff] %v4188_v29  ;;  %v4206_v35 = vmul.f32 %v5232_v58, %v1653_v16  ;;  %v890_v29 = vld [vmem:[#allocation2 + $0xd0] sm:$0xff]  ;;  %v4218_v41 = vmul.f32 %v4983_v55, %v1653_v16  ;;  %v5304_v58 = vld [vmem:[#allocation40_spill] sm:$0xff]  ;;  %v4222_v11 = vmul.f32 %v4985_v21, %v1653_v16 }
 0x1b8   : > { %5293 = vst [vmem:[#allocation313_spill] sm:$0xff] %v4191_v48  ;;  %5294 = vst [vmem:[#allocation314_spill] sm:$0xff] %v4194_v18  ;;  %v4209_v48 = vmul.f32 %v5234_v63, %v1653_v16  ;;  %v4212_v18 = vmul.f32 %v5236_v37, %v1653_v16  ;;  %v1352_v7 = vld [vmem:[#allocation2 + $0xd3] sm:$0xff]  ;;  %v4237_v55 = vmul.f32 %v5179_v60, %v890_v29  ;;  %v5323_v37 = vld [vmem:[#allocation142_spill] sm:$0xff] }
 0x1b9   : > { %5295 = vst [vmem:[#allocation315_spill] sm:$0xff] %v4196_v45  ;;  %5297 = vst [vmem:[#allocation188_spill] sm:$0xff] %v4203_v17  ;;  %v1506_v17 = vld [vmem:[#allocation2 + $0xd4] sm:$0xff] }
 0x1ba   : > { %5298 = vst [vmem:[#allocation316_spill] sm:$0xff] %v4206_v35  ;;  %5299 = vst [vmem:[#allocation317_spill] sm:$0xff] %v4209_v48  ;;  %v1660_v1 = vld [vmem:[#allocation2 + $0xd5] sm:$0xff]  ;;  %v1137_v35 = vadd.f32 %v5304_v58, %v1117_v2  ;;  %v4226_v48 = vmul.f32 %v5134_v20, %v4196_v45  ;;  %v4240_v2 = vmul.f32 %v5184_v33, %v1044_v31 }
 0x1bb   : > { %5300 = vst [vmem:[#allocation318_spill] sm:$0xff] %v4212_v18  ;;  %5302 = vst [vmem:[#allocation319_spill] sm:$0xff] %v4215_v3  ;;  %v4230_v18 = vmul.f32 %v5136_v6, %v4196_v45  ;;  %v1814_v3 = vld [vmem:[#allocation2 + $0xd6] sm:$0xff]  ;;  %v4243_v58 = vmul.f32 %v5189_v12, %v1198_v10  ;;  %v4247_v6 = vmul.f32 %v4965_v34, %v1352_v7 }
 0x1bc   : > { %5303 = vst [vmem:[#allocation320_spill] sm:$0xff] %v4218_v41  ;;  %5305 = vst [vmem:[#allocation40_spill] sm:$0xff] %v4226_v48  ;;  %v884_v56 = vld [vmem:[#allocation2 + $0x70] sm:$0xff]  ;;  %v4234_v41 = vmul.f32 %v5138_v51, %v4196_v45  ;;  %v4253_v45 = vmul.f32 %v4985_v21, %v1660_v1  ;;  %v4256_v29 = vmul.f32 %v5202_v61, %v1814_v3  ;;  %v5312_v20 = vld [vmem:[#allocation36_spill] sm:$0xff] }
 0x1bd   : > { %5306 = vst [vmem:[#allocation321_spill] sm:$0xff] %v4230_v18  ;;  %v5308_v16 = vld [vmem:[#allocation259_spill] sm:$0xff]  ;;  %v4250_v18 = vmul.f32 %v4974_v0, %v1506_v17  ;;  %v902_v31 = vmul.f32 %v5095_v44, %v884_v56  ;;  %v940_v10 = vmul.f32 %v5268_v39, %v884_v56  ;;  %v997_v17 = vmul.f32 %v5312_v20, %v884_v56  ;;  %v2302_v1 = vld [vmem:[%s4739_s6] ss:$0 sm:$0xff]  ;;  %v5335_v63 = vld [vmem:[#allocation184_spill] sm:$0xff] }
 0x1be   : > { %5307 = vst [vmem:[#allocation322_spill] sm:$0xff] %v4234_v41  ;;  %v1157_v48 = vadd.f32 %v5308_v16, %v1137_v35  ;;  %5309 = vst [vmem:[#allocation259_spill] sm:$0xff] %v4253_v45  ;;  %v921_v41 = vmul.f32 %v5267_v19, %v884_v56  ;;  %v959_v35 = vmul.f32 %v5269_v62, %v884_v56  ;;  %v5311_v7 = vld [vmem:[#allocation35_spill] sm:$0xff]  ;;  %v5315_v21 = vld [vmem:[#allocation65_spill] sm:$0xff] }
 0x1bf   : > { %5310 = vst [vmem:[#allocation323_spill] sm:$0xff] %v4256_v29  ;;  %v978_v16 = vmul.f32 %v5311_v7, %v884_v56  ;;  %v910_v45 = vadd.f32 %v2302_v1, %v902_v31  ;;  %v948_v44 = vadd.f32 %v940_v10, %v4102_v22  ;;  %v1016_v19 = vmul.f32 %v5179_v60, %v884_v56  ;;  %v5313_v3 = vld [vmem:[#allocation71_spill] sm:$0xff]  ;;  %v5314_v7 = vld [vmem:[#allocation64_spill] sm:$0xff]  ;;  %v5316_v1 = vld [vmem:[#allocation69_spill] sm:$0xff] }
 0x1c0   : > { %v1177_v51 = vadd.f32 %v1169_v40, %v1157_v48  ;;  %v929_v61 = vadd.f32 %v921_v41, %v4099_v32  ;;  %v967_v40 = vadd.f32 %v959_v35, %v4105_v24  ;;  %v1005_v48 = vadd.f32 %v997_v17, %v4111_v26  ;;  %v4274_v20 = vld [vmem:[#allocation2 + $0x71] sm:$0xff]  ;;  %v5318_v60 = vld [vmem:[#allocation70_spill] sm:$0xff]  ;;  %v5320_v35 = vld [vmem:[#allocation77_spill] sm:$0xff] }
 0x1c1   : > { %v986_v62 = vadd.f32 %v978_v16, %v4108_v4  ;;  %v930_v29 = vadd.f32 %v5314_v7, %v910_v45  ;;  %v968_v32 = vadd.f32 %v5316_v1, %v948_v44  ;;  %v1024_v22 = vadd.f32 %v1016_v19, %v4114_v13  ;;  %v5317_v41 = vld [vmem:[#allocation87_spill] sm:$0xff]  ;;  %v5319_v10 = vld [vmem:[#allocation74_spill] sm:$0xff]  ;;  %v5321_v16 = vld [vmem:[#allocation140_spill] sm:$0xff] }
 0x1c2   : > { %v1211_v39 = vadd.f32 %v5313_v3, %v1177_v51  ;;  %v949_v31 = vadd.f32 %v5315_v21, %v929_v61  ;;  %v987_v51 = vadd.f32 %v5318_v60, %v967_v40  ;;  %v1025_v4 = vadd.f32 %v5320_v35, %v1005_v48  ;;  %v5322_v17 = vld [vmem:[#allocation141_spill] sm:$0xff]  ;;  %v5324_v21 = vld [vmem:[#allocation26_spill] sm:$0xff]  ;;  %v5325_v44 = vld [vmem:[#allocation127_spill] sm:$0xff] }
 0x1c3   : > { %v1006_v24 = vadd.f32 %v5319_v10, %v986_v62  ;;  %v950_v26 = vadd.f32 %v5321_v16, %v930_v29  ;;  %v988_v45 = vadd.f32 %v5323_v37, %v968_v32  ;;  %v1056_v61 = vmul.f32 %v5324_v21, %v4274_v20  ;;  %v5326_v13 = vld [vmem:[#allocation143_spill] sm:$0xff]  ;;  %v5328_v40 = vld [vmem:[#allocation84_spill] sm:$0xff]  ;;  %v5329_v62 = vld [vmem:[#allocation90_spill] sm:$0xff] }
 0x1c4   : > { %v1231_v56 = vadd.f32 %v5317_v41, %v1211_v39  ;;  %v969_v3 = vadd.f32 %v5322_v17, %v949_v31  ;;  %v1007_v19 = vadd.f32 %v5326_v13, %v987_v51  ;;  %v5327_v39 = vld [vmem:[#allocation144_spill] sm:$0xff]  ;;  %v1058_v41 = vadd.f32 %v5328_v40, %v1024_v22  ;;  %v5330_v48 = vld [vmem:[#allocation91_spill] sm:$0xff]  ;;  %v5332_v31 = vld [vmem:[#allocation122_spill] sm:$0xff] }
 0x1c5   : > { %v1026_v1 = vadd.f32 %v5327_v39, %v1006_v24  ;;  %v970_v60 = vadd.f32 %v5329_v62, %v950_v26  ;;  %v5331_v29 = vld [vmem:[#allocation175_spill] sm:$0xff]  ;;  %v1059_v16 = vadd.f32 %v5332_v31, %v1025_v4  ;;  %v5333_v37 = vld [vmem:[#allocation193_spill] sm:$0xff]  ;;  %v5334_v17 = vld [vmem:[#allocation176_spill] sm:$0xff]  ;;  %v1075_v51 = vmul.f32 %v2846_v54, %v4274_v20 }
 0x1c6   : > { %v1251_v7 = vadd.f32 %v5325_v44, %v1231_v56  ;;  %v989_v10 = vadd.f32 %v5330_v48, %v969_v3  ;;  %v1008_v35 = vadd.f32 %v5331_v29, %v988_v45  ;;  %v1027_v21 = vadd.f32 %v5334_v17, %v1007_v19  ;;  %v5336_v24 = vld [vmem:[#allocation238_spill] sm:$0xff]  ;;  %v5337_v22 = vld [vmem:[#allocation239_spill] sm:$0xff]  ;;  %v5338_v26 = vld [vmem:[#allocation37_spill] sm:$0xff] }
 0x1c7   : > { %v1060_v56 = vadd.f32 %v5335_v63, %v1026_v1  ;;  %v990_v44 = vadd.f32 %v5336_v24, %v970_v60  ;;  %v5339_v3 = vld [vmem:[#allocation123_spill] sm:$0xff]  ;;  %v5341_v4 = vld [vmem:[#allocation209_spill] sm:$0xff]  ;;  %v5343_v19 = vld [vmem:[#allocation210_spill] sm:$0xff] }
 0x1c8   : > { %v1271_v32 = vadd.f32 %v5333_v37, %v1251_v7  ;;  %v1009_v13 = vadd.f32 %v5337_v22, %v989_v10  ;;  %v1028_v39 = vadd.f32 %v5338_v26, %v1008_v35  ;;  %v1078_v40 = vadd.f32 %v5339_v3, %v1058_v41  ;;  %v5340_v45 = vld [vmem:[#allocation43_spill] sm:$0xff]  ;;  %v5342_v7 = vld [vmem:[#allocation185_spill] sm:$0xff]  ;;  %v5344_v63 = vld [vmem:[#allocation286_spill] sm:$0xff] }
 0x1c9   : > { %v1061_v48 = vadd.f32 %v5341_v4, %v1027_v21  ;;  %v1079_v29 = vadd.f32 %v5342_v7, %v1059_v16  ;;  %v1080_v31 = vadd.f32 %v5343_v19, %v1060_v56  ;;  %v1010_v1 = vadd.f32 %v5344_v63, %v990_v44  ;;  %v5345_v37 = vld [vmem:[#allocation287_spill] sm:$0xff]  ;;  %v5346_v17 = vld [vmem:[#allocation254_spill] sm:$0xff]  ;;  %v5347_v35 = vld [vmem:[#allocation265_spill] sm:$0xff] }
 0x1ca   : > { %v1291_v62 = vadd.f32 %v5340_v45, %v1271_v32  ;;  %v1029_v54 = vadd.f32 %v5345_v37, %v1009_v13  ;;  %v1062_v60 = vadd.f32 %v5346_v17, %v1028_v39  ;;  %v1094_v10 = vmul.f32 %v2880_v38, %v4274_v20  ;;  %v5348_v41 = vld [vmem:[#allocation255_spill] sm:$0xff]  ;;  %v5351_v56 = vld [vmem:[#allocation29_spill] sm:$0xff]  ;;  %v5352_v13 = vld [vmem:[#allocation256_spill] sm:$0xff] }
 0x1cb   : > { %v1081_v22 = vadd.f32 %v5348_v41, %v1061_v48  ;;  %v5349_v32 = vld [vmem:[#allocation187_spill] sm:$0xff]  ;;  %v1030_v16 = vadd.f32 %v4237_v55, %v1010_v1  ;;  %v1100_v4 = vadd.f32 %v5352_v13, %v1080_v31  ;;  %v5353_v48 = vld [vmem:[#allocation212_spill] sm:$0xff]  ;;  %v5354_v63 = vld [vmem:[#allocation257_spill] sm:$0xff] }
 0x1cc   : > { %v1311_v24 = vadd.f32 %v5347_v35, %v1291_v62  ;;  %v1098_v26 = vadd.f32 %v5349_v32, %v1078_v40  ;;  %v5350_v21 = vld [vmem:[#allocation211_spill] sm:$0xff]  ;;  %v1063_v45 = vadd.f32 %v5351_v56, %v1029_v54  ;;  %v1082_v44 = vadd.f32 %v4118_v14, %v1062_v60  ;;  %v5355_v1 = vld [vmem:[#allocation72_spill] sm:$0xff]  ;;  %v5356_v31 = vld [vmem:[#allocation78_spill] sm:$0xff] }
 0x1cd   : > { %v1099_v3 = vadd.f32 %v5350_v21, %v1079_v29  ;;  %v1101_v38 = vadd.f32 %v4121_v8, %v1081_v22  ;;  %v1113_v62 = vmul.f32 %v2896_v59, %v4274_v20  ;;  %v1064_v40 = vadd.f32 %v1056_v61, %v1030_v16  ;;  %v5357_v17 = vld [vmem:[#allocation79_spill] sm:$0xff]  ;;  %v5358_v59 = vld [vmem:[#allocation80_spill] sm:$0xff]  ;;  %v5361_v32 = vld [vmem:[#allocation81_spill] sm:$0xff] }
 0x1ce   : > { %v1331_v39 = vadd.f32 %v4154_v5, %v1311_v24  ;;  %v1118_v7 = vadd.f32 %v5353_v48, %v1098_v26  ;;  %v1083_v19 = vadd.f32 %v1075_v51, %v1063_v45  ;;  %v1102_v29 = vadd.f32 %v1094_v10, %v1082_v44  ;;  %v5359_v24 = vld [vmem:[#allocation258_spill] sm:$0xff]  ;;  %v5360_v51 = vld [vmem:[#allocation89_spill] sm:$0xff]  ;;  %v5368_v48 = vld [vmem:[#allocation148_spill] sm:$0xff] }
 0x1cf   : > { %v1119_v55 = vadd.f32 %v5354_v63, %v1099_v3  ;;  %v1120_v14 = vadd.f32 %v4124_v42, %v1100_v4  ;;  %v1121_v54 = vadd.f32 %v1113_v62, %v1101_v38  ;;  %v1132_v5 = vmul.f32 %v5147_v30, %v4274_v20  ;;  %v5362_v42 = vld [vmem:[#allocation145_spill] sm:$0xff]  ;;  %v5363_v3 = vld [vmem:[#allocation146_spill] sm:$0xff]  ;;  %v5364_v30 = vld [vmem:[#allocation147_spill] sm:$0xff] }
 0x1d0   : > { %v1365_v37 = vadd.f32 %v5355_v1, %v1331_v39  ;;  %v1084_v8 = vadd.f32 %v5356_v31, %v1064_v40  ;;  %v1103_v60 = vadd.f32 %v5357_v17, %v1083_v19  ;;  %v1122_v35 = vadd.f32 %v5358_v59, %v1102_v29  ;;  %v5365_v44 = vld [vmem:[#allocation130_spill] sm:$0xff]  ;;  %v5366_v4 = vld [vmem:[#allocation33_spill] sm:$0xff] }
 0x1d1   : > { %v1138_v61 = vadd.f32 %v5359_v24, %v1118_v7  ;;  %v1139_v41 = vadd.f32 %v4127_v28, %v1119_v55  ;;  %v1140_v22 = vadd.f32 %v1132_v5, %v1120_v14  ;;  %v1141_v26 = vadd.f32 %v5361_v32, %v1121_v54  ;;  %v5367_v38 = vld [vmem:[#allocation82_spill] sm:$0xff]  ;;  %v5371_v55 = vld [vmem:[#allocation32_spill] sm:$0xff]  ;;  %v5373_v5 = vld [vmem:[#allocation149_spill] sm:$0xff] }
 0x1d2   : > { %v1385_v10 = vadd.f32 %v5360_v51, %v1365_v37  ;;  %v1104_v21 = vadd.f32 %v5362_v42, %v1084_v8  ;;  %v1123_v16 = vadd.f32 %v5363_v3, %v1103_v60  ;;  %v1142_v56 = vadd.f32 %v5364_v30, %v1122_v35  ;;  %v5369_v7 = vld [vmem:[#allocation38_spill] sm:$0xff]  ;;  %v4352_v37 = vld [vmem:[#allocation2 + $0x72] sm:$0xff]  ;;  %v5376_v35 = vld [vmem:[#allocation41_spill] sm:$0xff] }
 0x1d3   : > { %v1151_v45 = vmul.f32 %v5182_v43, %v4274_v20  ;;  %v1158_v39 = vadd.f32 %v5366_v4, %v1138_v61  ;;  %v1160_v62 = vadd.f32 %v5367_v38, %v1140_v22  ;;  %v1161_v28 = vadd.f32 %v5368_v48, %v1141_v26  ;;  %v5370_v19 = vld [vmem:[#allocation66_spill] sm:$0xff]  ;;  %v5372_v14 = vld [vmem:[#allocation196_spill] sm:$0xff]  ;;  %v5374_v8 = vld [vmem:[#allocation63_spill] sm:$0xff] }
 0x1d4   : > { %v1405_v13 = vadd.f32 %v5365_v44, %v1385_v10  ;;  %v1124_v40 = vadd.f32 %v5369_v7, %v1104_v21  ;;  %v1143_v29 = vadd.f32 %v5370_v19, %v1123_v16  ;;  %v1162_v1 = vadd.f32 %v5371_v55, %v1142_v56  ;;  %v5375_v60 = vld [vmem:[#allocation240_spill] sm:$0xff]  ;;  %v5377_v61 = vld [vmem:[#allocation83_spill] sm:$0xff]  ;;  %v5378_v10 = vld [vmem:[#allocation42_spill] sm:$0xff] }
 0x1d5   : > { %v1159_v63 = vadd.f32 %v1151_v45, %v1139_v41  ;;  %v1170_v43 = vmul.f32 %v5184_v33, %v4274_v20  ;;  %v1180_v31 = vadd.f32 %v5373_v5, %v1160_v62  ;;  %v1181_v17 = vadd.f32 %v5374_v8, %v1161_v28  ;;  %v5379_v22 = vld [vmem:[#allocation221_spill] sm:$0xff]  ;;  %v5381_v20 = vld [vmem:[#allocation288_spill] sm:$0xff]  ;;  %v5385_v4 = vld [vmem:[#allocation271_spill] sm:$0xff] }
 0x1d6   : > { %v1425_v54 = vadd.f32 %v5372_v14, %v1405_v13  ;;  %v1144_v59 = vadd.f32 %v5375_v60, %v1124_v40  ;;  %v1163_v24 = vadd.f32 %v5376_v35, %v1143_v29  ;;  %v1182_v41 = vadd.f32 %v5378_v10, %v1162_v1  ;;  %v5380_v21 = vld [vmem:[#allocation189_spill] sm:$0xff]  ;;  %v5386_v62 = vld [vmem:[#allocation86_spill] sm:$0xff]  ;;  %v5387_v28 = vld [vmem:[#allocation260_spill] sm:$0xff] }
 0x1d7   : > { %v1179_v51 = vadd.f32 %v5377_v61, %v1159_v63  ;;  %v1178_v26 = vadd.f32 %v1170_v43, %v1158_v39  ;;  %v1210_v42 = vmul.f32 %v2789_v46, %v4352_v37  ;;  %v1214_v33 = vadd.f32 %v5380_v21, %v1180_v31  ;;  %v5382_v16 = vld [vmem:[#allocation289_spill] sm:$0xff]  ;;  %v5388_v40 = vld [vmem:[#allocation34_spill] sm:$0xff] }
 0x1d8   : > { %v1445_v32 = vadd.f32 %v5379_v22, %v1425_v54  ;;  %v1164_v3 = vadd.f32 %v5381_v20, %v1144_v59  ;;  %v1183_v30 = vadd.f32 %v5382_v16, %v1163_v24  ;;  %v5383_v56 = vld [vmem:[#allocation125_spill] sm:$0xff]  ;;  %v1216_v7 = vadd.f32 %v5387_v28, %v1182_v41  ;;  %v5389_v29 = vld [vmem:[#allocation190_spill] sm:$0xff]  ;;  %v5400_v20 = vld [vmem:[#allocation99_spill] sm:$0xff] }
 0x1d9   : > { %v1213_v45 = vadd.f32 %v5383_v56, %v1179_v51  ;;  %v5384_v44 = vld [vmem:[#allocation213_spill] sm:$0xff]  ;;  %v1212_v48 = vadd.f32 %v5386_v62, %v1178_v26  ;;  %v1229_v39 = vmul.f32 %v2850_v53, %v4352_v37  ;;  %v5390_v55 = vld [vmem:[#allocation214_spill] sm:$0xff]  ;;  %v1248_v53 = vmul.f32 %v2924_v49, %v4352_v37  ;;  %v5396_v51 = vld [vmem:[#allocation192_spill] sm:$0xff] }
 0x1da   : > { %v1215_v13 = vadd.f32 %v5384_v44, %v1181_v17  ;;  %v1465_v38 = vadd.f32 %v5385_v4, %v1445_v32  ;;  %v1184_v46 = vadd.f32 %v4240_v2, %v1164_v3  ;;  %v1217_v19 = vadd.f32 %v5388_v40, %v1183_v30  ;;  %v5391_v54 = vld [vmem:[#allocation126_spill] sm:$0xff]  ;;  %v5392_v5 = vld [vmem:[#allocation261_spill] sm:$0xff]  ;;  %v5394_v2 = vld [vmem:[#allocation215_spill] sm:$0xff] }
 0x1db   : > { %v1233_v63 = vadd.f32 %v5389_v29, %v1213_v45  ;;  %v1234_v1 = vadd.f32 %v5390_v55, %v1214_v33  ;;  %v1232_v43 = vadd.f32 %v5391_v54, %v1212_v48  ;;  %v5393_v8 = vld [vmem:[#allocation233_spill] sm:$0xff]  ;;  %v5397_v41 = vld [vmem:[#allocation262_spill] sm:$0xff]  ;;  %v5402_v30 = vld [vmem:[#allocation216_spill] sm:$0xff] }
 0x1dc   : > { %v1485_v14 = vadd.f32 %v4176_v36, %v1465_v38  ;;  %v1235_v31 = vadd.f32 %v5392_v5, %v1215_v13  ;;  %v1236_v17 = vadd.f32 %v5393_v8, %v1216_v7  ;;  %v1218_v60 = vadd.f32 %v1210_v42, %v1184_v46  ;;  %v5395_v24 = vld [vmem:[#allocation73_spill] sm:$0xff]  ;;  %v5398_v36 = vld [vmem:[#allocation68_spill] sm:$0xff]  ;;  %v5399_v26 = vld [vmem:[#allocation98_spill] sm:$0xff] }
 0x1dd   : > { %v1237_v59 = vadd.f32 %v1229_v39, %v1217_v19  ;;  %v1253_v35 = vadd.f32 %v5394_v2, %v1233_v63  ;;  %v1252_v10 = vadd.f32 %v5396_v51, %v1232_v43  ;;  %v1254_v22 = vadd.f32 %v5397_v41, %v1234_v1  ;;  %v5401_v16 = vld [vmem:[#allocation93_spill] sm:$0xff]  ;;  %v5403_v45 = vld [vmem:[#allocation263_spill] sm:$0xff]  ;;  %v5404_v13 = vld [vmem:[#allocation302_spill] sm:$0xff] }
 0x1de   : > { %v1519_v61 = vadd.f32 %v5395_v24, %v1485_v14  ;;  %v1255_v32 = vadd.f32 %v5398_v36, %v1235_v31  ;;  %v1238_v21 = vadd.f32 %v5399_v26, %v1218_v60  ;;  %v1256_v33 = vadd.f32 %v1248_v53, %v1236_v17  ;;  %v5405_v38 = vld [vmem:[#allocation150_spill] sm:$0xff]  ;;  %v5406_v28 = vld [vmem:[#allocation100_spill] sm:$0xff]  ;;  %v5407_v39 = vld [vmem:[#allocation151_spill] sm:$0xff] }
 0x1df   : > { %v1257_v3 = vadd.f32 %v5400_v20, %v1237_v59  ;;  %v1267_v42 = vmul.f32 %v2928_v52, %v4352_v37  ;;  %v1272_v56 = vadd.f32 %v5402_v30, %v1252_v10  ;;  %v1273_v44 = vadd.f32 %v5403_v45, %v1253_v35  ;;  %v5408_v40 = vld [vmem:[#allocation133_spill] sm:$0xff]  ;;  %v5409_v29 = vld [vmem:[#allocation264_spill] sm:$0xff]  ;;  %v5410_v55 = vld [vmem:[#allocation303_spill] sm:$0xff] }
 0x1e0   : > { %v1539_v49 = vadd.f32 %v5401_v16, %v1519_v61  ;;  %v1274_v4 = vadd.f32 %v5404_v13, %v1254_v22  ;;  %v1258_v62 = vadd.f32 %v5405_v38, %v1238_v21  ;;  %v1276_v7 = vadd.f32 %v5406_v28, %v1256_v33  ;;  %v5411_v14 = vld [vmem:[#allocation24_spill] sm:$0xff]  ;;  %v5412_v43 = vld [vmem:[#allocation101_spill] sm:$0xff]  ;;  %v5414_v17 = vld [vmem:[#allocation67_spill] sm:$0xff] }
 0x1e1   : > { %v1275_v48 = vadd.f32 %v1267_v42, %v1255_v32  ;;  %v1277_v46 = vadd.f32 %v5407_v39, %v1257_v3  ;;  %v1286_v52 = vmul.f32 %v5153_v57, %v4352_v37  ;;  %v1292_v63 = vadd.f32 %v5409_v29, %v1272_v56  ;;  %v5413_v31 = vld [vmem:[#allocation152_spill] sm:$0xff]  ;;  %v5418_v51 = vld [vmem:[#allocation241_spill] sm:$0xff]  ;;  %v5420_v36 = vld [vmem:[#allocation39_spill] sm:$0xff] }
 0x1e2   : > { %v1559_v19 = vadd.f32 %v5408_v40, %v1539_v49  ;;  %v1293_v1 = vadd.f32 %v5410_v55, %v1273_v44  ;;  %v1278_v54 = vadd.f32 %v5411_v14, %v1258_v62  ;;  %v1296_v8 = vadd.f32 %v5413_v31, %v1276_v7  ;;  %v5415_v59 = vld [vmem:[#allocation200_spill] sm:$0xff]  ;;  %v5419_v41 = vld [vmem:[#allocation153_spill] sm:$0xff]  ;;  %v5421_v26 = vld [vmem:[#allocation242_spill] sm:$0xff] }
 0x1e3   : > { %v1295_v5 = vadd.f32 %v5412_v43, %v1275_v48  ;;  %v1297_v60 = vadd.f32 %v5414_v17, %v1277_v46  ;;  %v1294_v2 = vadd.f32 %v1286_v52, %v1274_v4  ;;  %v5416_v35 = vld [vmem:[#allocation44_spill] sm:$0xff]  ;;  %v5422_v33 = vld [vmem:[#allocation226_spill] sm:$0xff]  ;;  %v1324_v49 = vmul.f32 %v5189_v12, %v4352_v37  ;;  %v5426_v4 = vld [vmem:[#allocation45_spill] sm:$0xff] }
 0x1e4   : > { %v1579_v53 = vadd.f32 %v5415_v59, %v1559_v19  ;;  %v1305_v24 = vmul.f32 %v5416_v35, %v4352_v37  ;;  %v5417_v61 = vld [vmem:[#allocation304_spill] sm:$0xff]  ;;  %v1298_v10 = vadd.f32 %v5418_v51, %v1278_v54  ;;  %v1316_v32 = vadd.f32 %v5420_v36, %v1296_v8  ;;  %v5423_v42 = vld [vmem:[#allocation102_spill] sm:$0xff]  ;;  %v5427_v62 = vld [vmem:[#allocation291_spill] sm:$0xff] }
 0x1e5   : > { %v1312_v57 = vadd.f32 %v5417_v61, %v1292_v63  ;;  %v1315_v22 = vadd.f32 %v5419_v41, %v1295_v5  ;;  %v1317_v21 = vadd.f32 %v5421_v26, %v1297_v60  ;;  %v1314_v16 = vadd.f32 %v5423_v42, %v1294_v2  ;;  %v4423_v30 = vld [vmem:[#allocation2 + $0x73] sm:$0xff]  ;;  %v5424_v56 = vld [vmem:[#allocation290_spill] sm:$0xff]  ;;  %v5431_v37 = vld [vmem:[#allocation217_spill] sm:$0xff] }
 0x1e6   : > { %v1599_v20 = vadd.f32 %v5422_v33, %v1579_v53  ;;  %v1313_v3 = vadd.f32 %v1305_v24, %v1293_v1  ;;  %v1318_v45 = vadd.f32 %v5424_v56, %v1298_v10  ;;  %v5425_v44 = vld [vmem:[#allocation22_spill] sm:$0xff]  ;;  %v1336_v38 = vadd.f32 %v5426_v4, %v1316_v32  ;;  %v5428_v28 = vld [vmem:[#allocation275_spill] sm:$0xff]  ;;  %v5433_v54 = vld [vmem:[#allocation88_spill] sm:$0xff] }
 0x1e7   : > { %v1335_v13 = vadd.f32 %v5425_v44, %v1315_v22  ;;  %v1337_v48 = vadd.f32 %v5427_v62, %v1317_v21  ;;  %v1332_v39 = vadd.f32 %v1324_v49, %v1312_v57  ;;  %v5429_v46 = vld [vmem:[#allocation103_spill] sm:$0xff]  ;;  %v5430_v19 = vld [vmem:[#allocation154_spill] sm:$0xff]  ;;  %v1364_v12 = vmul.f32 %v2795_v50, %v4423_v30  ;;  %v5434_v5 = vld [vmem:[#allocation128_spill] sm:$0xff] }
 0x1e8   : > { %v1619_v7 = vadd.f32 %v5428_v28, %v1599_v20  ;;  %v1333_v40 = vadd.f32 %v5429_v46, %v1313_v3  ;;  %v1334_v52 = vadd.f32 %v5430_v19, %v1314_v16  ;;  %v1338_v29 = vadd.f32 %v4243_v58, %v1318_v45  ;;  %v5432_v55 = vld [vmem:[#allocation266_spill] sm:$0xff]  ;;  %v5436_v60 = vld [vmem:[#allocation85_spill] sm:$0xff]  ;;  %v5438_v35 = vld [vmem:[#allocation267_spill] sm:$0xff] }
 0x1e9   : > { %v1369_v63 = vadd.f32 %v5431_v37, %v1335_v13  ;;  %v1370_v1 = vadd.f32 %v5432_v55, %v1336_v38  ;;  %v1366_v43 = vadd.f32 %v5433_v54, %v1332_v39  ;;  %v5435_v8 = vld [vmem:[#allocation194_spill] sm:$0xff]  ;;  %v1371_v59 = vadd.f32 %v5436_v60, %v1337_v48  ;;  %v5439_v24 = vld [vmem:[#allocation75_spill] sm:$0xff]  ;;  %v5440_v57 = vld [vmem:[#allocation129_spill] sm:$0xff] }
 0x1ea   : > { %v1639_v14 = vadd.f32 %v4200_v9, %v1619_v7  ;;  %v1367_v31 = vadd.f32 %v5434_v5, %v1333_v40  ;;  %v1368_v17 = vadd.f32 %v5435_v8, %v1334_v52  ;;  %v1372_v53 = vadd.f32 %v1364_v12, %v1338_v29  ;;  %v5437_v58 = vld [vmem:[#allocation30_spill] sm:$0xff]  ;;  %v5441_v10 = vld [vmem:[#allocation195_spill] sm:$0xff]  ;;  %v5443_v36 = vld [vmem:[#allocation305_spill] sm:$0xff] }
 0x1eb   : > { %v1383_v2 = vmul.f32 %v5437_v58, %v4423_v30  ;;  %v1389_v50 = vadd.f32 %v5438_v35, %v1369_v63  ;;  %v1386_v51 = vadd.f32 %v5440_v57, %v1366_v43  ;;  %v5442_v41 = vld [vmem:[#allocation218_spill] sm:$0xff]  ;;  %v1390_v32 = vadd.f32 %v5443_v36, %v1370_v1  ;;  %v5444_v21 = vld [vmem:[#allocation104_spill] sm:$0xff]  ;;  %v5445_v3 = vld [vmem:[#allocation95_spill] sm:$0xff] }
 0x1ec   : > { %v1673_v61 = vadd.f32 %v5439_v24, %v1639_v14  ;;  %v1387_v9 = vadd.f32 %v5441_v10, %v1367_v31  ;;  %v1388_v22 = vadd.f32 %v5442_v41, %v1368_v17  ;;  %v1392_v33 = vadd.f32 %v5444_v21, %v1372_v53  ;;  %v5446_v16 = vld [vmem:[#allocation46_spill] sm:$0xff]  ;;  %v5447_v56 = vld [vmem:[#allocation219_spill] sm:$0xff]  ;;  %v5448_v44 = vld [vmem:[#allocation268_spill] sm:$0xff] }
 0x1ed   : > { %v1391_v26 = vadd.f32 %v1383_v2, %v1371_v59  ;;  %v1402_v20 = vmul.f32 %v5115_v23, %v4423_v30  ;;  %v1406_v49 = vadd.f32 %v5446_v16, %v1386_v51  ;;  %v5449_v4 = vld [vmem:[#allocation306_spill] sm:$0xff]  ;;  %v5450_v48 = vld [vmem:[#allocation105_spill] sm:$0xff]  ;;  %v5451_v7 = vld [vmem:[#allocation155_spill] sm:$0xff]  ;;  %v1421_v23 = vmul.f32 %v4959_v47, %v4423_v30 }
 0x1ee   : > { %v1693_v42 = vadd.f32 %v5445_v3, %v1673_v61  ;;  %v1407_v45 = vadd.f32 %v5447_v56, %v1387_v9  ;;  %v1408_v13 = vadd.f32 %v5448_v44, %v1388_v22  ;;  %v1409_v38 = vadd.f32 %v5449_v4, %v1389_v50  ;;  %v5452_v46 = vld [vmem:[#allocation136_spill] sm:$0xff]  ;;  %v5454_v29 = vld [vmem:[#allocation269_spill] sm:$0xff]  ;;  %v5455_v37 = vld [vmem:[#allocation307_spill] sm:$0xff] }
 0x1ef   : > { %v1410_v62 = vadd.f32 %v1402_v20, %v1390_v32  ;;  %v1411_v28 = vadd.f32 %v5450_v48, %v1391_v26  ;;  %v1412_v39 = vadd.f32 %v5451_v7, %v1392_v33  ;;  %v5453_v19 = vld [vmem:[#allocation220_spill] sm:$0xff]  ;;  %v5456_v55 = vld [vmem:[#allocation47_spill] sm:$0xff]  ;;  %v5458_v43 = vld [vmem:[#allocation62_spill] sm:$0xff]  ;;  %v1440_v60 = vmul.f32 %v4961_v25, %v4423_v30 }
 0x1f0   : > { %v1713_v40 = vadd.f32 %v5452_v46, %v1693_v42  ;;  %v1426_v52 = vadd.f32 %v5453_v19, %v1406_v49  ;;  %v1427_v12 = vadd.f32 %v5454_v29, %v1407_v45  ;;  %v1428_v63 = vadd.f32 %v5455_v37, %v1408_v13  ;;  %v5457_v14 = vld [vmem:[#allocation156_spill] sm:$0xff]  ;;  %v5460_v59 = vld [vmem:[#allocation270_spill] sm:$0xff]  ;;  %v5462_v2 = vld [vmem:[#allocation157_spill] sm:$0xff] }
 0x1f1   : > { %v1430_v1 = vadd.f32 %v5456_v55, %v1410_v62  ;;  %v1431_v54 = vadd.f32 %v5457_v14, %v1411_v28  ;;  %v1432_v5 = vadd.f32 %v5458_v43, %v1412_v39  ;;  %v5459_v31 = vld [vmem:[#allocation204_spill] sm:$0xff]  ;;  %v1429_v17 = vadd.f32 %v1421_v23, %v1409_v38  ;;  %v5463_v50 = vld [vmem:[#allocation23_spill] sm:$0xff]  ;;  %v5467_v32 = vld [vmem:[#allocation309_spill] sm:$0xff] }
 0x1f2   : > { %v1733_v8 = vadd.f32 %v5459_v31, %v1713_v40  ;;  %v1446_v47 = vadd.f32 %v5460_v59, %v1426_v52  ;;  %v5461_v53 = vld [vmem:[#allocation308_spill] sm:$0xff]  ;;  %v5464_v61 = vld [vmem:[#allocation243_spill] sm:$0xff]  ;;  %v1448_v9 = vadd.f32 %v1440_v60, %v1428_v63  ;;  %v1459_v36 = vmul.f32 %v4963_v27, %v4423_v30  ;;  %v5468_v26 = vld [vmem:[#allocation61_spill] sm:$0xff] }
 0x1f3   : > { %v1447_v58 = vadd.f32 %v5461_v53, %v1427_v12  ;;  %v1450_v35 = vadd.f32 %v5462_v2, %v1430_v1  ;;  %v1451_v24 = vadd.f32 %v5463_v50, %v1431_v54  ;;  %v1452_v57 = vadd.f32 %v5464_v61, %v1432_v5  ;;  %v5465_v51 = vld [vmem:[#allocation231_spill] sm:$0xff]  ;;  %v5466_v41 = vld [vmem:[#allocation48_spill] sm:$0xff]  ;;  %v5471_v16 = vld [vmem:[#allocation198_spill] sm:$0xff] }
 0x1f4   : > { %v1753_v10 = vadd.f32 %v5465_v51, %v1733_v8  ;;  %v1449_v22 = vadd.f32 %v5466_v41, %v1429_v17  ;;  %v1466_v25 = vadd.f32 %v5467_v32, %v1446_v47  ;;  %v5469_v33 = vld [vmem:[#allocation244_spill] sm:$0xff]  ;;  %v5472_v45 = vld [vmem:[#allocation50_spill] sm:$0xff]  ;;  %v1478_v62 = vmul.f32 %v4965_v34, %v4423_v30  ;;  %v5474_v27 = vld [vmem:[#allocation245_spill] sm:$0xff] }
 0x1f5   : > { %v1470_v21 = vadd.f32 %v5468_v26, %v1450_v35  ;;  %v1471_v20 = vadd.f32 %v5469_v33, %v1451_v24  ;;  %v5470_v3 = vld [vmem:[#allocation292_spill] sm:$0xff]  ;;  %v1467_v56 = vadd.f32 %v1459_v36, %v1447_v58  ;;  %v1468_v44 = vadd.f32 %v5472_v45, %v1448_v9  ;;  %v5473_v13 = vld [vmem:[#allocation158_spill] sm:$0xff]  ;;  %v5475_v28 = vld [vmem:[#allocation293_spill] sm:$0xff] }
 0x1f6   : > { %v1472_v42 = vadd.f32 %v5470_v3, %v1452_v57  ;;  %v1773_v49 = vadd.f32 %v5471_v16, %v1753_v10  ;;  %v1469_v4 = vadd.f32 %v5473_v13, %v1449_v22  ;;  %v1500_v38 = vld [vmem:[#allocation2 + $0x74] sm:$0xff]  ;;  %v5478_v29 = vld [vmem:[#allocation53_spill] sm:$0xff]  ;;  %v1486_v37 = vadd.f32 %v1478_v62, %v1466_v25  ;;  %v5484_v31 = vld [vmem:[#allocation222_spill] sm:$0xff] }
 0x1f7   : > { %v1490_v48 = vadd.f32 %v5474_v27, %v1470_v21  ;;  %v1491_v7 = vadd.f32 %v5475_v28, %v1471_v20  ;;  %v5476_v40 = vld [vmem:[#allocation51_spill] sm:$0xff]  ;;  %v5480_v1 = vld [vmem:[#allocation272_spill] sm:$0xff]  ;;  %v5483_v5 = vld [vmem:[#allocation197_spill] sm:$0xff]  ;;  %v1537_v8 = vmul.f32 %v5120_v15, %v1500_v38 }
 0x1f8   : > { %v1492_v39 = vadd.f32 %v4247_v6, %v1472_v42  ;;  %v4494_v46 = vadd.f32 %v4222_v11, %v1773_v49  ;;  %v1487_v23 = vadd.f32 %v5476_v40, %v1467_v56  ;;  %v5477_v19 = vld [vmem:[#allocation159_spill] sm:$0xff]  ;;  %v1489_v12 = vadd.f32 %v5478_v29, %v1469_v4  ;;  %v5481_v30 = vld [vmem:[#allocation124_spill] sm:$0xff]  ;;  %v5486_v47 = vld [vmem:[#allocation310_spill] sm:$0xff] }
 0x1f9   : > { %v1488_v52 = vadd.f32 %v5477_v19, %v1468_v44  ;;  %v5479_v63 = vld [vmem:[#allocation27_spill] sm:$0xff]  ;;  %v1524_v34 = vadd.f32 %v5480_v1, %v1490_v48  ;;  %v1525_v14 = vadd.f32 %v5481_v30, %v1491_v7  ;;  %v5485_v17 = vld [vmem:[#allocation92_spill] sm:$0xff]  ;;  %v5492_v22 = vld [vmem:[#allocation106_spill] sm:$0xff] }
 0x1fa   : > { %v1518_v55 = vmul.f32 %v5479_v63, %v1500_v38  ;;  %v5482_v54 = vld [vmem:[#allocation131_spill] sm:$0xff]  ;;  %v1523_v11 = vadd.f32 %v5484_v31, %v1489_v12  ;;  %v1520_v60 = vadd.f32 %v5485_v17, %v1486_v37  ;;  %v5487_v58 = vld [vmem:[#allocation52_spill] sm:$0xff]  ;;  %v5493_v15 = vld [vmem:[#allocation54_spill] sm:$0xff] }
 0x1fb   : > { %v1521_v43 = vadd.f32 %v5482_v54, %v1487_v23  ;;  %v1522_v6 = vadd.f32 %v5483_v5, %v1488_v52  ;;  %v1544_v53 = vadd.f32 %v5486_v47, %v1524_v34  ;;  %v1556_v2 = vmul.f32 %v5487_v58, %v1500_v38  ;;  %v5488_v35 = vld [vmem:[#allocation31_spill] sm:$0xff]  ;;  %v5491_v9 = vld [vmem:[#allocation132_spill] sm:$0xff]  ;;  %v5495_v33 = vld [vmem:[#allocation273_spill] sm:$0xff] }
 0x1fc   : > { %v1526_v59 = vadd.f32 %v1518_v55, %v1492_v39  ;;  %v5489_v24 = vld [vmem:[#allocation223_spill] sm:$0xff]  ;;  %v1545_v10 = vadd.f32 %v1537_v8, %v1525_v14  ;;  %v1540_v41 = vadd.f32 %v5491_v9, %v1520_v60  ;;  %v1575_v25 = vmul.f32 %v5493_v15, %v1500_v38  ;;  %v5494_v26 = vld [vmem:[#allocation224_spill] sm:$0xff]  ;;  %v5500_v4 = vld [vmem:[#allocation109_spill] sm:$0xff] }
 0x1fd   : > { %v1541_v50 = vadd.f32 %v5488_v35, %v1521_v43  ;;  %v1542_v61 = vadd.f32 %v5489_v24, %v1522_v6  ;;  %v5490_v57 = vld [vmem:[#allocation191_spill] sm:$0xff]  ;;  %v1564_v32 = vadd.f32 %v1556_v2, %v1544_v53  ;;  %v5499_v44 = vld [vmem:[#allocation160_spill] sm:$0xff]  ;;  %v5502_v28 = vld [vmem:[#allocation274_spill] sm:$0xff]  ;;  %v1632_v2 = vmul.f32 %v4974_v0, %v1500_v38 }
 0x1fe   : > { %v1543_v51 = vadd.f32 %v5490_v57, %v1523_v11  ;;  %v1546_v36 = vadd.f32 %v5492_v22, %v1526_v59  ;;  %v5496_v3 = vld [vmem:[#allocation311_spill] sm:$0xff]  ;;  %v5503_v39 = vld [vmem:[#allocation312_spill] sm:$0xff]  ;;  %v5504_v19 = vld [vmem:[#allocation161_spill] sm:$0xff] }
 0x1ff   : > { %v1561_v21 = vadd.f32 %v5494_v26, %v1541_v50  ;;  %v1562_v20 = vadd.f32 %v5495_v33, %v1542_v61  ;;  %v5497_v16 = vld [vmem:[#allocation107_spill] sm:$0xff]  ;;  %v1584_v62 = vadd.f32 %v5500_v4, %v1564_v32  ;;  %v5505_v29 = vld [vmem:[#allocation225_spill] sm:$0xff]  ;;  %v5506_v37 = vld [vmem:[#allocation28_spill] sm:$0xff] }
 0x200   : > { %v1563_v42 = vadd.f32 %v5496_v3, %v1543_v51  ;;  %v1565_v49 = vadd.f32 %v5497_v16, %v1545_v10  ;;  %v5498_v56 = vld [vmem:[#allocation199_spill] sm:$0xff]  ;;  %v1566_v13 = vadd.f32 %v5499_v44, %v1546_v36  ;;  %v5507_v55 = vld [vmem:[#allocation162_spill] sm:$0xff]  ;;  %v5508_v34 = vld [vmem:[#allocation56_spill] sm:$0xff] }
 0x201   : > { %v1560_v45 = vadd.f32 %v5498_v56, %v1540_v41  ;;  %v5501_v27 = vld [vmem:[#allocation55_spill] sm:$0xff]  ;;  %v1581_v7 = vadd.f32 %v5502_v28, %v1561_v21  ;;  %v1582_v40 = vadd.f32 %v5503_v39, %v1562_v20  ;;  %v1604_v1 = vadd.f32 %v5507_v55, %v1584_v62  ;;  %v5509_v14 = vld [vmem:[#allocation313_spill] sm:$0xff]  ;;  %v5510_v5 = vld [vmem:[#allocation110_spill] sm:$0xff] }
 0x202   : > { %v1594_v48 = vmul.f32 %v5501_v27, %v1500_v38  ;;  %v1583_v23 = vadd.f32 %v1575_v25, %v1563_v42  ;;  %v1585_v52 = vadd.f32 %v5504_v19, %v1565_v49  ;;  %v1586_v63 = vadd.f32 %v5506_v37, %v1566_v13  ;;  %v5511_v31 = vld [vmem:[#allocation60_spill] sm:$0xff]  ;;  %v5512_v17 = vld [vmem:[#allocation59_spill] sm:$0xff]  ;;  %v5513_v59 = vld [vmem:[#allocation246_spill] sm:$0xff] }
 0x203   : > { %v1580_v12 = vadd.f32 %v5505_v29, %v1560_v45  ;;  %v1613_v30 = vmul.f32 %v5508_v34, %v1500_v38  ;;  %v1601_v54 = vadd.f32 %v5509_v14, %v1581_v7  ;;  %v1654_v8 = vld [vmem:[#allocation2 + $0x75] sm:$0xff]  ;;  %v5514_v53 = vld [vmem:[#allocation49_spill] sm:$0xff]  ;;  %v5518_v9 = vld [vmem:[#allocation314_spill] sm:$0xff] }
 0x204   : > { %v1602_v43 = vadd.f32 %v1594_v48, %v1582_v40  ;;  %v1603_v6 = vadd.f32 %v5510_v5, %v1583_v23  ;;  %v1605_v11 = vadd.f32 %v5511_v31, %v1585_v52  ;;  %v1606_v47 = vadd.f32 %v5513_v59, %v1586_v63  ;;  %v5515_v50 = vld [vmem:[#allocation111_spill] sm:$0xff]  ;;  %v5519_v22 = vld [vmem:[#allocation294_spill] sm:$0xff]  ;;  %v5520_v32 = vld [vmem:[#allocation248_spill] sm:$0xff] }
 0x205   : > { %v1600_v60 = vadd.f32 %v5512_v17, %v1580_v12  ;;  %v1624_v58 = vadd.f32 %v5514_v53, %v1604_v1  ;;  %v1621_v35 = vadd.f32 %v1613_v30, %v1601_v54  ;;  %v5516_v61 = vld [vmem:[#allocation163_spill] sm:$0xff]  ;;  %v5521_v25 = vld [vmem:[#allocation9_spill] sm:$0xff]  ;;  %v5523_v20 = vld [vmem:[#allocation164_spill] sm:$0xff] }
 0x206   : > { %v1622_v24 = vadd.f32 %v5515_v50, %v1602_v43  ;;  %v1623_v57 = vadd.f32 %v5516_v61, %v1603_v6  ;;  %v5517_v51 = vld [vmem:[#allocation247_spill] sm:$0xff]  ;;  %v1626_v36 = vadd.f32 %v5519_v22, %v1606_v47  ;;  %v1672_v26 = vmul.f32 %v5521_v25, %v1654_v8  ;;  %v5522_v21 = vld [vmem:[#allocation57_spill] sm:$0xff]  ;;  %v5526_v45 = vld [vmem:[#allocation276_spill] sm:$0xff] }
 0x207   : > { %v1625_v10 = vadd.f32 %v5517_v51, %v1605_v11  ;;  %v1620_v41 = vadd.f32 %v5518_v9, %v1600_v60  ;;  %v1644_v15 = vadd.f32 %v5520_v32, %v1624_v58  ;;  %v1641_v33 = vadd.f32 %v5522_v21, %v1621_v35  ;;  %v5524_v0 = vld [vmem:[#allocation177_spill] sm:$0xff]  ;;  %v5525_v42 = vld [vmem:[#allocation295_spill] sm:$0xff]  ;;  %v5528_v62 = vld [vmem:[#allocation134_spill] sm:$0xff] }
 0x208   : > { %v1642_v3 = vadd.f32 %v5523_v20, %v1622_v24  ;;  %v1643_v38 = vadd.f32 %v5524_v0, %v1623_v57  ;;  %v1646_v56 = vadd.f32 %v4250_v18, %v1626_v36  ;;  %v5527_v13 = vld [vmem:[#allocation11_spill] sm:$0xff]  ;;  %v5529_v48 = vld [vmem:[#allocation201_spill] sm:$0xff]  ;;  %v5531_v40 = vld [vmem:[#allocation188_spill] sm:$0xff] }
 0x209   : > { %v1645_v16 = vadd.f32 %v5525_v42, %v1625_v10  ;;  %v1640_v49 = vadd.f32 %v1632_v2, %v1620_v41  ;;  %v1678_v44 = vadd.f32 %v5526_v45, %v1644_v15  ;;  %v1691_v4 = vmul.f32 %v5527_v13, %v1654_v8  ;;  %v5530_v7 = vld [vmem:[#allocation227_spill] sm:$0xff]  ;;  %v5532_v19 = vld [vmem:[#allocation94_spill] sm:$0xff]  ;;  %v5533_v12 = vld [vmem:[#allocation316_spill] sm:$0xff] }
 0x20a   : > { %v1675_v27 = vadd.f32 %v5528_v62, %v1641_v33  ;;  %v1676_v28 = vadd.f32 %v5529_v48, %v1642_v3  ;;  %v1677_v39 = vadd.f32 %v5530_v7, %v1643_v38  ;;  %v1680_v29 = vadd.f32 %v1672_v26, %v1646_v56  ;;  %v5534_v63 = vld [vmem:[#allocation13_spill] sm:$0xff]  ;;  %v5535_v18 = vld [vmem:[#allocation202_spill] sm:$0xff]  ;;  %v5536_v34 = vld [vmem:[#allocation228_spill] sm:$0xff] }
 0x20b   : > { %v1679_v23 = vadd.f32 %v5531_v40, %v1645_v16  ;;  %v1674_v52 = vadd.f32 %v5532_v19, %v1640_v49  ;;  %v1698_v37 = vadd.f32 %v5533_v12, %v1678_v44  ;;  %v1710_v55 = vmul.f32 %v5534_v63, %v1654_v8  ;;  %v5537_v14 = vld [vmem:[#allocation277_spill] sm:$0xff]  ;;  %v5538_v5 = vld [vmem:[#allocation135_spill] sm:$0xff]  ;;  %v5539_v31 = vld [vmem:[#allocation112_spill] sm:$0xff] }
 0x20c   : > { %v1695_v1 = vadd.f32 %v5535_v18, %v1675_v27  ;;  %v1696_v30 = vadd.f32 %v5536_v34, %v1676_v28  ;;  %v1697_v54 = vadd.f32 %v5537_v14, %v1677_v39  ;;  %v1700_v11 = vadd.f32 %v5539_v31, %v1680_v29  ;;  %v5540_v60 = vld [vmem:[#allocation14_spill] sm:$0xff]  ;;  %v5541_v47 = vld [vmem:[#allocation229_spill] sm:$0xff]  ;;  %v5545_v57 = vld [vmem:[#allocation203_spill] sm:$0xff] }
 0x20d   : > { %v1699_v43 = vadd.f32 %v1691_v4, %v1679_v23  ;;  %v1694_v6 = vadd.f32 %v5538_v5, %v1674_v52  ;;  %v1718_v17 = vadd.f32 %v1710_v55, %v1698_v37  ;;  %v1729_v59 = vmul.f32 %v5540_v60, %v1654_v8  ;;  %v5542_v58 = vld [vmem:[#allocation278_spill] sm:$0xff]  ;;  %v5543_v35 = vld [vmem:[#allocation317_spill] sm:$0xff]  ;;  %v5548_v36 = vld [vmem:[#allocation15_spill] sm:$0xff] }
 0x20e   : > { %v1715_v53 = vadd.f32 %v5541_v47, %v1695_v1  ;;  %v1716_v2 = vadd.f32 %v5542_v58, %v1696_v30  ;;  %v1717_v50 = vadd.f32 %v5543_v35, %v1697_v54  ;;  %v5544_v24 = vld [vmem:[#allocation113_spill] sm:$0xff]  ;;  %v5546_v10 = vld [vmem:[#allocation166_spill] sm:$0xff]  ;;  %v1748_v32 = vmul.f32 %v5548_v36, %v1654_v8  ;;  %v5549_v15 = vld [vmem:[#allocation279_spill] sm:$0xff] }
 0x20f   : > { %v1719_v61 = vadd.f32 %v5544_v24, %v1699_v43  ;;  %v1714_v51 = vadd.f32 %v5545_v57, %v1694_v6  ;;  %v1720_v9 = vadd.f32 %v5546_v10, %v1700_v11  ;;  %v5547_v41 = vld [vmem:[#allocation114_spill] sm:$0xff]  ;;  %v5551_v20 = vld [vmem:[#allocation167_spill] sm:$0xff]  ;;  %v5554_v56 = vld [vmem:[#allocation168_spill] sm:$0xff] }
 0x210   : > { %v1738_v22 = vadd.f32 %v5547_v41, %v1718_v17  ;;  %v1735_v25 = vadd.f32 %v5549_v15, %v1715_v53  ;;  %v5550_v26 = vld [vmem:[#allocation318_spill] sm:$0xff]  ;;  %v1737_v33 = vadd.f32 %v1729_v59, %v1717_v50  ;;  %v4575_v0 = vld [vmem:[#allocation2 + $0x76] sm:$0xff]  ;;  %v5560_v19 = vld [vmem:[#allocation249_spill] sm:$0xff] }
 0x211   : > { %v1736_v21 = vadd.f32 %v5550_v26, %v1716_v2  ;;  %v1739_v3 = vadd.f32 %v5551_v20, %v1719_v61  ;;  %v5552_v38 = vld [vmem:[#allocation230_spill] sm:$0xff]  ;;  %v5555_v44 = vld [vmem:[#allocation16_spill] sm:$0xff]  ;;  %v5556_v4 = vld [vmem:[#allocation319_spill] sm:$0xff] }
 0x212   : > { %v1734_v42 = vadd.f32 %v5552_v38, %v1714_v51  ;;  %v5553_v16 = vld [vmem:[#allocation178_spill] sm:$0xff]  ;;  %v1758_v45 = vadd.f32 %v5554_v56, %v1738_v22  ;;  %v1767_v13 = vmul.f32 %v5555_v44, %v1654_v8  ;;  %v1755_v62 = vadd.f32 %v5556_v4, %v1735_v25  ;;  %v5557_v48 = vld [vmem:[#allocation115_spill] sm:$0xff]  ;;  %v5559_v40 = vld [vmem:[#allocation280_spill] sm:$0xff] }
 0x213   : > { %v1740_v49 = vadd.f32 %v5553_v16, %v1720_v9  ;;  %v1756_v27 = vadd.f32 %v1748_v32, %v1736_v21  ;;  %v1757_v28 = vadd.f32 %v5557_v48, %v1737_v33  ;;  %v5558_v7 = vld [vmem:[#allocation179_spill] sm:$0xff]  ;;  %v5561_v29 = vld [vmem:[#allocation17_spill] sm:$0xff]  ;;  %v5562_v37 = vld [vmem:[#allocation10_spill] sm:$0xff] }
 0x214   : > { %v1759_v39 = vadd.f32 %v5558_v7, %v1739_v3  ;;  %v1754_v23 = vadd.f32 %v5559_v40, %v1734_v42  ;;  %v1786_v12 = vmul.f32 %v5561_v29, %v1654_v8  ;;  %v1826_v63 = vmul.f32 %v5562_v37, %v4575_v0  ;;  %v5563_v18 = vld [vmem:[#allocation116_spill] sm:$0xff]  ;;  %v5564_v34 = vld [vmem:[#allocation169_spill] sm:$0xff]  ;;  %v5568_v11 = vld [vmem:[#allocation18_spill] sm:$0xff] }
 0x215   : > { %v1760_v52 = vadd.f32 %v5560_v19, %v1740_v49  ;;  %v1775_v55 = vadd.f32 %v1767_v13, %v1755_v62  ;;  %v1776_v1 = vadd.f32 %v5563_v18, %v1756_v27  ;;  %v1777_v30 = vadd.f32 %v5564_v34, %v1757_v28  ;;  %v5565_v14 = vld [vmem:[#allocation12_spill] sm:$0xff]  ;;  %v5569_v60 = vld [vmem:[#allocation58_spill] sm:$0xff]  ;;  %v5570_v59 = vld [vmem:[#allocation117_spill] sm:$0xff] }
 0x216   : > { %v1845_v54 = vmul.f32 %v5565_v14, %v4575_v0  ;;  %v5566_v43 = vld [vmem:[#allocation320_spill] sm:$0xff]  ;;  %v1864_v17 = vmul.f32 %v5568_v11, %v4575_v0  ;;  %v1778_v8 = vadd.f32 %v5569_v60, %v1758_v45  ;;  %v5571_v53 = vld [vmem:[#allocation250_spill] sm:$0xff]  ;;  %v5573_v50 = vld [vmem:[#allocation25_spill] sm:$0xff] }
 0x217   : > { %v1774_v5 = vadd.f32 %v5566_v43, %v1754_v23  ;;  %v5567_v6 = vld [vmem:[#allocation296_spill] sm:$0xff]  ;;  %v1795_v47 = vadd.f32 %v5570_v59, %v1775_v55  ;;  %v1779_v58 = vadd.f32 %v5571_v53, %v1759_v39  ;;  %v5572_v2 = vld [vmem:[#allocation170_spill] sm:$0xff]  ;;  %v1797_v24 = vadd.f32 %v5573_v50, %v1777_v30  ;;  %v5574_v57 = vld [vmem:[#allocation259_spill] sm:$0xff] }
 0x218   : > { %v1780_v31 = vadd.f32 %v5567_v6, %v1760_v52  ;;  %v1796_v35 = vadd.f32 %v5572_v2, %v1776_v1  ;;  %v5575_v10 = vld [vmem:[#allocation251_spill] sm:$0xff]  ;;  %v5576_v41 = vld [vmem:[#allocation76_spill] sm:$0xff]  ;;  %v5577_v36 = vld [vmem:[#allocation297_spill] sm:$0xff] }
 0x219   : > { %v1794_v61 = vadd.f32 %v1786_v12, %v1774_v5  ;;  %v1798_v9 = vadd.f32 %v5575_v10, %v1778_v8  ;;  %v1827_v22 = vadd.f32 %v5576_v41, %v4494_v46  ;;  %v1799_v32 = vadd.f32 %v5577_v36, %v1779_v58  ;;  %v5578_v15 = vld [vmem:[#allocation137_spill] sm:$0xff]  ;;  %v5580_v33 = vld [vmem:[#allocation232_spill] sm:$0xff]  ;;  %v5585_v4 = vld [vmem:[#allocation206_spill] sm:$0xff] }
 0x21a   : > { %v1800_v51 = vadd.f32 %v5574_v57, %v1780_v31  ;;  %v1829_v25 = vadd.f32 %v5578_v15, %v1795_v47  ;;  %v5579_v26 = vld [vmem:[#allocation205_spill] sm:$0xff]  ;;  %v1831_v20 = vadd.f32 %v5580_v33, %v1797_v24  ;;  %v5581_v38 = vld [vmem:[#allocation96_spill] sm:$0xff]  ;;  %v5586_v46 = vld [vmem:[#allocation234_spill] sm:$0xff] }
 0x21b   : > { %v1830_v21 = vadd.f32 %v5579_v26, %v1796_v35  ;;  %v1828_v42 = vadd.f32 %v5581_v38, %v1794_v61  ;;  %v5582_v16 = vld [vmem:[#allocation281_spill] sm:$0xff]  ;;  %v5584_v44 = vld [vmem:[#allocation40_spill] sm:$0xff]  ;;  %v5587_v48 = vld [vmem:[#allocation282_spill] sm:$0xff] }
 0x21c   : > { %v1834_v3 = vadd.f32 %v1826_v63, %v1800_v51  ;;  %v1832_v49 = vadd.f32 %v5582_v16, %v1798_v9  ;;  %v5583_v56 = vld [vmem:[#allocation97_spill] sm:$0xff]  ;;  %v1833_v13 = vadd.f32 %v5584_v44, %v1799_v32  ;;  %v1849_v62 = vadd.f32 %v5585_v4, %v1829_v25  ;;  %v5588_v7 = vld [vmem:[#allocation138_spill] sm:$0xff]  ;;  %v5591_v29 = vld [vmem:[#allocation139_spill] sm:$0xff] }
 0x21d   : > { %v1847_v45 = vadd.f32 %v5583_v56, %v1827_v22  ;;  %v1850_v27 = vadd.f32 %v5586_v46, %v1830_v21  ;;  %v1851_v28 = vadd.f32 %v5587_v48, %v1831_v20  ;;  %v1848_v39 = vadd.f32 %v5588_v7, %v1828_v42  ;;  %v5589_v40 = vld [vmem:[#allocation321_spill] sm:$0xff]  ;;  %v5590_v19 = vld [vmem:[#allocation118_spill] sm:$0xff]  ;;  %v5592_v63 = vld [vmem:[#allocation235_spill] sm:$0xff] }
 0x21e   : > { %v1852_v23 = vadd.f32 %v5589_v40, %v1832_v49  ;;  %v1854_v52 = vadd.f32 %v5590_v19, %v1834_v3  ;;  %v1853_v37 = vadd.f32 %v1845_v54, %v1833_v13  ;;  %v1869_v55 = vadd.f32 %v5592_v63, %v1849_v62  ;;  %v5593_v18 = vld [vmem:[#allocation283_spill] sm:$0xff]  ;;  %v5594_v34 = vld [vmem:[#allocation322_spill] sm:$0xff]  ;;  %v5600_v54 = vld [vmem:[#allocation208_spill] sm:$0xff] }
 0x21f   : > { %v1867_v12 = vadd.f32 %v5591_v29, %v1847_v45  ;;  %v1870_v1 = vadd.f32 %v5593_v18, %v1850_v27  ;;  %v1871_v30 = vadd.f32 %v5594_v34, %v1851_v28  ;;  %v5595_v14 = vld [vmem:[#allocation207_spill] sm:$0xff]  ;;  %v5601_v2 = vld [vmem:[#allocation284_spill] sm:$0xff]  ;;  %v5607_v25 = vld [vmem:[#allocation237_spill] sm:$0xff] }
 0x220   : > { %v1868_v43 = vadd.f32 %v5595_v14, %v1848_v39  ;;  %v1872_v5 = vadd.f32 %v1864_v17, %v1852_v23  ;;  %v5596_v6 = vld [vmem:[#allocation171_spill] sm:$0xff]  ;;  %v1889_v35 = vadd.f32 %v5601_v2, %v1869_v55  ;;  %v5602_v50 = vld [vmem:[#allocation236_spill] sm:$0xff]  ;;  %v5608_v21 = vld [vmem:[#allocation285_spill] sm:$0xff] }
 0x221   : > { %v1874_v31 = vadd.f32 %v5596_v6, %v1854_v52  ;;  %v5597_v11 = vld [vmem:[#allocation315_spill] sm:$0xff]  ;;  %v1887_v58 = vadd.f32 %v5600_v54, %v1867_v12  ;;  %v5603_v57 = vld [vmem:[#allocation120_spill] sm:$0xff]  ;;  %v5609_v20 = vld [vmem:[#allocation173_spill] sm:$0xff] }
 0x222   : > { %v5598_v60 = vld [vmem:[#allocation19_spill] sm:$0xff]  ;;  %v1888_v24 = vadd.f32 %v5602_v50, %v1868_v43  ;;  %v1892_v51 = vadd.f32 %v5603_v57, %v1872_v5  ;;  %v5604_v17 = vld [vmem:[#allocation180_spill] sm:$0xff]  ;;  %v5611_v56 = vld [vmem:[#allocation121_spill] sm:$0xff] }
 0x223   : > { %v1882_v8 = vmul.f32 %v5598_v60, %v5597_v11  ;;  %v5599_v59 = vld [vmem:[#allocation119_spill] sm:$0xff]  ;;  %v1883_v53 = vmul.f32 %v5598_v60, %v4575_v0  ;;  %v1894_v10 = vadd.f32 %v5604_v17, %v1874_v31  ;;  %v5605_v41 = vld [vmem:[#allocation172_spill] sm:$0xff]  ;;  %v1907_v26 = vadd.f32 %v5607_v25, %v1887_v58  ;;  %v5612_v44 = vld [vmem:[#allocation181_spill] sm:$0xff] }
 0x224   : > { %v1873_v47 = vadd.f32 %v5599_v59, %v1853_v37  ;;  %v5606_v36 = vld [vmem:[#allocation20_spill] sm:$0xff]  ;;  %v1908_v33 = vadd.f32 %v5608_v21, %v1888_v24  ;;  %v1912_v3 = vadd.f32 %v5609_v20, %v1892_v51  ;;  %v5613_v4 = vld [vmem:[#allocation21_spill] sm:$0xff]  ;;  %v5615_v28 = vld [vmem:[#allocation182_spill] sm:$0xff] }
 0x225   : > { %v1890_v61 = vadd.f32 %v1882_v8, %v1870_v1  ;;  %v1891_v9 = vadd.f32 %v1883_v53, %v1871_v30  ;;  %v1901_v32 = vmul.f32 %v5606_v36, %v5597_v11  ;;  %v1902_v15 = vmul.f32 %v5606_v36, %v4575_v0  ;;  %v5610_v38 = vld [vmem:[#allocation252_spill] sm:$0xff]  ;;  %v5617_v23 = vld [vmem:[#allocation174_spill] sm:$0xff]  ;;  %v5618_v52 = vld [vmem:[#allocation253_spill] sm:$0xff] }
 0x226   : > { %v1893_v22 = vadd.f32 %v5605_v41, %v1873_v47  ;;  %v1914_v42 = vadd.f32 %v5610_v38, %v1894_v10  ;;  %v1920_v62 = vmul.f32 %v5613_v4, %v5597_v11  ;;  %v1921_v46 = vmul.f32 %v5613_v4, %v4575_v0  ;;  %v5614_v27 = vld [vmem:[#allocation300_spill] sm:$0xff]  ;;  %v5619_v12 = vld [vmem:[#allocation298_spill] sm:$0xff]  ;;  %v2303_v18 = vld [vmem:[%s4738_s5 + $0x30] ss:$0 sm:$0xff] }
 0x227   : > { %v1909_v16 = vadd.f32 %v1901_v32, %v1889_v35  ;;  %v1910_v49 = vadd.f32 %v1902_v15, %v1890_v61  ;;  %v1911_v45 = vadd.f32 %v5611_v56, %v1891_v9  ;;  %v1927_v48 = vadd.f32 %v5614_v27, %v1907_v26  ;;  %v5616_v39 = vld [vmem:[#allocation108_spill] sm:$0xff]  ;;  %v5621_v30 = vld [vmem:[#allocation165_spill] sm:$0xff]  ;;  %v5622_v43 = vld [vmem:[#allocation186_spill] sm:$0xff] }
 0x228   : > { %v1913_v13 = vadd.f32 %v5612_v44, %v1893_v22  ;;  %v1932_v7 = vadd.f32 %v5615_v28, %v1912_v3  ;;  %v1934_v37 = vadd.f32 %v5619_v12, %v1914_v42  ;;  %v1928_v63 = vadd.f32 %v1920_v62, %v1908_v33  ;;  %v5623_v6 = vld [vmem:[#allocation183_spill] sm:$0xff]  ;;  %v5625_v53 = vld [vmem:[#allocation301_spill] sm:$0xff] }
 0x229   : > { %v1930_v40 = vadd.f32 %v5616_v39, %v1910_v49  ;;  %v1931_v19 = vadd.f32 %v5617_v23, %v1911_v45  ;;  %v1929_v55 = vadd.f32 %v1921_v46, %v1909_v16  ;;  %v1939_v1 = vmul.f32 %v2303_v18, %v5597_v11  ;;  %v5624_v60 = vld [vmem:[#allocation299_spill] sm:$0xff] }
 0x22a   : > { %v1933_v29 = vadd.f32 %v5618_v52, %v1913_v13  ;;  %v1940_v34 = vmul.f32 %v2303_v18, %v4575_v0  ;;  %v1952_v31 = vadd.f32 %v5623_v6, %v1932_v7  ;;  %v5626_v58 = vld [vmem:[#allocation323_spill] sm:$0xff] }
 0x22b   : > { %v1950_v14 = vadd.f32 %v5621_v30, %v1930_v40  ;;  %v1951_v5 = vadd.f32 %v5622_v43, %v1931_v19  ;;  %v1947_v59 = vadd.f32 %v1939_v1, %v1927_v48  ;;  %v1949_v54 = vadd.f32 %v5625_v53, %v1929_v55 }
 0x22c   : > { %v1953_v8 = vadd.f32 %v5624_v60, %v1933_v29  ;;  %v1948_v47 = vadd.f32 %v1940_v34, %v1928_v63  ;;  %v1954_v2 = vadd.f32 %v5626_v58, %v1934_v37  ;;  %1960 = vst.msk [vmem:[%s333_s25 + $0x28] sm:$0xff] %vm442_vm2, %v1952_v31 }
 0x22d   : > { %1958 = vst.msk [vmem:[%s333_s25 + $0x18] sm:$0xff] %vm442_vm2, %v1950_v14  ;;  %1959 = vst.msk [vmem:[%s333_s25 + $0x20] sm:$0xff] %vm442_vm2, %v1951_v5 }
 0x22e   : > { %1961 = vst.msk [vmem:[%s333_s25 + $0x30] sm:$0xff] %vm442_vm2, %v1953_v8  ;;  %1955 = vst.msk [vmem:[%s333_s25] sm:$0xff] %vm442_vm2, %v1947_v59 }
 0x22f   : > { %1956 = vst.msk [vmem:[%s333_s25 + $0x8] sm:$0xff] %vm442_vm2, %v1948_v47  ;;  %1957 = vst.msk [vmem:[%s333_s25 + $0x10] sm:$0xff] %vm442_vm2, %v1949_v54 }
 0x230   : > { %1962 = vst.msk [vmem:[%s333_s25 + $0x38] sm:$0xff] %vm442_vm2, %v1954_v2 }
 0x231   : > { %2343 = shalt.err (!%p2340_p7)
}
 0x232   : > { %s2344_s25 = scalar_lea.hbm %s4675_s22, 1024  ;;  %s2348_s24 = scalar_lea.hbm %s4740_s7, 2048 }
 0x233   : > { %p2345_p9 = scmp.ne.s32.totalorder %s4675_s22, %s2344_s25  ;;  %p2349_p12 = scmp.lt.s32.totalorder %s4675_s22, %s4740_s7 }
 0x234   : > { %p2350_p13 = scmp.lt.s32.totalorder %s2348_s24, %s2344_s25 }
 0x235   : > { %p2346_p10 = pnand %p2345_p9, %p2503_p4 }
 0x236   : > { %p2351_p0 = por %p2350_p13, %p2349_p12 }
 0x237   : > { %p2347_p11 = pneg %p2346_p10 }
 0x239   : > { %p2352_p1 = pnand %p2351_p0, %p2347_p11 }
 0x23b   : > { %2355 = shalt.err (!%p2352_p1)
}
 0x23c   : > { %s5628_s23 = smov 128  }
 0x23d   : > { %2238 = dma.vmem_to_hbm [thread:$0]  (%p2503_p4), %s4677_s14, 1024, %s4675_s22, %s1964_s30, %s5628_s23, %s5628_s23, %s2416_s12  }
 0x23e PF: > { %p2249_p2 = scmp.ge.s32.totalorder %s2410_s10, 2  ;;  %s2017_s20 = sand.u32 1, %s2390_s27  }
 0x23f   : > { %s2018_s26 = scalar_lea.sflag [#allocation4], %s2017_s20 }
 0x240   : > { %p2243_p3 = pnand %p2249_p2, %p2510_p8 }
 0x242   : > { %p2244_p5 = pneg %p2243_p3 }
 0x244   : > { %2381 = dma.done.wait (%p2244_p5), %s2018_s26, 1024  }
 0x245   : > { %2383 = vsyncadd (%p2244_p5), %s2018_s26, 4294966272  ;;  %s2027_s11 = scalar_lea.sflag [#allocation6], %s2017_s20 }
 0x246   : > { %2385 = dma.done.wait (%p2244_p5), %s2027_s11, 1024  }
 0x247   : > { %2387 = vsyncadd (%p2244_p5), %s2027_s11, 4294966272  ;;  %s25_s10 = sadd.s32 1, %s2410_s10   ;;  %s5629_s27 = smov %s2394_s28 }
 0x248   : > { %p22_p6 = scmp.ge.s32.totalorder %s25_s10, 4   ;;  %s5630_s28 = smov %s2398_s29 }
 0x249   : > { %s5631_s29 = smov %s2516_s18  ;;  %s5632_s30 = smov %s2406_s9 }
 0x24a   : > { %s5633_s9 = smov %s5635_s13  ;;  %24 = sbr.rel (!%p22_p6) target bundleno = 6 (0x6), region = 105 }
 0x24f   :  { %2032 = vsyncpa [#allocation4], 1 }
 0x250   :  { %2034 = vsyncpa [#allocation4 + $0x1], 1 }
 0x251   :  { %2035 = vsyncpa [#allocation6], 1 }
 0x252   :  { %2037 = vsyncpa [#allocation6 + $0x1], 1 }

</bundles_post_ra>
